<compile_context>
chip_gen: v6e
topology: v6e:2x2x1
jax: 0.10.0
libtpu: 0.0.40
codegen_flags: <defaults>
</compile_context>

<pallas_src>
import functools

import jax
import jax.numpy as jnp
from jax.experimental import pallas as pl
from jax.experimental.pallas import tpu as pltpu

KSIZE = 5                 # Conv1d kernel size
PAD = 2                   # 'same' padding
CP = 128                  # channel padding width (one full lane register)
CHANNELS = (1, 4, 8, 16)  # c = [1, 4, 8, 16] in the PyTorch module
BN_EPS = 1e-5


# ---------------------------------------------------------------------------
# Fused double-conv Pallas kernel
# ---------------------------------------------------------------------------
def _fused_double_conv_kernel(x_ref, w1_ref, sc1_ref, sh1_ref,
                              w2_ref, sc2_ref, sh2_ref, o_ref, *, seq_len):
    """One grid step: a block of whole sequences flattened to rows.

    x_ref : (rows, 128) f32      rows = (sequences per block) * seq_len
    w?_ref: (5*128, 128) bf16    im2col-folded conv weights of layer ?
    sc?/sh?: (1, 128) f32        folded BN scale / shift (includes conv bias)
    o_ref : (rows, 128) f32
    """
    rows = x_ref.shape[0]
    # Row position inside its own sequence.  Blocks always contain whole
    # sequences, so these masks let one tile carry several batch rows without
    # the conv taps leaking across sequence boundaries.  Computed once per
    # grid step and shared by both conv layers.
    pos = jax.lax.broadcasted_iota(jnp.int32, (rows, 1), 0) % seq_len
    tap_mask = []
    for k in range(KSIZE):
        d = k - PAD
        if d == 0:
            tap_mask.append(None)
        else:
            valid = jnp.logical_and(pos + d >= 0, pos + d < seq_len)
            tap_mask.append(valid.astype(jnp.float32))

    def im2col(x):
        # x: (rows, C) f32 -> (rows, 5*C) f32.  Tap k reads row r + (k - PAD),
        # zero outside each sequence (== the Conv1d zero padding); no halo is
        # ever stored in HBM.
        cin = x.shape[1]
        cols = []
        for k in range(KSIZE):
            d = k - PAD
            if d == 0:
                cols.append(x)
                continue
            if d > 0:
                shifted = jnp.concatenate(
                    [x[d:, :], jnp.zeros((d, cin), x.dtype)], axis=0)
            else:
                shifted = jnp.concatenate(
                    [jnp.zeros((-d, cin), x.dtype), x[:d, :]], axis=0)
            cols.append(shifted * tap_mask[k])
        return jnp.concatenate(cols, axis=1)

    def conv_bn_relu(x, w_ref, sc_ref, sh_ref):
        # Single deep MXU matmul per layer: (rows, 5*128) @ (5*128, 128),
        # bf16 inputs, f32 accumulation, f32 epilogue (folded BN + ReLU).
        acc = jnp.dot(im2col(x).astype(jnp.bfloat16), w_ref[...],
                      preferred_element_type=jnp.float32)
        return jnp.maximum(acc * sc_ref[...] + sh_ref[...], 0.0)

    h = conv_bn_relu(x_ref[...], w1_ref, sc1_ref, sh1_ref)  # stays in VMEM
    y = conv_bn_relu(h, w2_ref, sc2_ref, sh2_ref)
    o_ref[...] = y.astype(o_ref.dtype)


def _pick_batch_block(n_seq, seq_len, target_rows=1024):
    """Sequences per grid step: biggest row block within the budget, but keep
    >=2 grid steps when possible (v7x has 2 TensorCores), and keep the row
    block a multiple of 8 sublanes unless it covers the whole array."""
    nb = max(1, min(n_seq, target_rows // max(seq_len, 1)))
    if n_seq >= 2:
        nb = min(nb, max(1, n_seq // 2))
    while n_seq % nb:
        nb -= 1
    if (nb * seq_len) % 8 != 0 and nb != n_seq:
        nb = n_seq
    return nb


def fused_double_conv(x, layer_params):
    """x: (N, L, 128) f32 channel-padded NLC -> (N, L, 128) f32."""
    (w1, sc1, sh1), (w2, sc2, sh2) = layer_params
    n_seq, seq_len, cp = x.shape
    nb = _pick_batch_block(n_seq, seq_len)
    rows_blk = nb * seq_len
    total_rows = n_seq * seq_len
    x_rows = x.reshape(total_rows, cp)

    kernel = functools.partial(_fused_double_conv_kernel, seq_len=seq_len)
    const = lambda i: (0, 0)  # weights/scales: resident, constant block index
    out = pl.pallas_call(
        kernel,
        out_shape=jax.ShapeDtypeStruct((total_rows, CP), jnp.float32),
        grid_spec=pltpu.PrefetchScalarGridSpec(
            num_scalar_prefetch=0,
            grid=(total_rows // rows_blk,),
            in_specs=[
                pl.BlockSpec((rows_blk, cp), lambda i: (i, 0)),
                pl.BlockSpec(w1.shape, const),
                pl.BlockSpec(sc1.shape, const),
                pl.BlockSpec(sh1.shape, const),
                pl.BlockSpec(w2.shape, const),
                pl.BlockSpec(sc2.shape, const),
                pl.BlockSpec(sh2.shape, const),
            ],
            out_specs=pl.BlockSpec((rows_blk, CP), lambda i: (i, 0)),
        ),
        compiler_params=pltpu.CompilerParams(
            dimension_semantics=("parallel",),
            vmem_limit_bytes=32 * 1024 * 1024,
        ),
    )(x_rows, w1, sc1, sh1, w2, sc2, sh2)
    return out.reshape(n_seq, seq_len, CP)


# ---------------------------------------------------------------------------
# Plain-JAX glue between the Pallas conv blocks (NLC, channel-padded to 128)
# ---------------------------------------------------------------------------
def maxpool2_nlc(x):
    n, l, c = x.shape
    l2 = l // 2
    return jnp.max(x[:, :l2 * 2].reshape(n, l2, 2, c), axis=2)


def conv_transpose2_nlc(x, w0, w1, b):
    # ConvTranspose1d(k=2, s=2): out[:, 2l + j, :] = x[:, l, :] @ w_j + b
    n, l, cp = x.shape
    y0 = x @ w0 + b
    y1 = x @ w1 + b
    return jnp.stack([y0, y1], axis=2).reshape(n, 2 * l, cp)


def pad_length(x, target_len):
    diff = target_len - x.shape[1]
    if diff == 0:
        return x
    return jnp.pad(x, ((0, 0), (diff // 2, diff - diff // 2), (0, 0)))


def concat_channels(a, ca, b, cb):
    n, l, cp = a.shape
    out = jnp.zeros((n, l, cp), a.dtype)
    out = out.at[..., :ca].set(a[..., :ca])
    out = out.at[..., ca:ca + cb].set(b[..., :cb])
    return out


# ---------------------------------------------------------------------------
# Parameters (deterministic), BN folding and kernel-side packing
# ---------------------------------------------------------------------------
def _rand_conv_bn(key, c_in, c_out):
    kw, kb, kg, kbe, km, kv = jax.random.split(key, 6)
    return dict(
        w=0.1 * jax.random.normal(kw, (c_out, c_in, KSIZE), jnp.float32),
        b=0.1 * jax.random.normal(kb, (c_out,), jnp.float32),
        gamma=1.0 + 0.1 * jax.random.normal(kg, (c_out,), jnp.float32),
        beta=0.1 * jax.random.normal(kbe, (c_out,), jnp.float32),
        mean=0.1 * jax.random.normal(km, (c_out,), jnp.float32),
        var=1.0 + 0.1 * jax.random.uniform(kv, (c_out,), jnp.float32),
    )


def make_raw_params(key):
    ks = iter(jax.random.split(key, 16))
    c = CHANNELS

    def block(c_in, c_out):
        return {'l1': _rand_conv_bn(next(ks), c_in, c_out),
                'l2': _rand_conv_bn(next(ks), c_out, c_out)}

    raw = {'conv1': block(c[0], c[1]),
           'conv2': block(c[1], c[2]),
           'conv3': block(c[2], c[3])}
    for name, (ci, co) in (('up1', (c[3], c[2])), ('up2', (c[2], c[1]))):
        kw, kb = jax.random.split(next(ks))
        raw[name] = {'wt': 0.1 * jax.random.normal(kw, (ci, co, 2), jnp.float32),
                     'bt': 0.1 * jax.random.normal(kb, (co,), jnp.float32),
                     'conv': block(ci, co)}
    kw, kb = jax.random.split(next(ks))
    raw['final_w'] = 0.1 * jax.random.normal(kw, (c[0], c[1], 1), jnp.float32)
    raw['final_b'] = 0.1 * jax.random.normal(kb, (c[0],), jnp.float32)
    return raw


def _pack_conv_layer(w, scale, shift):
    # PyTorch Conv1d weight (C_out, C_in, K) -> im2col-folded (K*128, 128)
    # bf16, zero-padded to the 128-lane width.  Padded output channels get
    # scale = shift = 0 so padded lanes stay exactly zero downstream.
    c_out, c_in, k = w.shape
    w_pad = jnp.zeros((k, CP, CP), jnp.float32)
    w_pad = w_pad.at[:, :c_in, :c_out].set(jnp.transpose(w, (2, 1, 0)))
    sc = jnp.zeros((1, CP), jnp.float32).at[0, :c_out].set(scale)
    sh = jnp.zeros((1, CP), jnp.float32).at[0, :c_out].set(shift)
    return w_pad.reshape(k * CP, CP).astype(jnp.bfloat16), sc, sh


def _fold_bn_layer(p):
    scale = p['gamma'] / jnp.sqrt(p['var'] + BN_EPS)
    shift = p['beta'] + scale * (p['b'] - p['mean'])
    return _pack_conv_layer(p['w'], scale, shift)


def _pack_transpose(wt, bt):
    c_in, c_out, _ = wt.shape
    w0 = jnp.zeros((CP, CP), jnp.float32).at[:c_in, :c_out].set(wt[:, :, 0])
    w1 = jnp.zeros((CP, CP), jnp.float32).at[:c_in, :c_out].set(wt[:, :, 1])
    b = jnp.zeros((CP,), jnp.float32).at[:c_out].set(bt)
    return w0, w1, b


def prepare_params(raw):
    def block(blk):
        return (_fold_bn_layer(blk['l1']), _fold_bn_layer(blk['l2']))

    dev = {'conv1': block(raw['conv1']),
           'conv2': block(raw['conv2']),
           'conv3': block(raw['conv3']),
           'up1_conv': block(raw['up1']['conv']),
           'up2_conv': block(raw['up2']['conv']),
           'final_w': raw['final_w'],
           'final_b': raw['final_b']}
    dev['up1_w0'], dev['up1_w1'], dev['up1_b'] = _pack_transpose(
        raw['up1']['wt'], raw['up1']['bt'])
    dev['up2_w0'], dev['up2_w1'], dev['up2_b'] = _pack_transpose(
        raw['up2']['wt'], raw['up2']['bt'])
    return dev


# ---------------------------------------------------------------------------
# Full IntervalsModel forward (Pallas path)
# ---------------------------------------------------------------------------
def intervals_model_forward(x, dev):
    """x: (B, sampleLen) f32 -> (B, sampleLen) f32.  Mirrors IntervalsModel."""
    bsz, length = x.shape
    c = CHANNELS
    # expandDim + NCL->NLC + channel pad to the 128-lane width, done once.
    h = jnp.zeros((bsz, length, CP), jnp.float32).at[:, :, 0].set(x)

    x1 = fused_double_conv(h, dev['conv1'])                  # 4 real channels
    x2 = fused_double_conv(maxpool2_nlc(x1), dev['conv2'])   # 8
    x3 = fused_double_conv(maxpool2_nlc(x2), dev['conv3'])   # 16

    u = conv_transpose2_nlc(x3, dev['up1_w0'], dev['up1_w1'], dev['up1_b'])
    u = pad_length(u, x2.shape[1])
    y = fused_double_conv(concat_channels(x2, c[2], u, c[2]), dev['up1_conv'])

    u = conv_transpose2_nlc(y, dev['up2_w0'], dev['up2_w1'], dev['up2_b'])
    u = pad_length(u, x1.shape[1])
    y = fused_double_conv(concat_channels(x1, c[1], u, c[1]), dev['up2_conv'])

    # final Conv1d(4 -> 1, kernel_size=1) + Flatten(0, 1)
    out = jnp.einsum('nlc,c->nl', y[..., :c[1]], dev['final_w'][0, :, 0])
    return out + dev['final_b'][0]


# ---------------------------------------------------------------------------
# Pure-JAX reference (f32, NCL like PyTorch) for a tolerance check
# ---------------------------------------------------------------------------
def _ref_conv1d(x, w, b, padding):
    y = jax.lax.conv_general_dilated(
        x, w, window_strides=(1,), padding=[(padding, padding)],
        dimension_numbers=('NCH', 'OIH', 'NCH'))
    return y + b[None, :, None]


def _ref_block(x, blk):
    for p in (blk['l1'], blk['l2']):
        x = _ref_conv1d(x, p['w'], p['b'], PAD)
        x = ((x - p['mean'][None, :, None])
             / jnp.sqrt(p['var'][None, :, None] + BN_EPS)
             * p['gamma'][None, :, None] + p['beta'][None, :, None])
        x = jnp.maximum(x, 0.0)
    return x


def _ref_maxpool(x):
    n, c, l = x.shape
    return jnp.max(x[:, :, :(l // 2) * 2].reshape(n, c, l // 2, 2), axis=3)


def _ref_up(x1, x2, up):
    y = jnp.einsum('nil,ioj->nolj', x1, up['wt'])
    y = y.reshape(y.shape[0], y.shape[1], -1) + up['bt'][None, :, None]
    diff = x2.shape[2] - y.shape[2]
    y = jnp.pad(y, ((0, 0), (0, 0), (diff // 2, diff - diff // 2)))
    return _ref_block(jnp.concatenate([x2, y], axis=1), up['conv'])


def intervals_model_reference(x, raw):
    xin = x[:, None, :]                              # expandDim: (B, 1, L)
    x1 = _ref_block(xin, raw['conv1'])
    x2 = _ref_block(_ref_maxpool(x1), raw['conv2'])
    x3 = _ref_block(_ref_maxpool(x2), raw['conv3'])
    y = _ref_up(x3, x2, raw['up1'])
    y = _ref_up(y, x1, raw['up2'])
    y = _ref_conv1d(y, raw['final_w'], raw['final_b'], 0)
    return y[:, 0, :]                                # Flatten(0, 1)


if __name__ == "__main__":
    key = jax.random.PRNGKey(0)
    k_x, k_p = jax.random.split(key)

    BATCH, SAMPLE_LEN = 2, 16
    x = jax.random.normal(k_x, (BATCH, SAMPLE_LEN), jnp.float32)

    raw = make_raw_params(k_p)
    dev = prepare_params(raw)

    fwd = jax.jit(intervals_model_forward)
    out = jax.block_until_ready(fwd(x, dev))
    assert out.shape == (BATCH, SAMPLE_LEN), out.shape

    ref = jax.block_until_ready(intervals_model_reference(x, raw))
    err = float(jnp.max(jnp.abs(out - ref)))
    tol = 5e-2 * (1.0 + float(jnp.max(jnp.abs(ref))))
    assert err < tol, f"mismatch vs reference: max abs err {err} (tol {tol})"
    print("KERNEL_OK")
</pallas_src>

<mosaic_0001>
module attributes {stable_mosaic.version = 11 : i64} {
  func.func @_fused_double_conv_kernel(%arg0: i32, %arg1: memref<16x128xf32, #tpu.memory_space<vmem>>, %arg2: memref<640x128xbf16, #tpu.memory_space<vmem>>, %arg3: memref<1x128xf32, #tpu.memory_space<vmem>>, %arg4: memref<1x128xf32, #tpu.memory_space<vmem>>, %arg5: memref<640x128xbf16, #tpu.memory_space<vmem>>, %arg6: memref<1x128xf32, #tpu.memory_space<vmem>>, %arg7: memref<1x128xf32, #tpu.memory_space<vmem>>, %arg8: memref<16x128xf32, #tpu.memory_space<vmem>>) attributes {dimension_semantics = [#tpu.dimension_semantics<parallel>], iteration_bounds = array<i64: 2>, scalar_prefetch = 0 : i64, scratch_operands = 0 : i64, tpu.core_type = #tpu.core_type<tc>, window_params = [{transform_indices = @transform_0, window_bounds = array<i64: 16, 128>}, {pipeline_mode = #tpu.pipeline_mode<synchronous>, transform_indices = @transform_1, window_bounds = array<i64: 640, 128>}, {pipeline_mode = #tpu.pipeline_mode<synchronous>, transform_indices = @transform_2, window_bounds = array<i64: 1, 128>}, {pipeline_mode = #tpu.pipeline_mode<synchronous>, transform_indices = @transform_3, window_bounds = array<i64: 1, 128>}, {pipeline_mode = #tpu.pipeline_mode<synchronous>, transform_indices = @transform_4, window_bounds = array<i64: 640, 128>}, {pipeline_mode = #tpu.pipeline_mode<synchronous>, transform_indices = @transform_5, window_bounds = array<i64: 1, 128>}, {pipeline_mode = #tpu.pipeline_mode<synchronous>, transform_indices = @transform_6, window_bounds = array<i64: 1, 128>}, {transform_indices = @transform_7, window_bounds = array<i64: 16, 128>}]} {
    %0 = tpu.iota {dimensions = array<i32: 0>} : vector<16x1xi32>
    %c16_i32 = arith.constant 16 : i32
    %c0_i32 = arith.constant 0 : i32
    %1 = arith.cmpi eq, %c16_i32, %c0_i32 : i32
    %c1_i32 = arith.constant 1 : i32
    %2 = arith.select %1, %c1_i32, %c16_i32 : i32
    %3 = vector.broadcast %2 : i32 to vector<16x1xi32>
    %4 = arith.remsi %0, %3 : vector<16x1xi32>
    %c0_i32_0 = arith.constant 0 : i32
    %5 = vector.broadcast %c0_i32_0 : i32 to vector<16x1xi32>
    %6 = arith.cmpi ne, %4, %5 : vector<16x1xi32>
    %c0_i32_1 = arith.constant 0 : i32
    %7 = vector.broadcast %c0_i32_1 : i32 to vector<16x1xi32>
    %8 = arith.cmpi slt, %4, %7 : vector<16x1xi32>
    %c0_i32_2 = arith.constant 0 : i32
    %9 = arith.cmpi slt, %2, %c0_i32_2 : i32
    %10 = vector.broadcast %9 : i1 to vector<16x1xi1>
    %11 = vector.broadcast %10 : vector<16x1xi1> to vector<16x1xi1>
    %12 = arith.xori %8, %11 : vector<16x1xi1>
    %13 = arith.andi %12, %6 : vector<16x1xi1>
    %14 = vector.broadcast %2 : i32 to vector<16x1xi32>
    %15 = arith.addi %4, %14 : vector<16x1xi32>
    %16 = arith.select %13, %15, %4 : vector<16x1xi1>, vector<16x1xi32>
    %c-2_i32 = arith.constant -2 : i32
    %17 = vector.broadcast %c-2_i32 : i32 to vector<16x1xi32>
    %18 = arith.addi %16, %17 : vector<16x1xi32>
    %c0_i32_3 = arith.constant 0 : i32
    %19 = vector.broadcast %c0_i32_3 : i32 to vector<16x1xi32>
    %20 = arith.cmpi sge, %18, %19 : vector<16x1xi32>
    %c-2_i32_4 = arith.constant -2 : i32
    %21 = vector.broadcast %c-2_i32_4 : i32 to vector<16x1xi32>
    %22 = arith.addi %16, %21 : vector<16x1xi32>
    %c16_i32_5 = arith.constant 16 : i32
    %23 = vector.broadcast %c16_i32_5 : i32 to vector<16x1xi32>
    %24 = arith.cmpi slt, %22, %23 : vector<16x1xi32>
    %25 = arith.andi %20, %24 : vector<16x1xi1>
    %26 = arith.extui %25 : vector<16x1xi1> to vector<16x1xi32>
    %27 = arith.sitofp %26 : vector<16x1xi32> to vector<16x1xf32>
    %c-1_i32 = arith.constant -1 : i32
    %28 = vector.broadcast %c-1_i32 : i32 to vector<16x1xi32>
    %29 = arith.addi %16, %28 : vector<16x1xi32>
    %c0_i32_6 = arith.constant 0 : i32
    %30 = vector.broadcast %c0_i32_6 : i32 to vector<16x1xi32>
    %31 = arith.cmpi sge, %29, %30 : vector<16x1xi32>
    %c-1_i32_7 = arith.constant -1 : i32
    %32 = vector.broadcast %c-1_i32_7 : i32 to vector<16x1xi32>
    %33 = arith.addi %16, %32 : vector<16x1xi32>
    %c16_i32_8 = arith.constant 16 : i32
    %34 = vector.broadcast %c16_i32_8 : i32 to vector<16x1xi32>
    %35 = arith.cmpi slt, %33, %34 : vector<16x1xi32>
    %36 = arith.andi %31, %35 : vector<16x1xi1>
    %37 = arith.extui %36 : vector<16x1xi1> to vector<16x1xi32>
    %38 = arith.sitofp %37 : vector<16x1xi32> to vector<16x1xf32>
    %c1_i32_9 = arith.constant 1 : i32
    %39 = vector.broadcast %c1_i32_9 : i32 to vector<16x1xi32>
    %40 = arith.addi %16, %39 : vector<16x1xi32>
    %c0_i32_10 = arith.constant 0 : i32
    %41 = vector.broadcast %c0_i32_10 : i32 to vector<16x1xi32>
    %42 = arith.cmpi sge, %40, %41 : vector<16x1xi32>
    %c1_i32_11 = arith.constant 1 : i32
    %43 = vector.broadcast %c1_i32_11 : i32 to vector<16x1xi32>
    %44 = arith.addi %16, %43 : vector<16x1xi32>
    %c16_i32_12 = arith.constant 16 : i32
    %45 = vector.broadcast %c16_i32_12 : i32 to vector<16x1xi32>
    %46 = arith.cmpi slt, %44, %45 : vector<16x1xi32>
    %47 = arith.andi %42, %46 : vector<16x1xi1>
    %48 = arith.extui %47 : vector<16x1xi1> to vector<16x1xi32>
    %49 = arith.sitofp %48 : vector<16x1xi32> to vector<16x1xf32>
    %c2_i32 = arith.constant 2 : i32
    %50 = vector.broadcast %c2_i32 : i32 to vector<16x1xi32>
    %51 = arith.addi %16, %50 : vector<16x1xi32>
    %c0_i32_13 = arith.constant 0 : i32
    %52 = vector.broadcast %c0_i32_13 : i32 to vector<16x1xi32>
    %53 = arith.cmpi sge, %51, %52 : vector<16x1xi32>
    %c2_i32_14 = arith.constant 2 : i32
    %54 = vector.broadcast %c2_i32_14 : i32 to vector<16x1xi32>
    %55 = arith.addi %16, %54 : vector<16x1xi32>
    %c16_i32_15 = arith.constant 16 : i32
    %56 = vector.broadcast %c16_i32_15 : i32 to vector<16x1xi32>
    %57 = arith.cmpi slt, %55, %56 : vector<16x1xi32>
    %58 = arith.andi %53, %57 : vector<16x1xi1>
    %59 = arith.extui %58 : vector<16x1xi1> to vector<16x1xi32>
    %60 = arith.sitofp %59 : vector<16x1xi32> to vector<16x1xf32>
    %c0 = arith.constant 0 : index
    %c0_16 = arith.constant 0 : index
    %61 = vector.load %arg1[%c0, %c0_16] : memref<16x128xf32, #tpu.memory_space<vmem>>, vector<16x128xf32>
    %cst = arith.constant 0.000000e+00 : f32
    %62 = vector.broadcast %cst : f32 to vector<2x128xf32>
    %63 = vector.extract_strided_slice %61 {offsets = [0, 0], sizes = [14, 128], strides = [1, 1]} : vector<16x128xf32> to vector<14x128xf32>
    %64 = tpu.concatenate %62, %63 in 0 : vector<2x128xf32>, vector<14x128xf32> -> vector<16x128xf32>
    %65 = vector.broadcast %27 : vector<16x1xf32> to vector<16x128xf32>
    %66 = arith.mulf %64, %65 : vector<16x128xf32>
    %cst_17 = arith.constant 0.000000e+00 : f32
    %67 = vector.broadcast %cst_17 : f32 to vector<1x128xf32>
    %68 = vector.extract_strided_slice %61 {offsets = [0, 0], sizes = [15, 128], strides = [1, 1]} : vector<16x128xf32> to vector<15x128xf32>
    %69 = tpu.concatenate %67, %68 in 0 : vector<1x128xf32>, vector<15x128xf32> -> vector<16x128xf32>
    %70 = vector.broadcast %38 : vector<16x1xf32> to vector<16x128xf32>
    %71 = arith.mulf %69, %70 : vector<16x128xf32>
    %72 = vector.extract_strided_slice %61 {offsets = [1, 0], sizes = [15, 128], strides = [1, 1]} : vector<16x128xf32> to vector<15x128xf32>
    %cst_18 = arith.constant 0.000000e+00 : f32
    %73 = vector.broadcast %cst_18 : f32 to vector<1x128xf32>
    %74 = tpu.concatenate %72, %73 in 0 : vector<15x128xf32>, vector<1x128xf32> -> vector<16x128xf32>
    %75 = vector.broadcast %49 : vector<16x1xf32> to vector<16x128xf32>
    %76 = arith.mulf %74, %75 : vector<16x128xf32>
    %77 = vector.extract_strided_slice %61 {offsets = [2, 0], sizes = [14, 128], strides = [1, 1]} : vector<16x128xf32> to vector<14x128xf32>
    %cst_19 = arith.constant 0.000000e+00 : f32
    %78 = vector.broadcast %cst_19 : f32 to vector<2x128xf32>
    %79 = tpu.concatenate %77, %78 in 0 : vector<14x128xf32>, vector<2x128xf32> -> vector<16x128xf32>
    %80 = vector.broadcast %60 : vector<16x1xf32> to vector<16x128xf32>
    %81 = arith.mulf %79, %80 : vector<16x128xf32>
    %82 = tpu.concatenate %66, %71, %61, %76, %81 in 1 : vector<16x128xf32>, vector<16x128xf32>, vector<16x128xf32>, vector<16x128xf32>, vector<16x128xf32> -> vector<16x640xf32>
    %83 = arith.truncf %82 : vector<16x640xf32> to vector<16x640xbf16>
    %c0_20 = arith.constant 0 : index
    %c0_21 = arith.constant 0 : index
    %84 = vector.load %arg2[%c0_20, %c0_21] : memref<640x128xbf16, #tpu.memory_space<vmem>>, vector<640x128xbf16>
    %cst_22 = arith.constant dense<0.000000e+00> : vector<16x128xf32>
    %85 = tpu.matmul %83, %84, %cst_22 {dimension_numbers = #tpu.dot_dimension_numbers<[1], [0], [0], [1], [0, 0, 1, 1], [], []>} : vector<16x640xbf16>, vector<640x128xbf16>, vector<16x128xf32> -> vector<16x128xf32>
    %c0_23 = arith.constant 0 : index
    %c0_24 = arith.constant 0 : index
    %86 = vector.load %arg3[%c0_23, %c0_24] : memref<1x128xf32, #tpu.memory_space<vmem>>, vector<1x128xf32>
    %87 = vector.broadcast %86 : vector<1x128xf32> to vector<16x128xf32>
    %88 = arith.mulf %85, %87 : vector<16x128xf32>
    %c0_25 = arith.constant 0 : index
    %c0_26 = arith.constant 0 : index
    %89 = vector.load %arg4[%c0_25, %c0_26] : memref<1x128xf32, #tpu.memory_space<vmem>>, vector<1x128xf32>
    %90 = vector.broadcast %89 : vector<1x128xf32> to vector<16x128xf32>
    %91 = arith.addf %88, %90 : vector<16x128xf32>
    %cst_27 = arith.constant 0.000000e+00 : f32
    %92 = vector.broadcast %cst_27 : f32 to vector<16x128xf32>
    %93 = arith.maximumf %91, %92 : vector<16x128xf32>
    %cst_28 = arith.constant 0.000000e+00 : f32
    %94 = vector.broadcast %cst_28 : f32 to vector<2x128xf32>
    %95 = vector.extract_strided_slice %93 {offsets = [0, 0], sizes = [14, 128], strides = [1, 1]} : vector<16x128xf32> to vector<14x128xf32>
    %96 = tpu.concatenate %94, %95 in 0 : vector<2x128xf32>, vector<14x128xf32> -> vector<16x128xf32>
    %97 = vector.broadcast %27 : vector<16x1xf32> to vector<16x128xf32>
    %98 = arith.mulf %96, %97 : vector<16x128xf32>
    %cst_29 = arith.constant 0.000000e+00 : f32
    %99 = vector.broadcast %cst_29 : f32 to vector<1x128xf32>
    %100 = vector.extract_strided_slice %93 {offsets = [0, 0], sizes = [15, 128], strides = [1, 1]} : vector<16x128xf32> to vector<15x128xf32>
    %101 = tpu.concatenate %99, %100 in 0 : vector<1x128xf32>, vector<15x128xf32> -> vector<16x128xf32>
    %102 = vector.broadcast %38 : vector<16x1xf32> to vector<16x128xf32>
    %103 = arith.mulf %101, %102 : vector<16x128xf32>
    %104 = vector.extract_strided_slice %93 {offsets = [1, 0], sizes = [15, 128], strides = [1, 1]} : vector<16x128xf32> to vector<15x128xf32>
    %cst_30 = arith.constant 0.000000e+00 : f32
    %105 = vector.broadcast %cst_30 : f32 to vector<1x128xf32>
    %106 = tpu.concatenate %104, %105 in 0 : vector<15x128xf32>, vector<1x128xf32> -> vector<16x128xf32>
    %107 = vector.broadcast %49 : vector<16x1xf32> to vector<16x128xf32>
    %108 = arith.mulf %106, %107 : vector<16x128xf32>
    %109 = vector.extract_strided_slice %93 {offsets = [2, 0], sizes = [14, 128], strides = [1, 1]} : vector<16x128xf32> to vector<14x128xf32>
    %cst_31 = arith.constant 0.000000e+00 : f32
    %110 = vector.broadcast %cst_31 : f32 to vector<2x128xf32>
    %111 = tpu.concatenate %109, %110 in 0 : vector<14x128xf32>, vector<2x128xf32> -> vector<16x128xf32>
    %112 = vector.broadcast %60 : vector<16x1xf32> to vector<16x128xf32>
    %113 = arith.mulf %111, %112 : vector<16x128xf32>
    %114 = tpu.concatenate %98, %103, %93, %108, %113 in 1 : vector<16x128xf32>, vector<16x128xf32>, vector<16x128xf32>, vector<16x128xf32>, vector<16x128xf32> -> vector<16x640xf32>
    %115 = arith.truncf %114 : vector<16x640xf32> to vector<16x640xbf16>
    %c0_32 = arith.constant 0 : index
    %c0_33 = arith.constant 0 : index
    %116 = vector.load %arg5[%c0_32, %c0_33] : memref<640x128xbf16, #tpu.memory_space<vmem>>, vector<640x128xbf16>
    %cst_34 = arith.constant dense<0.000000e+00> : vector<16x128xf32>
    %117 = tpu.matmul %115, %116, %cst_34 {dimension_numbers = #tpu.dot_dimension_numbers<[1], [0], [0], [1], [0, 0, 1, 1], [], []>} : vector<16x640xbf16>, vector<640x128xbf16>, vector<16x128xf32> -> vector<16x128xf32>
    %c0_35 = arith.constant 0 : index
    %c0_36 = arith.constant 0 : index
    %118 = vector.load %arg6[%c0_35, %c0_36] : memref<1x128xf32, #tpu.memory_space<vmem>>, vector<1x128xf32>
    %119 = vector.broadcast %118 : vector<1x128xf32> to vector<16x128xf32>
    %120 = arith.mulf %117, %119 : vector<16x128xf32>
    %c0_37 = arith.constant 0 : index
    %c0_38 = arith.constant 0 : index
    %121 = vector.load %arg7[%c0_37, %c0_38] : memref<1x128xf32, #tpu.memory_space<vmem>>, vector<1x128xf32>
    %122 = vector.broadcast %121 : vector<1x128xf32> to vector<16x128xf32>
    %123 = arith.addf %120, %122 : vector<16x128xf32>
    %cst_39 = arith.constant 0.000000e+00 : f32
    %124 = vector.broadcast %cst_39 : f32 to vector<16x128xf32>
    %125 = arith.maximumf %123, %124 : vector<16x128xf32>
    %c0_40 = arith.constant 0 : index
    %c0_41 = arith.constant 0 : index
    %126 = vector.load %arg8[%c0_40, %c0_41] : memref<16x128xf32, #tpu.memory_space<vmem>>, vector<16x128xf32>
    tpu.vector_store %arg8[%c0_40, %c0_41], %125 {strides = array<i32>} : memref<16x128xf32, #tpu.memory_space<vmem>>, vector<16x128xf32>,
    return
  }
  func.func @transform_0(%arg0: i32) -> (i32, i32) {
    %c0_i32 = arith.constant 0 : i32
    %c0_i32_0 = arith.constant 0 : i32
    return %arg0, %c0_i32 : i32, i32
  }
  func.func @transform_1(%arg0: i32) -> (i32, i32) {
    %c0_i32 = arith.constant 0 : i32
    %c0_i32_0 = arith.constant 0 : i32
    %c0_i32_1 = arith.constant 0 : i32
    return %c0_i32, %c0_i32_0 : i32, i32
  }
  func.func @transform_2(%arg0: i32) -> (i32, i32) {
    %c0_i32 = arith.constant 0 : i32
    %c0_i32_0 = arith.constant 0 : i32
    %c0_i32_1 = arith.constant 0 : i32
    return %c0_i32, %c0_i32_0 : i32, i32
  }
  func.func @transform_3(%arg0: i32) -> (i32, i32) {
    %c0_i32 = arith.constant 0 : i32
    %c0_i32_0 = arith.constant 0 : i32
    %c0_i32_1 = arith.constant 0 : i32
    return %c0_i32, %c0_i32_0 : i32, i32
  }
  func.func @transform_4(%arg0: i32) -> (i32, i32) {
    %c0_i32 = arith.constant 0 : i32
    %c0_i32_0 = arith.constant 0 : i32
    %c0_i32_1 = arith.constant 0 : i32
    return %c0_i32, %c0_i32_0 : i32, i32
  }
  func.func @transform_5(%arg0: i32) -> (i32, i32) {
    %c0_i32 = arith.constant 0 : i32
    %c0_i32_0 = arith.constant 0 : i32
    %c0_i32_1 = arith.constant 0 : i32
    return %c0_i32, %c0_i32_0 : i32, i32
  }
  func.func @transform_6(%arg0: i32) -> (i32, i32) {
    %c0_i32 = arith.constant 0 : i32
    %c0_i32_0 = arith.constant 0 : i32
    %c0_i32_1 = arith.constant 0 : i32
    return %c0_i32, %c0_i32_0 : i32, i32
  }
  func.func @transform_7(%arg0: i32) -> (i32, i32) {
    %c0_i32 = arith.constant 0 : i32
    %c0_i32_0 = arith.constant 0 : i32
    return %arg0, %c0_i32 : i32, i32
  }
}

module attributes {stable_mosaic.version = 11 : i64} {
  func.func @_fused_double_conv_kernel(%arg0: i32, %arg1: memref<8x128xf32, #tpu.memory_space<vmem>>, %arg2: memref<640x128xbf16, #tpu.memory_space<vmem>>, %arg3: memref<1x128xf32, #tpu.memory_space<vmem>>, %arg4: memref<1x128xf32, #tpu.memory_space<vmem>>, %arg5: memref<640x128xbf16, #tpu.memory_space<vmem>>, %arg6: memref<1x128xf32, #tpu.memory_space<vmem>>, %arg7: memref<1x128xf32, #tpu.memory_space<vmem>>, %arg8: memref<8x128xf32, #tpu.memory_space<vmem>>) attributes {dimension_semantics = [#tpu.dimension_semantics<parallel>], iteration_bounds = array<i64: 2>, scalar_prefetch = 0 : i64, scratch_operands = 0 : i64, tpu.core_type = #tpu.core_type<tc>, window_params = [{transform_indices = @transform_0, window_bounds = array<i64: 8, 128>}, {pipeline_mode = #tpu.pipeline_mode<synchronous>, transform_indices = @transform_1, window_bounds = array<i64: 640, 128>}, {pipeline_mode = #tpu.pipeline_mode<synchronous>, transform_indices = @transform_2, window_bounds = array<i64: 1, 128>}, {pipeline_mode = #tpu.pipeline_mode<synchronous>, transform_indices = @transform_3, window_bounds = array<i64: 1, 128>}, {pipeline_mode = #tpu.pipeline_mode<synchronous>, transform_indices = @transform_4, window_bounds = array<i64: 640, 128>}, {pipeline_mode = #tpu.pipeline_mode<synchronous>, transform_indices = @transform_5, window_bounds = array<i64: 1, 128>}, {pipeline_mode = #tpu.pipeline_mode<synchronous>, transform_indices = @transform_6, window_bounds = array<i64: 1, 128>}, {transform_indices = @transform_7, window_bounds = array<i64: 8, 128>}]} {
    %0 = tpu.iota {dimensions = array<i32: 0>} : vector<8x1xi32>
    %c8_i32 = arith.constant 8 : i32
    %c0_i32 = arith.constant 0 : i32
    %1 = arith.cmpi eq, %c8_i32, %c0_i32 : i32
    %c1_i32 = arith.constant 1 : i32
    %2 = arith.select %1, %c1_i32, %c8_i32 : i32
    %3 = vector.broadcast %2 : i32 to vector<8x1xi32>
    %4 = arith.remsi %0, %3 : vector<8x1xi32>
    %c0_i32_0 = arith.constant 0 : i32
    %5 = vector.broadcast %c0_i32_0 : i32 to vector<8x1xi32>
    %6 = arith.cmpi ne, %4, %5 : vector<8x1xi32>
    %c0_i32_1 = arith.constant 0 : i32
    %7 = vector.broadcast %c0_i32_1 : i32 to vector<8x1xi32>
    %8 = arith.cmpi slt, %4, %7 : vector<8x1xi32>
    %c0_i32_2 = arith.constant 0 : i32
    %9 = arith.cmpi slt, %2, %c0_i32_2 : i32
    %10 = vector.broadcast %9 : i1 to vector<8x1xi1>
    %11 = vector.broadcast %10 : vector<8x1xi1> to vector<8x1xi1>
    %12 = arith.xori %8, %11 : vector<8x1xi1>
    %13 = arith.andi %12, %6 : vector<8x1xi1>
    %14 = vector.broadcast %2 : i32 to vector<8x1xi32>
    %15 = arith.addi %4, %14 : vector<8x1xi32>
    %16 = arith.select %13, %15, %4 : vector<8x1xi1>, vector<8x1xi32>
    %c-2_i32 = arith.constant -2 : i32
    %17 = vector.broadcast %c-2_i32 : i32 to vector<8x1xi32>
    %18 = arith.addi %16, %17 : vector<8x1xi32>
    %c0_i32_3 = arith.constant 0 : i32
    %19 = vector.broadcast %c0_i32_3 : i32 to vector<8x1xi32>
    %20 = arith.cmpi sge, %18, %19 : vector<8x1xi32>
    %c-2_i32_4 = arith.constant -2 : i32
    %21 = vector.broadcast %c-2_i32_4 : i32 to vector<8x1xi32>
    %22 = arith.addi %16, %21 : vector<8x1xi32>
    %c8_i32_5 = arith.constant 8 : i32
    %23 = vector.broadcast %c8_i32_5 : i32 to vector<8x1xi32>
    %24 = arith.cmpi slt, %22, %23 : vector<8x1xi32>
    %25 = arith.andi %20, %24 : vector<8x1xi1>
    %26 = arith.extui %25 : vector<8x1xi1> to vector<8x1xi32>
    %27 = arith.sitofp %26 : vector<8x1xi32> to vector<8x1xf32>
    %c-1_i32 = arith.constant -1 : i32
    %28 = vector.broadcast %c-1_i32 : i32 to vector<8x1xi32>
    %29 = arith.addi %16, %28 : vector<8x1xi32>
    %c0_i32_6 = arith.constant 0 : i32
    %30 = vector.broadcast %c0_i32_6 : i32 to vector<8x1xi32>
    %31 = arith.cmpi sge, %29, %30 : vector<8x1xi32>
    %c-1_i32_7 = arith.constant -1 : i32
    %32 = vector.broadcast %c-1_i32_7 : i32 to vector<8x1xi32>
    %33 = arith.addi %16, %32 : vector<8x1xi32>
    %c8_i32_8 = arith.constant 8 : i32
    %34 = vector.broadcast %c8_i32_8 : i32 to vector<8x1xi32>
    %35 = arith.cmpi slt, %33, %34 : vector<8x1xi32>
    %36 = arith.andi %31, %35 : vector<8x1xi1>
    %37 = arith.extui %36 : vector<8x1xi1> to vector<8x1xi32>
    %38 = arith.sitofp %37 : vector<8x1xi32> to vector<8x1xf32>
    %c1_i32_9 = arith.constant 1 : i32
    %39 = vector.broadcast %c1_i32_9 : i32 to vector<8x1xi32>
    %40 = arith.addi %16, %39 : vector<8x1xi32>
    %c0_i32_10 = arith.constant 0 : i32
    %41 = vector.broadcast %c0_i32_10 : i32 to vector<8x1xi32>
    %42 = arith.cmpi sge, %40, %41 : vector<8x1xi32>
    %c1_i32_11 = arith.constant 1 : i32
    %43 = vector.broadcast %c1_i32_11 : i32 to vector<8x1xi32>
    %44 = arith.addi %16, %43 : vector<8x1xi32>
    %c8_i32_12 = arith.constant 8 : i32
    %45 = vector.broadcast %c8_i32_12 : i32 to vector<8x1xi32>
    %46 = arith.cmpi slt, %44, %45 : vector<8x1xi32>
    %47 = arith.andi %42, %46 : vector<8x1xi1>
    %48 = arith.extui %47 : vector<8x1xi1> to vector<8x1xi32>
    %49 = arith.sitofp %48 : vector<8x1xi32> to vector<8x1xf32>
    %c2_i32 = arith.constant 2 : i32
    %50 = vector.broadcast %c2_i32 : i32 to vector<8x1xi32>
    %51 = arith.addi %16, %50 : vector<8x1xi32>
    %c0_i32_13 = arith.constant 0 : i32
    %52 = vector.broadcast %c0_i32_13 : i32 to vector<8x1xi32>
    %53 = arith.cmpi sge, %51, %52 : vector<8x1xi32>
    %c2_i32_14 = arith.constant 2 : i32
    %54 = vector.broadcast %c2_i32_14 : i32 to vector<8x1xi32>
    %55 = arith.addi %16, %54 : vector<8x1xi32>
    %c8_i32_15 = arith.constant 8 : i32
    %56 = vector.broadcast %c8_i32_15 : i32 to vector<8x1xi32>
    %57 = arith.cmpi slt, %55, %56 : vector<8x1xi32>
    %58 = arith.andi %53, %57 : vector<8x1xi1>
    %59 = arith.extui %58 : vector<8x1xi1> to vector<8x1xi32>
    %60 = arith.sitofp %59 : vector<8x1xi32> to vector<8x1xf32>
    %c0 = arith.constant 0 : index
    %c0_16 = arith.constant 0 : index
    %61 = vector.load %arg1[%c0, %c0_16] : memref<8x128xf32, #tpu.memory_space<vmem>>, vector<8x128xf32>
    %cst = arith.constant 0.000000e+00 : f32
    %62 = vector.broadcast %cst : f32 to vector<2x128xf32>
    %63 = vector.extract_strided_slice %61 {offsets = [0, 0], sizes = [6, 128], strides = [1, 1]} : vector<8x128xf32> to vector<6x128xf32>
    %64 = tpu.concatenate %62, %63 in 0 : vector<2x128xf32>, vector<6x128xf32> -> vector<8x128xf32>
    %65 = vector.broadcast %27 : vector<8x1xf32> to vector<8x128xf32>
    %66 = arith.mulf %64, %65 : vector<8x128xf32>
    %cst_17 = arith.constant 0.000000e+00 : f32
    %67 = vector.broadcast %cst_17 : f32 to vector<1x128xf32>
    %68 = vector.extract_strided_slice %61 {offsets = [0, 0], sizes = [7, 128], strides = [1, 1]} : vector<8x128xf32> to vector<7x128xf32>
    %69 = tpu.concatenate %67, %68 in 0 : vector<1x128xf32>, vector<7x128xf32> -> vector<8x128xf32>
    %70 = vector.broadcast %38 : vector<8x1xf32> to vector<8x128xf32>
    %71 = arith.mulf %69, %70 : vector<8x128xf32>
    %72 = vector.extract_strided_slice %61 {offsets = [1, 0], sizes = [7, 128], strides = [1, 1]} : vector<8x128xf32> to vector<7x128xf32>
    %cst_18 = arith.constant 0.000000e+00 : f32
    %73 = vector.broadcast %cst_18 : f32 to vector<1x128xf32>
    %74 = tpu.concatenate %72, %73 in 0 : vector<7x128xf32>, vector<1x128xf32> -> vector<8x128xf32>
    %75 = vector.broadcast %49 : vector<8x1xf32> to vector<8x128xf32>
    %76 = arith.mulf %74, %75 : vector<8x128xf32>
    %77 = vector.extract_strided_slice %61 {offsets = [2, 0], sizes = [6, 128], strides = [1, 1]} : vector<8x128xf32> to vector<6x128xf32>
    %cst_19 = arith.constant 0.000000e+00 : f32
    %78 = vector.broadcast %cst_19 : f32 to vector<2x128xf32>
    %79 = tpu.concatenate %77, %78 in 0 : vector<6x128xf32>, vector<2x128xf32> -> vector<8x128xf32>
    %80 = vector.broadcast %60 : vector<8x1xf32> to vector<8x128xf32>
    %81 = arith.mulf %79, %80 : vector<8x128xf32>
    %82 = tpu.concatenate %66, %71, %61, %76, %81 in 1 : vector<8x128xf32>, vector<8x128xf32>, vector<8x128xf32>, vector<8x128xf32>, vector<8x128xf32> -> vector<8x640xf32>
    %83 = arith.truncf %82 : vector<8x640xf32> to vector<8x640xbf16>
    %c0_20 = arith.constant 0 : index
    %c0_21 = arith.constant 0 : index
    %84 = vector.load %arg2[%c0_20, %c0_21] : memref<640x128xbf16, #tpu.memory_space<vmem>>, vector<640x128xbf16>
    %cst_22 = arith.constant dense<0.000000e+00> : vector<8x128xf32>
    %85 = tpu.matmul %83, %84, %cst_22 {dimension_numbers = #tpu.dot_dimension_numbers<[1], [0], [0], [1], [0, 0, 1, 1], [], []>} : vector<8x640xbf16>, vector<640x128xbf16>, vector<8x128xf32> -> vector<8x128xf32>
    %c0_23 = arith.constant 0 : index
    %c0_24 = arith.constant 0 : index
    %86 = vector.load %arg3[%c0_23, %c0_24] : memref<1x128xf32, #tpu.memory_space<vmem>>, vector<1x128xf32>
    %87 = vector.broadcast %86 : vector<1x128xf32> to vector<8x128xf32>
    %88 = arith.mulf %85, %87 : vector<8x128xf32>
    %c0_25 = arith.constant 0 : index
    %c0_26 = arith.constant 0 : index
    %89 = vector.load %arg4[%c0_25, %c0_26] : memref<1x128xf32, #tpu.memory_space<vmem>>, vector<1x128xf32>
    %90 = vector.broadcast %89 : vector<1x128xf32> to vector<8x128xf32>
    %91 = arith.addf %88, %90 : vector<8x128xf32>
    %cst_27 = arith.constant 0.000000e+00 : f32
    %92 = vector.broadcast %cst_27 : f32 to vector<8x128xf32>
    %93 = arith.maximumf %91, %92 : vector<8x128xf32>
    %cst_28 = arith.constant 0.000000e+00 : f32
    %94 = vector.broadcast %cst_28 : f32 to vector<2x128xf32>
    %95 = vector.extract_strided_slice %93 {offsets = [0, 0], sizes = [6, 128], strides = [1, 1]} : vector<8x128xf32> to vector<6x128xf32>
    %96 = tpu.concatenate %94, %95 in 0 : vector<2x128xf32>, vector<6x128xf32> -> vector<8x128xf32>
    %97 = vector.broadcast %27 : vector<8x1xf32> to vector<8x128xf32>
    %98 = arith.mulf %96, %97 : vector<8x128xf32>
    %cst_29 = arith.constant 0.000000e+00 : f32
    %99 = vector.broadcast %cst_29 : f32 to vector<1x128xf32>
    %100 = vector.extract_strided_slice %93 {offsets = [0, 0], sizes = [7, 128], strides = [1, 1]} : vector<8x128xf32> to vector<7x128xf32>
    %101 = tpu.concatenate %99, %100 in 0 : vector<1x128xf32>, vector<7x128xf32> -> vector<8x128xf32>
    %102 = vector.broadcast %38 : vector<8x1xf32> to vector<8x128xf32>
    %103 = arith.mulf %101, %102 : vector<8x128xf32>
    %104 = vector.extract_strided_slice %93 {offsets = [1, 0], sizes = [7, 128], strides = [1, 1]} : vector<8x128xf32> to vector<7x128xf32>
    %cst_30 = arith.constant 0.000000e+00 : f32
    %105 = vector.broadcast %cst_30 : f32 to vector<1x128xf32>
    %106 = tpu.concatenate %104, %105 in 0 : vector<7x128xf32>, vector<1x128xf32> -> vector<8x128xf32>
    %107 = vector.broadcast %49 : vector<8x1xf32> to vector<8x128xf32>
    %108 = arith.mulf %106, %107 : vector<8x128xf32>
    %109 = vector.extract_strided_slice %93 {offsets = [2, 0], sizes = [6, 128], strides = [1, 1]} : vector<8x128xf32> to vector<6x128xf32>
    %cst_31 = arith.constant 0.000000e+00 : f32
    %110 = vector.broadcast %cst_31 : f32 to vector<2x128xf32>
    %111 = tpu.concatenate %109, %110 in 0 : vector<6x128xf32>, vector<2x128xf32> -> vector<8x128xf32>
    %112 = vector.broadcast %60 : vector<8x1xf32> to vector<8x128xf32>
    %113 = arith.mulf %111, %112 : vector<8x128xf32>
    %114 = tpu.concatenate %98, %103, %93, %108, %113 in 1 : vector<8x128xf32>, vector<8x128xf32>, vector<8x128xf32>, vector<8x128xf32>, vector<8x128xf32> -> vector<8x640xf32>
    %115 = arith.truncf %114 : vector<8x640xf32> to vector<8x640xbf16>
    %c0_32 = arith.constant 0 : index
    %c0_33 = arith.constant 0 : index
    %116 = vector.load %arg5[%c0_32, %c0_33] : memref<640x128xbf16, #tpu.memory_space<vmem>>, vector<640x128xbf16>
    %cst_34 = arith.constant dense<0.000000e+00> : vector<8x128xf32>
    %117 = tpu.matmul %115, %116, %cst_34 {dimension_numbers = #tpu.dot_dimension_numbers<[1], [0], [0], [1], [0, 0, 1, 1], [], []>} : vector<8x640xbf16>, vector<640x128xbf16>, vector<8x128xf32> -> vector<8x128xf32>
    %c0_35 = arith.constant 0 : index
    %c0_36 = arith.constant 0 : index
    %118 = vector.load %arg6[%c0_35, %c0_36] : memref<1x128xf32, #tpu.memory_space<vmem>>, vector<1x128xf32>
    %119 = vector.broadcast %118 : vector<1x128xf32> to vector<8x128xf32>
    %120 = arith.mulf %117, %119 : vector<8x128xf32>
    %c0_37 = arith.constant 0 : index
    %c0_38 = arith.constant 0 : index
    %121 = vector.load %arg7[%c0_37, %c0_38] : memref<1x128xf32, #tpu.memory_space<vmem>>, vector<1x128xf32>
    %122 = vector.broadcast %121 : vector<1x128xf32> to vector<8x128xf32>
    %123 = arith.addf %120, %122 : vector<8x128xf32>
    %cst_39 = arith.constant 0.000000e+00 : f32
    %124 = vector.broadcast %cst_39 : f32 to vector<8x128xf32>
    %125 = arith.maximumf %123, %124 : vector<8x128xf32>
    %c0_40 = arith.constant 0 : index
    %c0_41 = arith.constant 0 : index
    %126 = vector.load %arg8[%c0_40, %c0_41] : memref<8x128xf32, #tpu.memory_space<vmem>>, vector<8x128xf32>
    tpu.vector_store %arg8[%c0_40, %c0_41], %125 {strides = array<i32>} : memref<8x128xf32, #tpu.memory_space<vmem>>, vector<8x128xf32>,
    return
  }
  func.func @transform_0(%arg0: i32) -> (i32, i32) {
    %c0_i32 = arith.constant 0 : i32
    %c0_i32_0 = arith.constant 0 : i32
    return %arg0, %c0_i32 : i32, i32
  }
  func.func @transform_1(%arg0: i32) -> (i32, i32) {
    %c0_i32 = arith.constant 0 : i32
    %c0_i32_0 = arith.constant 0 : i32
    %c0_i32_1 = arith.constant 0 : i32
    return %c0_i32, %c0_i32_0 : i32, i32
  }
  func.func @transform_2(%arg0: i32) -> (i32, i32) {
    %c0_i32 = arith.constant 0 : i32
    %c0_i32_0 = arith.constant 0 : i32
    %c0_i32_1 = arith.constant 0 : i32
    return %c0_i32, %c0_i32_0 : i32, i32
  }
  func.func @transform_3(%arg0: i32) -> (i32, i32) {
    %c0_i32 = arith.constant 0 : i32
    %c0_i32_0 = arith.constant 0 : i32
    %c0_i32_1 = arith.constant 0 : i32
    return %c0_i32, %c0_i32_0 : i32, i32
  }
  func.func @transform_4(%arg0: i32) -> (i32, i32) {
    %c0_i32 = arith.constant 0 : i32
    %c0_i32_0 = arith.constant 0 : i32
    %c0_i32_1 = arith.constant 0 : i32
    return %c0_i32, %c0_i32_0 : i32, i32
  }
  func.func @transform_5(%arg0: i32) -> (i32, i32) {
    %c0_i32 = arith.constant 0 : i32
    %c0_i32_0 = arith.constant 0 : i32
    %c0_i32_1 = arith.constant 0 : i32
    return %c0_i32, %c0_i32_0 : i32, i32
  }
  func.func @transform_6(%arg0: i32) -> (i32, i32) {
    %c0_i32 = arith.constant 0 : i32
    %c0_i32_0 = arith.constant 0 : i32
    %c0_i32_1 = arith.constant 0 : i32
    return %c0_i32, %c0_i32_0 : i32, i32
  }
  func.func @transform_7(%arg0: i32) -> (i32, i32) {
    %c0_i32 = arith.constant 0 : i32
    %c0_i32_0 = arith.constant 0 : i32
    return %arg0, %c0_i32 : i32, i32
  }
}

module attributes {stable_mosaic.version = 11 : i64} {
  func.func @_fused_double_conv_kernel(%arg0: i32, %arg1: memref<8x128xf32, #tpu.memory_space<vmem>>, %arg2: memref<640x128xbf16, #tpu.memory_space<vmem>>, %arg3: memref<1x128xf32, #tpu.memory_space<vmem>>, %arg4: memref<1x128xf32, #tpu.memory_space<vmem>>, %arg5: memref<640x128xbf16, #tpu.memory_space<vmem>>, %arg6: memref<1x128xf32, #tpu.memory_space<vmem>>, %arg7: memref<1x128xf32, #tpu.memory_space<vmem>>, %arg8: memref<8x128xf32, #tpu.memory_space<vmem>>) attributes {dimension_semantics = [#tpu.dimension_semantics<parallel>], iteration_bounds = array<i64: 1>, scalar_prefetch = 0 : i64, scratch_operands = 0 : i64, tpu.core_type = #tpu.core_type<tc>, window_params = [{transform_indices = @transform_0, window_bounds = array<i64: 8, 128>}, {pipeline_mode = #tpu.pipeline_mode<synchronous>, transform_indices = @transform_1, window_bounds = array<i64: 640, 128>}, {pipeline_mode = #tpu.pipeline_mode<synchronous>, transform_indices = @transform_2, window_bounds = array<i64: 1, 128>}, {pipeline_mode = #tpu.pipeline_mode<synchronous>, transform_indices = @transform_3, window_bounds = array<i64: 1, 128>}, {pipeline_mode = #tpu.pipeline_mode<synchronous>, transform_indices = @transform_4, window_bounds = array<i64: 640, 128>}, {pipeline_mode = #tpu.pipeline_mode<synchronous>, transform_indices = @transform_5, window_bounds = array<i64: 1, 128>}, {pipeline_mode = #tpu.pipeline_mode<synchronous>, transform_indices = @transform_6, window_bounds = array<i64: 1, 128>}, {transform_indices = @transform_7, window_bounds = array<i64: 8, 128>}]} {
    %0 = tpu.iota {dimensions = array<i32: 0>} : vector<8x1xi32>
    %c4_i32 = arith.constant 4 : i32
    %c0_i32 = arith.constant 0 : i32
    %1 = arith.cmpi eq, %c4_i32, %c0_i32 : i32
    %c1_i32 = arith.constant 1 : i32
    %2 = arith.select %1, %c1_i32, %c4_i32 : i32
    %3 = vector.broadcast %2 : i32 to vector<8x1xi32>
    %4 = arith.remsi %0, %3 : vector<8x1xi32>
    %c0_i32_0 = arith.constant 0 : i32
    %5 = vector.broadcast %c0_i32_0 : i32 to vector<8x1xi32>
    %6 = arith.cmpi ne, %4, %5 : vector<8x1xi32>
    %c0_i32_1 = arith.constant 0 : i32
    %7 = vector.broadcast %c0_i32_1 : i32 to vector<8x1xi32>
    %8 = arith.cmpi slt, %4, %7 : vector<8x1xi32>
    %c0_i32_2 = arith.constant 0 : i32
    %9 = arith.cmpi slt, %2, %c0_i32_2 : i32
    %10 = vector.broadcast %9 : i1 to vector<8x1xi1>
    %11 = vector.broadcast %10 : vector<8x1xi1> to vector<8x1xi1>
    %12 = arith.xori %8, %11 : vector<8x1xi1>
    %13 = arith.andi %12, %6 : vector<8x1xi1>
    %14 = vector.broadcast %2 : i32 to vector<8x1xi32>
    %15 = arith.addi %4, %14 : vector<8x1xi32>
    %16 = arith.select %13, %15, %4 : vector<8x1xi1>, vector<8x1xi32>
    %c-2_i32 = arith.constant -2 : i32
    %17 = vector.broadcast %c-2_i32 : i32 to vector<8x1xi32>
    %18 = arith.addi %16, %17 : vector<8x1xi32>
    %c0_i32_3 = arith.constant 0 : i32
    %19 = vector.broadcast %c0_i32_3 : i32 to vector<8x1xi32>
    %20 = arith.cmpi sge, %18, %19 : vector<8x1xi32>
    %c-2_i32_4 = arith.constant -2 : i32
    %21 = vector.broadcast %c-2_i32_4 : i32 to vector<8x1xi32>
    %22 = arith.addi %16, %21 : vector<8x1xi32>
    %c4_i32_5 = arith.constant 4 : i32
    %23 = vector.broadcast %c4_i32_5 : i32 to vector<8x1xi32>
    %24 = arith.cmpi slt, %22, %23 : vector<8x1xi32>
    %25 = arith.andi %20, %24 : vector<8x1xi1>
    %26 = arith.extui %25 : vector<8x1xi1> to vector<8x1xi32>
    %27 = arith.sitofp %26 : vector<8x1xi32> to vector<8x1xf32>
    %c-1_i32 = arith.constant -1 : i32
    %28 = vector.broadcast %c-1_i32 : i32 to vector<8x1xi32>
    %29 = arith.addi %16, %28 : vector<8x1xi32>
    %c0_i32_6 = arith.constant 0 : i32
    %30 = vector.broadcast %c0_i32_6 : i32 to vector<8x1xi32>
    %31 = arith.cmpi sge, %29, %30 : vector<8x1xi32>
    %c-1_i32_7 = arith.constant -1 : i32
    %32 = vector.broadcast %c-1_i32_7 : i32 to vector<8x1xi32>
    %33 = arith.addi %16, %32 : vector<8x1xi32>
    %c4_i32_8 = arith.constant 4 : i32
    %34 = vector.broadcast %c4_i32_8 : i32 to vector<8x1xi32>
    %35 = arith.cmpi slt, %33, %34 : vector<8x1xi32>
    %36 = arith.andi %31, %35 : vector<8x1xi1>
    %37 = arith.extui %36 : vector<8x1xi1> to vector<8x1xi32>
    %38 = arith.sitofp %37 : vector<8x1xi32> to vector<8x1xf32>
    %c1_i32_9 = arith.constant 1 : i32
    %39 = vector.broadcast %c1_i32_9 : i32 to vector<8x1xi32>
    %40 = arith.addi %16, %39 : vector<8x1xi32>
    %c0_i32_10 = arith.constant 0 : i32
    %41 = vector.broadcast %c0_i32_10 : i32 to vector<8x1xi32>
    %42 = arith.cmpi sge, %40, %41 : vector<8x1xi32>
    %c1_i32_11 = arith.constant 1 : i32
    %43 = vector.broadcast %c1_i32_11 : i32 to vector<8x1xi32>
    %44 = arith.addi %16, %43 : vector<8x1xi32>
    %c4_i32_12 = arith.constant 4 : i32
    %45 = vector.broadcast %c4_i32_12 : i32 to vector<8x1xi32>
    %46 = arith.cmpi slt, %44, %45 : vector<8x1xi32>
    %47 = arith.andi %42, %46 : vector<8x1xi1>
    %48 = arith.extui %47 : vector<8x1xi1> to vector<8x1xi32>
    %49 = arith.sitofp %48 : vector<8x1xi32> to vector<8x1xf32>
    %c2_i32 = arith.constant 2 : i32
    %50 = vector.broadcast %c2_i32 : i32 to vector<8x1xi32>
    %51 = arith.addi %16, %50 : vector<8x1xi32>
    %c0_i32_13 = arith.constant 0 : i32
    %52 = vector.broadcast %c0_i32_13 : i32 to vector<8x1xi32>
    %53 = arith.cmpi sge, %51, %52 : vector<8x1xi32>
    %c2_i32_14 = arith.constant 2 : i32
    %54 = vector.broadcast %c2_i32_14 : i32 to vector<8x1xi32>
    %55 = arith.addi %16, %54 : vector<8x1xi32>
    %c4_i32_15 = arith.constant 4 : i32
    %56 = vector.broadcast %c4_i32_15 : i32 to vector<8x1xi32>
    %57 = arith.cmpi slt, %55, %56 : vector<8x1xi32>
    %58 = arith.andi %53, %57 : vector<8x1xi1>
    %59 = arith.extui %58 : vector<8x1xi1> to vector<8x1xi32>
    %60 = arith.sitofp %59 : vector<8x1xi32> to vector<8x1xf32>
    %c0 = arith.constant 0 : index
    %c0_16 = arith.constant 0 : index
    %61 = vector.load %arg1[%c0, %c0_16] : memref<8x128xf32, #tpu.memory_space<vmem>>, vector<8x128xf32>
    %cst = arith.constant 0.000000e+00 : f32
    %62 = vector.broadcast %cst : f32 to vector<2x128xf32>
    %63 = vector.extract_strided_slice %61 {offsets = [0, 0], sizes = [6, 128], strides = [1, 1]} : vector<8x128xf32> to vector<6x128xf32>
    %64 = tpu.concatenate %62, %63 in 0 : vector<2x128xf32>, vector<6x128xf32> -> vector<8x128xf32>
    %65 = vector.broadcast %27 : vector<8x1xf32> to vector<8x128xf32>
    %66 = arith.mulf %64, %65 : vector<8x128xf32>
    %cst_17 = arith.constant 0.000000e+00 : f32
    %67 = vector.broadcast %cst_17 : f32 to vector<1x128xf32>
    %68 = vector.extract_strided_slice %61 {offsets = [0, 0], sizes = [7, 128], strides = [1, 1]} : vector<8x128xf32> to vector<7x128xf32>
    %69 = tpu.concatenate %67, %68 in 0 : vector<1x128xf32>, vector<7x128xf32> -> vector<8x128xf32>
    %70 = vector.broadcast %38 : vector<8x1xf32> to vector<8x128xf32>
    %71 = arith.mulf %69, %70 : vector<8x128xf32>
    %72 = vector.extract_strided_slice %61 {offsets = [1, 0], sizes = [7, 128], strides = [1, 1]} : vector<8x128xf32> to vector<7x128xf32>
    %cst_18 = arith.constant 0.000000e+00 : f32
    %73 = vector.broadcast %cst_18 : f32 to vector<1x128xf32>
    %74 = tpu.concatenate %72, %73 in 0 : vector<7x128xf32>, vector<1x128xf32> -> vector<8x128xf32>
    %75 = vector.broadcast %49 : vector<8x1xf32> to vector<8x128xf32>
    %76 = arith.mulf %74, %75 : vector<8x128xf32>
    %77 = vector.extract_strided_slice %61 {offsets = [2, 0], sizes = [6, 128], strides = [1, 1]} : vector<8x128xf32> to vector<6x128xf32>
    %cst_19 = arith.constant 0.000000e+00 : f32
    %78 = vector.broadcast %cst_19 : f32 to vector<2x128xf32>
    %79 = tpu.concatenate %77, %78 in 0 : vector<6x128xf32>, vector<2x128xf32> -> vector<8x128xf32>
    %80 = vector.broadcast %60 : vector<8x1xf32> to vector<8x128xf32>
    %81 = arith.mulf %79, %80 : vector<8x128xf32>
    %82 = tpu.concatenate %66, %71, %61, %76, %81 in 1 : vector<8x128xf32>, vector<8x128xf32>, vector<8x128xf32>, vector<8x128xf32>, vector<8x128xf32> -> vector<8x640xf32>
    %83 = arith.truncf %82 : vector<8x640xf32> to vector<8x640xbf16>
    %c0_20 = arith.constant 0 : index
    %c0_21 = arith.constant 0 : index
    %84 = vector.load %arg2[%c0_20, %c0_21] : memref<640x128xbf16, #tpu.memory_space<vmem>>, vector<640x128xbf16>
    %cst_22 = arith.constant dense<0.000000e+00> : vector<8x128xf32>
    %85 = tpu.matmul %83, %84, %cst_22 {dimension_numbers = #tpu.dot_dimension_numbers<[1], [0], [0], [1], [0, 0, 1, 1], [], []>} : vector<8x640xbf16>, vector<640x128xbf16>, vector<8x128xf32> -> vector<8x128xf32>
    %c0_23 = arith.constant 0 : index
    %c0_24 = arith.constant 0 : index
    %86 = vector.load %arg3[%c0_23, %c0_24] : memref<1x128xf32, #tpu.memory_space<vmem>>, vector<1x128xf32>
    %87 = vector.broadcast %86 : vector<1x128xf32> to vector<8x128xf32>
    %88 = arith.mulf %85, %87 : vector<8x128xf32>
    %c0_25 = arith.constant 0 : index
    %c0_26 = arith.constant 0 : index
    %89 = vector.load %arg4[%c0_25, %c0_26] : memref<1x128xf32, #tpu.memory_space<vmem>>, vector<1x128xf32>
    %90 = vector.broadcast %89 : vector<1x128xf32> to vector<8x128xf32>
    %91 = arith.addf %88, %90 : vector<8x128xf32>
    %cst_27 = arith.constant 0.000000e+00 : f32
    %92 = vector.broadcast %cst_27 : f32 to vector<8x128xf32>
    %93 = arith.maximumf %91, %92 : vector<8x128xf32>
    %cst_28 = arith.constant 0.000000e+00 : f32
    %94 = vector.broadcast %cst_28 : f32 to vector<2x128xf32>
    %95 = vector.extract_strided_slice %93 {offsets = [0, 0], sizes = [6, 128], strides = [1, 1]} : vector<8x128xf32> to vector<6x128xf32>
    %96 = tpu.concatenate %94, %95 in 0 : vector<2x128xf32>, vector<6x128xf32> -> vector<8x128xf32>
    %97 = vector.broadcast %27 : vector<8x1xf32> to vector<8x128xf32>
    %98 = arith.mulf %96, %97 : vector<8x128xf32>
    %cst_29 = arith.constant 0.000000e+00 : f32
    %99 = vector.broadcast %cst_29 : f32 to vector<1x128xf32>
    %100 = vector.extract_strided_slice %93 {offsets = [0, 0], sizes = [7, 128], strides = [1, 1]} : vector<8x128xf32> to vector<7x128xf32>
    %101 = tpu.concatenate %99, %100 in 0 : vector<1x128xf32>, vector<7x128xf32> -> vector<8x128xf32>
    %102 = vector.broadcast %38 : vector<8x1xf32> to vector<8x128xf32>
    %103 = arith.mulf %101, %102 : vector<8x128xf32>
    %104 = vector.extract_strided_slice %93 {offsets = [1, 0], sizes = [7, 128], strides = [1, 1]} : vector<8x128xf32> to vector<7x128xf32>
    %cst_30 = arith.constant 0.000000e+00 : f32
    %105 = vector.broadcast %cst_30 : f32 to vector<1x128xf32>
    %106 = tpu.concatenate %104, %105 in 0 : vector<7x128xf32>, vector<1x128xf32> -> vector<8x128xf32>
    %107 = vector.broadcast %49 : vector<8x1xf32> to vector<8x128xf32>
    %108 = arith.mulf %106, %107 : vector<8x128xf32>
    %109 = vector.extract_strided_slice %93 {offsets = [2, 0], sizes = [6, 128], strides = [1, 1]} : vector<8x128xf32> to vector<6x128xf32>
    %cst_31 = arith.constant 0.000000e+00 : f32
    %110 = vector.broadcast %cst_31 : f32 to vector<2x128xf32>
    %111 = tpu.concatenate %109, %110 in 0 : vector<6x128xf32>, vector<2x128xf32> -> vector<8x128xf32>
    %112 = vector.broadcast %60 : vector<8x1xf32> to vector<8x128xf32>
    %113 = arith.mulf %111, %112 : vector<8x128xf32>
    %114 = tpu.concatenate %98, %103, %93, %108, %113 in 1 : vector<8x128xf32>, vector<8x128xf32>, vector<8x128xf32>, vector<8x128xf32>, vector<8x128xf32> -> vector<8x640xf32>
    %115 = arith.truncf %114 : vector<8x640xf32> to vector<8x640xbf16>
    %c0_32 = arith.constant 0 : index
    %c0_33 = arith.constant 0 : index
    %116 = vector.load %arg5[%c0_32, %c0_33] : memref<640x128xbf16, #tpu.memory_space<vmem>>, vector<640x128xbf16>
    %cst_34 = arith.constant dense<0.000000e+00> : vector<8x128xf32>
    %117 = tpu.matmul %115, %116, %cst_34 {dimension_numbers = #tpu.dot_dimension_numbers<[1], [0], [0], [1], [0, 0, 1, 1], [], []>} : vector<8x640xbf16>, vector<640x128xbf16>, vector<8x128xf32> -> vector<8x128xf32>
    %c0_35 = arith.constant 0 : index
    %c0_36 = arith.constant 0 : index
    %118 = vector.load %arg6[%c0_35, %c0_36] : memref<1x128xf32, #tpu.memory_space<vmem>>, vector<1x128xf32>
    %119 = vector.broadcast %118 : vector<1x128xf32> to vector<8x128xf32>
    %120 = arith.mulf %117, %119 : vector<8x128xf32>
    %c0_37 = arith.constant 0 : index
    %c0_38 = arith.constant 0 : index
    %121 = vector.load %arg7[%c0_37, %c0_38] : memref<1x128xf32, #tpu.memory_space<vmem>>, vector<1x128xf32>
    %122 = vector.broadcast %121 : vector<1x128xf32> to vector<8x128xf32>
    %123 = arith.addf %120, %122 : vector<8x128xf32>
    %cst_39 = arith.constant 0.000000e+00 : f32
    %124 = vector.broadcast %cst_39 : f32 to vector<8x128xf32>
    %125 = arith.maximumf %123, %124 : vector<8x128xf32>
    %c0_40 = arith.constant 0 : index
    %c0_41 = arith.constant 0 : index
    %126 = vector.load %arg8[%c0_40, %c0_41] : memref<8x128xf32, #tpu.memory_space<vmem>>, vector<8x128xf32>
    tpu.vector_store %arg8[%c0_40, %c0_41], %125 {strides = array<i32>} : memref<8x128xf32, #tpu.memory_space<vmem>>, vector<8x128xf32>,
    return
  }
  func.func @transform_0(%arg0: i32) -> (i32, i32) {
    %c0_i32 = arith.constant 0 : i32
    %c0_i32_0 = arith.constant 0 : i32
    return %arg0, %c0_i32 : i32, i32
  }
  func.func @transform_1(%arg0: i32) -> (i32, i32) {
    %c0_i32 = arith.constant 0 : i32
    %c0_i32_0 = arith.constant 0 : i32
    %c0_i32_1 = arith.constant 0 : i32
    return %c0_i32, %c0_i32_0 : i32, i32
  }
  func.func @transform_2(%arg0: i32) -> (i32, i32) {
    %c0_i32 = arith.constant 0 : i32
    %c0_i32_0 = arith.constant 0 : i32
    %c0_i32_1 = arith.constant 0 : i32
    return %c0_i32, %c0_i32_0 : i32, i32
  }
  func.func @transform_3(%arg0: i32) -> (i32, i32) {
    %c0_i32 = arith.constant 0 : i32
    %c0_i32_0 = arith.constant 0 : i32
    %c0_i32_1 = arith.constant 0 : i32
    return %c0_i32, %c0_i32_0 : i32, i32
  }
  func.func @transform_4(%arg0: i32) -> (i32, i32) {
    %c0_i32 = arith.constant 0 : i32
    %c0_i32_0 = arith.constant 0 : i32
    %c0_i32_1 = arith.constant 0 : i32
    return %c0_i32, %c0_i32_0 : i32, i32
  }
  func.func @transform_5(%arg0: i32) -> (i32, i32) {
    %c0_i32 = arith.constant 0 : i32
    %c0_i32_0 = arith.constant 0 : i32
    %c0_i32_1 = arith.constant 0 : i32
    return %c0_i32, %c0_i32_0 : i32, i32
  }
  func.func @transform_6(%arg0: i32) -> (i32, i32) {
    %c0_i32 = arith.constant 0 : i32
    %c0_i32_0 = arith.constant 0 : i32
    %c0_i32_1 = arith.constant 0 : i32
    return %c0_i32, %c0_i32_0 : i32, i32
  }
  func.func @transform_7(%arg0: i32) -> (i32, i32) {
    %c0_i32 = arith.constant 0 : i32
    %c0_i32_0 = arith.constant 0 : i32
    return %arg0, %c0_i32 : i32, i32
  }
}

module attributes {stable_mosaic.version = 11 : i64} {
  func.func @_fused_double_conv_kernel(%arg0: i32, %arg1: memref<16x128xf32, #tpu.memory_space<vmem>>, %arg2: memref<640x128xbf16, #tpu.memory_space<vmem>>, %arg3: memref<1x128xf32, #tpu.memory_space<vmem>>, %arg4: memref<1x128xf32, #tpu.memory_space<vmem>>, %arg5: memref<640x128xbf16, #tpu.memory_space<vmem>>, %arg6: memref<1x128xf32, #tpu.memory_space<vmem>>, %arg7: memref<1x128xf32, #tpu.memory_space<vmem>>, %arg8: memref<16x128xf32, #tpu.memory_space<vmem>>) attributes {dimension_semantics = [#tpu.dimension_semantics<parallel>], iteration_bounds = array<i64: 2>, scalar_prefetch = 0 : i64, scratch_operands = 0 : i64, tpu.core_type = #tpu.core_type<tc>, window_params = [{transform_indices = @transform_0, window_bounds = array<i64: 16, 128>}, {pipeline_mode = #tpu.pipeline_mode<synchronous>, transform_indices = @transform_1, window_bounds = array<i64: 640, 128>}, {pipeline_mode = #tpu.pipeline_mode<synchronous>, transform_indices = @transform_2, window_bounds = array<i64: 1, 128>}, {pipeline_mode = #tpu.pipeline_mode<synchronous>, transform_indices = @transform_3, window_bounds = array<i64: 1, 128>}, {pipeline_mode = #tpu.pipeline_mode<synchronous>, transform_indices = @transform_4, window_bounds = array<i64: 640, 128>}, {pipeline_mode = #tpu.pipeline_mode<synchronous>, transform_indices = @transform_5, window_bounds = array<i64: 1, 128>}, {pipeline_mode = #tpu.pipeline_mode<synchronous>, transform_indices = @transform_6, window_bounds = array<i64: 1, 128>}, {transform_indices = @transform_7, window_bounds = array<i64: 16, 128>}]} {
    %0 = tpu.iota {dimensions = array<i32: 0>} : vector<16x1xi32>
    %c16_i32 = arith.constant 16 : i32
    %c0_i32 = arith.constant 0 : i32
    %1 = arith.cmpi eq, %c16_i32, %c0_i32 : i32
    %c1_i32 = arith.constant 1 : i32
    %2 = arith.select %1, %c1_i32, %c16_i32 : i32
    %3 = vector.broadcast %2 : i32 to vector<16x1xi32>
    %4 = arith.remsi %0, %3 : vector<16x1xi32>
    %c0_i32_0 = arith.constant 0 : i32
    %5 = vector.broadcast %c0_i32_0 : i32 to vector<16x1xi32>
    %6 = arith.cmpi ne, %4, %5 : vector<16x1xi32>
    %c0_i32_1 = arith.constant 0 : i32
    %7 = vector.broadcast %c0_i32_1 : i32 to vector<16x1xi32>
    %8 = arith.cmpi slt, %4, %7 : vector<16x1xi32>
    %c0_i32_2 = arith.constant 0 : i32
    %9 = arith.cmpi slt, %2, %c0_i32_2 : i32
    %10 = vector.broadcast %9 : i1 to vector<16x1xi1>
    %11 = vector.broadcast %10 : vector<16x1xi1> to vector<16x1xi1>
    %12 = arith.xori %8, %11 : vector<16x1xi1>
    %13 = arith.andi %12, %6 : vector<16x1xi1>
    %14 = vector.broadcast %2 : i32 to vector<16x1xi32>
    %15 = arith.addi %4, %14 : vector<16x1xi32>
    %16 = arith.select %13, %15, %4 : vector<16x1xi1>, vector<16x1xi32>
    %c-2_i32 = arith.constant -2 : i32
    %17 = vector.broadcast %c-2_i32 : i32 to vector<16x1xi32>
    %18 = arith.addi %16, %17 : vector<16x1xi32>
    %c0_i32_3 = arith.constant 0 : i32
    %19 = vector.broadcast %c0_i32_3 : i32 to vector<16x1xi32>
    %20 = arith.cmpi sge, %18, %19 : vector<16x1xi32>
    %c-2_i32_4 = arith.constant -2 : i32
    %21 = vector.broadcast %c-2_i32_4 : i32 to vector<16x1xi32>
    %22 = arith.addi %16, %21 : vector<16x1xi32>
    %c16_i32_5 = arith.constant 16 : i32
    %23 = vector.broadcast %c16_i32_5 : i32 to vector<16x1xi32>
    %24 = arith.cmpi slt, %22, %23 : vector<16x1xi32>
    %25 = arith.andi %20, %24 : vector<16x1xi1>
    %26 = arith.extui %25 : vector<16x1xi1> to vector<16x1xi32>
    %27 = arith.sitofp %26 : vector<16x1xi32> to vector<16x1xf32>
    %c-1_i32 = arith.constant -1 : i32
    %28 = vector.broadcast %c-1_i32 : i32 to vector<16x1xi32>
    %29 = arith.addi %16, %28 : vector<16x1xi32>
    %c0_i32_6 = arith.constant 0 : i32
    %30 = vector.broadcast %c0_i32_6 : i32 to vector<16x1xi32>
    %31 = arith.cmpi sge, %29, %30 : vector<16x1xi32>
    %c-1_i32_7 = arith.constant -1 : i32
    %32 = vector.broadcast %c-1_i32_7 : i32 to vector<16x1xi32>
    %33 = arith.addi %16, %32 : vector<16x1xi32>
    %c16_i32_8 = arith.constant 16 : i32
    %34 = vector.broadcast %c16_i32_8 : i32 to vector<16x1xi32>
    %35 = arith.cmpi slt, %33, %34 : vector<16x1xi32>
    %36 = arith.andi %31, %35 : vector<16x1xi1>
    %37 = arith.extui %36 : vector<16x1xi1> to vector<16x1xi32>
    %38 = arith.sitofp %37 : vector<16x1xi32> to vector<16x1xf32>
    %c1_i32_9 = arith.constant 1 : i32
    %39 = vector.broadcast %c1_i32_9 : i32 to vector<16x1xi32>
    %40 = arith.addi %16, %39 : vector<16x1xi32>
    %c0_i32_10 = arith.constant 0 : i32
    %41 = vector.broadcast %c0_i32_10 : i32 to vector<16x1xi32>
    %42 = arith.cmpi sge, %40, %41 : vector<16x1xi32>
    %c1_i32_11 = arith.constant 1 : i32
    %43 = vector.broadcast %c1_i32_11 : i32 to vector<16x1xi32>
    %44 = arith.addi %16, %43 : vector<16x1xi32>
    %c16_i32_12 = arith.constant 16 : i32
    %45 = vector.broadcast %c16_i32_12 : i32 to vector<16x1xi32>
    %46 = arith.cmpi slt, %44, %45 : vector<16x1xi32>
    %47 = arith.andi %42, %46 : vector<16x1xi1>
    %48 = arith.extui %47 : vector<16x1xi1> to vector<16x1xi32>
    %49 = arith.sitofp %48 : vector<16x1xi32> to vector<16x1xf32>
    %c2_i32 = arith.constant 2 : i32
    %50 = vector.broadcast %c2_i32 : i32 to vector<16x1xi32>
    %51 = arith.addi %16, %50 : vector<16x1xi32>
    %c0_i32_13 = arith.constant 0 : i32
    %52 = vector.broadcast %c0_i32_13 : i32 to vector<16x1xi32>
    %53 = arith.cmpi sge, %51, %52 : vector<16x1xi32>
    %c2_i32_14 = arith.constant 2 : i32
    %54 = vector.broadcast %c2_i32_14 : i32 to vector<16x1xi32>
    %55 = arith.addi %16, %54 : vector<16x1xi32>
    %c16_i32_15 = arith.constant 16 : i32
    %56 = vector.broadcast %c16_i32_15 : i32 to vector<16x1xi32>
    %57 = arith.cmpi slt, %55, %56 : vector<16x1xi32>
    %58 = arith.andi %53, %57 : vector<16x1xi1>
    %59 = arith.extui %58 : vector<16x1xi1> to vector<16x1xi32>
    %60 = arith.sitofp %59 : vector<16x1xi32> to vector<16x1xf32>
    %c0 = arith.constant 0 : index
    %c0_16 = arith.constant 0 : index
    %61 = vector.load %arg1[%c0, %c0_16] : memref<16x128xf32, #tpu.memory_space<vmem>>, vector<16x128xf32>
    %cst = arith.constant 0.000000e+00 : f32
    %62 = vector.broadcast %cst : f32 to vector<2x128xf32>
    %63 = vector.extract_strided_slice %61 {offsets = [0, 0], sizes = [14, 128], strides = [1, 1]} : vector<16x128xf32> to vector<14x128xf32>
    %64 = tpu.concatenate %62, %63 in 0 : vector<2x128xf32>, vector<14x128xf32> -> vector<16x128xf32>
    %65 = vector.broadcast %27 : vector<16x1xf32> to vector<16x128xf32>
    %66 = arith.mulf %64, %65 : vector<16x128xf32>
    %cst_17 = arith.constant 0.000000e+00 : f32
    %67 = vector.broadcast %cst_17 : f32 to vector<1x128xf32>
    %68 = vector.extract_strided_slice %61 {offsets = [0, 0], sizes = [15, 128], strides = [1, 1]} : vector<16x128xf32> to vector<15x128xf32>
    %69 = tpu.concatenate %67, %68 in 0 : vector<1x128xf32>, vector<15x128xf32> -> vector<16x128xf32>
    %70 = vector.broadcast %38 : vector<16x1xf32> to vector<16x128xf32>
    %71 = arith.mulf %69, %70 : vector<16x128xf32>
    %72 = vector.extract_strided_slice %61 {offsets = [1, 0], sizes = [15, 128], strides = [1, 1]} : vector<16x128xf32> to vector<15x128xf32>
    %cst_18 = arith.constant 0.000000e+00 : f32
    %73 = vector.broadcast %cst_18 : f32 to vector<1x128xf32>
    %74 = tpu.concatenate %72, %73 in 0 : vector<15x128xf32>, vector<1x128xf32> -> vector<16x128xf32>
    %75 = vector.broadcast %49 : vector<16x1xf32> to vector<16x128xf32>
    %76 = arith.mulf %74, %75 : vector<16x128xf32>
    %77 = vector.extract_strided_slice %61 {offsets = [2, 0], sizes = [14, 128], strides = [1, 1]} : vector<16x128xf32> to vector<14x128xf32>
    %cst_19 = arith.constant 0.000000e+00 : f32
    %78 = vector.broadcast %cst_19 : f32 to vector<2x128xf32>
    %79 = tpu.concatenate %77, %78 in 0 : vector<14x128xf32>, vector<2x128xf32> -> vector<16x128xf32>
    %80 = vector.broadcast %60 : vector<16x1xf32> to vector<16x128xf32>
    %81 = arith.mulf %79, %80 : vector<16x128xf32>
    %82 = tpu.concatenate %66, %71, %61, %76, %81 in 1 : vector<16x128xf32>, vector<16x128xf32>, vector<16x128xf32>, vector<16x128xf32>, vector<16x128xf32> -> vector<16x640xf32>
    %83 = arith.truncf %82 : vector<16x640xf32> to vector<16x640xbf16>
    %c0_20 = arith.constant 0 : index
    %c0_21 = arith.constant 0 : index
    %84 = vector.load %arg2[%c0_20, %c0_21] : memref<640x128xbf16, #tpu.memory_space<vmem>>, vector<640x128xbf16>
    %cst_22 = arith.constant dense<0.000000e+00> : vector<16x128xf32>
    %85 = tpu.matmul %83, %84, %cst_22 {dimension_numbers = #tpu.dot_dimension_numbers<[1], [0], [0], [1], [0, 0, 1, 1], [], []>} : vector<16x640xbf16>, vector<640x128xbf16>, vector<16x128xf32> -> vector<16x128xf32>
    %c0_23 = arith.constant 0 : index
    %c0_24 = arith.constant 0 : index
    %86 = vector.load %arg3[%c0_23, %c0_24] : memref<1x128xf32, #tpu.memory_space<vmem>>, vector<1x128xf32>
    %87 = vector.broadcast %86 : vector<1x128xf32> to vector<16x128xf32>
    %88 = arith.mulf %85, %87 : vector<16x128xf32>
    %c0_25 = arith.constant 0 : index
    %c0_26 = arith.constant 0 : index
    %89 = vector.load %arg4[%c0_25, %c0_26] : memref<1x128xf32, #tpu.memory_space<vmem>>, vector<1x128xf32>
    %90 = vector.broadcast %89 : vector<1x128xf32> to vector<16x128xf32>
    %91 = arith.addf %88, %90 : vector<16x128xf32>
    %cst_27 = arith.constant 0.000000e+00 : f32
    %92 = vector.broadcast %cst_27 : f32 to vector<16x128xf32>
    %93 = arith.maximumf %91, %92 : vector<16x128xf32>
    %cst_28 = arith.constant 0.000000e+00 : f32
    %94 = vector.broadcast %cst_28 : f32 to vector<2x128xf32>
    %95 = vector.extract_strided_slice %93 {offsets = [0, 0], sizes = [14, 128], strides = [1, 1]} : vector<16x128xf32> to vector<14x128xf32>
    %96 = tpu.concatenate %94, %95 in 0 : vector<2x128xf32>, vector<14x128xf32> -> vector<16x128xf32>
    %97 = vector.broadcast %27 : vector<16x1xf32> to vector<16x128xf32>
    %98 = arith.mulf %96, %97 : vector<16x128xf32>
    %cst_29 = arith.constant 0.000000e+00 : f32
    %99 = vector.broadcast %cst_29 : f32 to vector<1x128xf32>
    %100 = vector.extract_strided_slice %93 {offsets = [0, 0], sizes = [15, 128], strides = [1, 1]} : vector<16x128xf32> to vector<15x128xf32>
    %101 = tpu.concatenate %99, %100 in 0 : vector<1x128xf32>, vector<15x128xf32> -> vector<16x128xf32>
    %102 = vector.broadcast %38 : vector<16x1xf32> to vector<16x128xf32>
    %103 = arith.mulf %101, %102 : vector<16x128xf32>
    %104 = vector.extract_strided_slice %93 {offsets = [1, 0], sizes = [15, 128], strides = [1, 1]} : vector<16x128xf32> to vector<15x128xf32>
    %cst_30 = arith.constant 0.000000e+00 : f32
    %105 = vector.broadcast %cst_30 : f32 to vector<1x128xf32>
    %106 = tpu.concatenate %104, %105 in 0 : vector<15x128xf32>, vector<1x128xf32> -> vector<16x128xf32>
    %107 = vector.broadcast %49 : vector<16x1xf32> to vector<16x128xf32>
    %108 = arith.mulf %106, %107 : vector<16x128xf32>
    %109 = vector.extract_strided_slice %93 {offsets = [2, 0], sizes = [14, 128], strides = [1, 1]} : vector<16x128xf32> to vector<14x128xf32>
    %cst_31 = arith.constant 0.000000e+00 : f32
    %110 = vector.broadcast %cst_31 : f32 to vector<2x128xf32>
    %111 = tpu.concatenate %109, %110 in 0 : vector<14x128xf32>, vector<2x128xf32> -> vector<16x128xf32>
    %112 = vector.broadcast %60 : vector<16x1xf32> to vector<16x128xf32>
    %113 = arith.mulf %111, %112 : vector<16x128xf32>
    %114 = tpu.concatenate %98, %103, %93, %108, %113 in 1 : vector<16x128xf32>, vector<16x128xf32>, vector<16x128xf32>, vector<16x128xf32>, vector<16x128xf32> -> vector<16x640xf32>
    %115 = arith.truncf %114 : vector<16x640xf32> to vector<16x640xbf16>
    %c0_32 = arith.constant 0 : index
    %c0_33 = arith.constant 0 : index
    %116 = vector.load %arg5[%c0_32, %c0_33] : memref<640x128xbf16, #tpu.memory_space<vmem>>, vector<640x128xbf16>
    %cst_34 = arith.constant dense<0.000000e+00> : vector<16x128xf32>
    %117 = tpu.matmul %115, %116, %cst_34 {dimension_numbers = #tpu.dot_dimension_numbers<[1], [0], [0], [1], [0, 0, 1, 1], [], []>} : vector<16x640xbf16>, vector<640x128xbf16>, vector<16x128xf32> -> vector<16x128xf32>
    %c0_35 = arith.constant 0 : index
    %c0_36 = arith.constant 0 : index
    %118 = vector.load %arg6[%c0_35, %c0_36] : memref<1x128xf32, #tpu.memory_space<vmem>>, vector<1x128xf32>
    %119 = vector.broadcast %118 : vector<1x128xf32> to vector<16x128xf32>
    %120 = arith.mulf %117, %119 : vector<16x128xf32>
    %c0_37 = arith.constant 0 : index
    %c0_38 = arith.constant 0 : index
    %121 = vector.load %arg7[%c0_37, %c0_38] : memref<1x128xf32, #tpu.memory_space<vmem>>, vector<1x128xf32>
    %122 = vector.broadcast %121 : vector<1x128xf32> to vector<16x128xf32>
    %123 = arith.addf %120, %122 : vector<16x128xf32>
    %cst_39 = arith.constant 0.000000e+00 : f32
    %124 = vector.broadcast %cst_39 : f32 to vector<16x128xf32>
    %125 = arith.maximumf %123, %124 : vector<16x128xf32>
    %c0_40 = arith.constant 0 : index
    %c0_41 = arith.constant 0 : index
    %126 = vector.load %arg8[%c0_40, %c0_41] : memref<16x128xf32, #tpu.memory_space<vmem>>, vector<16x128xf32>
    tpu.vector_store %arg8[%c0_40, %c0_41], %125 {strides = array<i32>} : memref<16x128xf32, #tpu.memory_space<vmem>>, vector<16x128xf32>,
    return
  }
  func.func @transform_0(%arg0: i32) -> (i32, i32) {
    %c0_i32 = arith.constant 0 : i32
    %c0_i32_0 = arith.constant 0 : i32
    return %arg0, %c0_i32 : i32, i32
  }
  func.func @transform_1(%arg0: i32) -> (i32, i32) {
    %c0_i32 = arith.constant 0 : i32
    %c0_i32_0 = arith.constant 0 : i32
    %c0_i32_1 = arith.constant 0 : i32
    return %c0_i32, %c0_i32_0 : i32, i32
  }
  func.func @transform_2(%arg0: i32) -> (i32, i32) {
    %c0_i32 = arith.constant 0 : i32
    %c0_i32_0 = arith.constant 0 : i32
    %c0_i32_1 = arith.constant 0 : i32
    return %c0_i32, %c0_i32_0 : i32, i32
  }
  func.func @transform_3(%arg0: i32) -> (i32, i32) {
    %c0_i32 = arith.constant 0 : i32
    %c0_i32_0 = arith.constant 0 : i32
    %c0_i32_1 = arith.constant 0 : i32
    return %c0_i32, %c0_i32_0 : i32, i32
  }
  func.func @transform_4(%arg0: i32) -> (i32, i32) {
    %c0_i32 = arith.constant 0 : i32
    %c0_i32_0 = arith.constant 0 : i32
    %c0_i32_1 = arith.constant 0 : i32
    return %c0_i32, %c0_i32_0 : i32, i32
  }
  func.func @transform_5(%arg0: i32) -> (i32, i32) {
    %c0_i32 = arith.constant 0 : i32
    %c0_i32_0 = arith.constant 0 : i32
    %c0_i32_1 = arith.constant 0 : i32
    return %c0_i32, %c0_i32_0 : i32, i32
  }
  func.func @transform_6(%arg0: i32) -> (i32, i32) {
    %c0_i32 = arith.constant 0 : i32
    %c0_i32_0 = arith.constant 0 : i32
    %c0_i32_1 = arith.constant 0 : i32
    return %c0_i32, %c0_i32_0 : i32, i32
  }
  func.func @transform_7(%arg0: i32) -> (i32, i32) {
    %c0_i32 = arith.constant 0 : i32
    %c0_i32_0 = arith.constant 0 : i32
    return %arg0, %c0_i32 : i32, i32
  }
}

</mosaic_0001>

<bundles_post_ra>
// kernel: intervals_model_forward.7
= control target key start
LH: loop header
LB: loop body
LE: loop exit
PB: predicated region body
PF: predicated region fallthrough
CT: control target
= control target key end

     0   :  { %v27_v13 = vlaneseq  ;;  %vm74_vm0 = vcmask 1040384   ;;  %vm79_vm1 = vcmask 1046528   ;;  %vm69_vm2 = vcmask 1041408   ;;  %s1703_s1 = inlined_call_operand.vmem [shape: bf16[640,128], index: 1, kind: input, shape index: {}]   ;;  %s1704_s0 = inlined_call_operand.vmem [shape: f32[8,128], index: 0, kind: input, shape index: {}]   ;;  %s1705_s4 = inlined_call_operand.vmem [shape: bf16[640,128], index: 4, kind: input, shape index: {}]   ;;  %s1706_s2 = inlined_call_operand.vmem [shape: f32[1,128], index: 2, kind: input, shape index: {}]   ;;  %s1707_s3 = inlined_call_operand.vmem [shape: f32[1,128], index: 3, kind: input, shape index: {}]   ;;  %s1708_s5 = inlined_call_operand.vmem [shape: f32[1,128], index: 5, kind: input, shape index: {}]   ;;  %s1709_s6 = inlined_call_operand.vmem [shape: f32[1,128], index: 6, kind: input, shape index: {}]   ;;  %s1710_s7 = inlined_call_operand.vmem [shape: f32[8,128], index: 7, kind: output, shape index: {}]  }
   0x1   :  { %v1269_v0 = vld [vmem:[%s1703_s1 + $0x78] sm:$0xff]   ;;  %v1273_v4 = vld [vmem:[%s1703_s1 + $0x70] sm:$0xff]   ;;  %v1277_v8 = vld [vmem:[%s1703_s1 + $0x68] sm:$0xff]   ;;  %v1349_v38 = vmov 0.0   ;;  %vm1350_vm6 = vmmov 0   ;;  %vm84_vm8 = vcmask 1045504  }
   0x2   :  { %v1270_v1 = vld [vmem:[%s1703_s1 + $0xf8] sm:$0xff]   ;;  %1121 = vmatprep.subr.bf16.mxu0 %v1269_v0  ;;  %v1274_v5 = vld [vmem:[%s1703_s1 + $0xf0] sm:$0xff]   ;;  %v1278_v9 = vld [vmem:[%s1703_s1 + $0xe8] sm:$0xff]   ;;  %v28_v18 = vshrl.u32 %v27_v13, 7 }
   0x3   :  { %v1271_v2 = vld [vmem:[%s1703_s1 + $0x38] sm:$0xff]   ;;  %1143 = vmatprep.subr.bf16.mxu1 %v1270_v1  ;;  %v1275_v6 = vld [vmem:[%s1703_s1 + $0x30] sm:$0xff]   ;;  %v1279_v10 = vld [vmem:[%s1703_s1 + $0x28] sm:$0xff]  }
   0x4   :  { %v1272_v3 = vld [vmem:[%s1703_s1 + $0xb8] sm:$0xff]   ;;  %1122 = vmatpush3.bf16.msra.mxu0 %v1271_v2  ;;  %v1276_v7 = vld [vmem:[%s1703_s1 + $0xb0] sm:$0xff]   ;;  %v1280_v11 = vld [vmem:[%s1703_s1 + $0xa8] sm:$0xff]   ;;  %v1454_v23 = vand.u32 3, %v28_v18 }
   0x5   :  { %1144 = vmatpush3.bf16.msra.mxu1 %v1272_v3  ;;  %1123 = vmatprep.subr.bf16.mxu0 %v1273_v4  ;;  %v1281_v12 = vld [vmem:[%s1703_s1 + $0x60] sm:$0xff]   ;;  %v1285_v17 = vld [vmem:[%s1703_s1 + $0x58] sm:$0xff]   ;;  %v1289_v22 = vld [vmem:[%s1703_s1 + $0x50] sm:$0xff]  }
   0x6   :  { %1145 = vmatprep.subr.bf16.mxu1 %v1274_v5  ;;  %v1282_v14 = vld [vmem:[%s1703_s1 + $0xe0] sm:$0xff]   ;;  %v1286_v19 = vld [vmem:[%s1703_s1 + $0xd8] sm:$0xff]   ;;  %v1290_v24 = vld [vmem:[%s1703_s1 + $0xd0] sm:$0xff]   ;;  %v47_v28 = vadd.s32 4294967295, %v1454_v23  ;;  %v53_v30 = vadd.s32 1, %v1454_v23  ;;  %v41_v32 = vadd.s32 4294967294, %v1454_v23 }
   0x7   :  { %v1283_v15 = vld [vmem:[%s1703_s1 + $0x20] sm:$0xff]   ;;  %v1287_v20 = vld [vmem:[%s1703_s1 + $0x18] sm:$0xff]   ;;  %v1291_v25 = vld [vmem:[%s1703_s1 + $0x10] sm:$0xff]   ;;  %v59_v61 = vadd.s32 2, %v1454_v23 }
   0x8   :  { %1124 = vmatpush3.bf16.msra.mxu0 %v1275_v6  ;;  %v1284_v16 = vld [vmem:[%s1703_s1 + $0xa0] sm:$0xff]   ;;  %v1288_v21 = vld [vmem:[%s1703_s1 + $0x98] sm:$0xff]   ;;  %v1292_v26 = vld [vmem:[%s1703_s1 + $0x90] sm:$0xff]   ;;  %vm48_vm3 = vcmp.ge.s32.totalorder %v47_v28, 0  ;;  %vm55_vm4 = vcmp.lt.s32.totalorder %v53_v30, 4  ;;  %vm42_vm5 = vcmp.ge.s32.totalorder %v41_v32, 0 }
   0x9   :  { %1146 = vmatpush3.bf16.msra.mxu1 %v1276_v7  ;;  %1125 = vmatprep.subr.bf16.mxu0 %v1277_v8  ;;  %v1293_v27 = vld [vmem:[%s1703_s1 + $0x48] sm:$0xff]   ;;  %v1297_v34 = vld [vmem:[%s1703_s1 + $0x40] sm:$0xff]   ;;  %v1493_v39 = vsel %vm48_vm3, 1.0, %v1349_v38  ;;  %v1499_v41 = vsel %vm55_vm4, 1.0, %v1349_v38  ;;  %v1502_v44 = vsel %vm42_vm5, 1.0, %v1349_v38  ;;  %v1301_v56 = vld [vmem:[%s1703_s1 + $0x138] sm:$0xff]  }
   0xa   :  { %1147 = vmatprep.subr.bf16.mxu1 %v1278_v9  ;;  %v1294_v29 = vld [vmem:[%s1703_s1 + $0xc8] sm:$0xff]   ;;  %v1298_v35 = vld [vmem:[%s1703_s1 + $0xc0] sm:$0xff]   ;;  %v1302_v57 = vld [vmem:[%s1703_s1 + $0x130] sm:$0xff]   ;;  %vm61_vm7 = vcmp.lt.s32.totalorder %v59_v61, 4 }
   0xb   :  { %v1295_v31 = vld [vmem:[%s1703_s1 + $0x8] sm:$0xff]   ;;  %v1299_v36 = vld [vmem:[%s1703_s1] sm:$0xff]   ;;  %v1305_v60 = vld [vmem:[%s1703_s1 + $0x118] sm:$0xff]   ;;  %v1541_v1 = vsel %vm61_vm7, 1.0, %v1349_v38 }
   0xc   :  { %1126 = vmatpush3.bf16.msra.mxu0 %v1279_v10  ;;  %v1296_v33 = vld [vmem:[%s1703_s1 + $0x88] sm:$0xff]   ;;  %v1300_v37 = vld [vmem:[%s1703_s1 + $0x80] sm:$0xff]   ;;  %v1306_v62 = vld [vmem:[%s1703_s1 + $0x110] sm:$0xff]  }
   0xd   :  { %1148 = vmatpush3.bf16.msra.mxu1 %v1280_v11  ;;  %1127 = vmatprep.subr.bf16.mxu0 %v1281_v12  ;;  %v65_v40 = vld [vmem:[%s1704_s0] sm:$0xff]  ;;  %v1303_v58 = vld [vmem:[%s1703_s1 + $0x128] sm:$0xff]   ;;  %v1309_v6 = vld [vmem:[%s1705_s4 + $0x78] sm:$0xff]  }
   0xe   :  { %1149 = vmatprep.subr.bf16.mxu1 %v1282_v14  ;;  %v72_v42 = vrot.slane %v65_v40, 7  ;;  %v77_v43 = vrot.slane %v65_v40, 1  ;;  %v67_v45 = vrot.slane %v65_v40, 6  ;;  %v89_v52 = vpack.c.bf16 %v65_v40, %v65_v40  ;;  %v1304_v59 = vld [vmem:[%s1703_s1 + $0x120] sm:$0xff]   ;;  %v1307_v0 = vld [vmem:[%s1703_s1 + $0x108] sm:$0xff]   ;;  %v1310_v7 = vld [vmem:[%s1705_s4 + $0x38] sm:$0xff]  }
   0xf   :  { %v82_v63 = vrot.slane %v65_v40, 2  ;;  %v1308_v4 = vld [vmem:[%s1703_s1 + $0x100] sm:$0xff]   ;;  %v1311_v8 = vld [vmem:[%s1705_s4 + $0xf8] sm:$0xff]   ;;  %v1313_v10 = vld [vmem:[%s1705_s4 + $0x70] sm:$0xff]  }
  0x10   :  { %1128 = vmatpush3.bf16.msra.mxu0 %v1283_v15  ;;  %v75_v46 = vsel %vm74_vm0, 0.0, %v72_v42  ;;  %v80_v47 = vsel %vm79_vm1, %v77_v43, 0.0  ;;  %v70_v48 = vsel %vm69_vm2, 0.0, %v67_v45  ;;  %v1312_v9 = vld [vmem:[%s1705_s4 + $0xb8] sm:$0xff]   ;;  %v1314_v11 = vld [vmem:[%s1705_s4 + $0x30] sm:$0xff]   ;;  %v1317_v14 = vld [vmem:[%s1705_s4 + $0x68] sm:$0xff]  }
  0x11   :  { %1150 = vmatpush3.bf16.msra.mxu1 %v1284_v16  ;;  %1129 = vmatprep.subr.bf16.mxu0 %v1285_v17  ;;  %v76_v49 = vmul.f32 %v1493_v39, %v75_v46  ;;  %v81_v50 = vmul.f32 %v1499_v41, %v80_v47  ;;  %v71_v51 = vmul.f32 %v1502_v44, %v70_v48  ;;  %v85_v2 = vsel %vm84_vm8, %v82_v63, 0.0  ;;  %v1315_v12 = vld [vmem:[%s1705_s4 + $0xf0] sm:$0xff]   ;;  %v1318_v15 = vld [vmem:[%s1705_s4 + $0x28] sm:$0xff]   ;;  %v1321_v18 = vld [vmem:[%s1705_s4 + $0x60] sm:$0xff]  }
  0x12   :  { %1151 = vmatprep.subr.bf16.mxu1 %v1286_v19  ;;  %v86_v3 = vmul.f32 %v1541_v1, %v85_v2  ;;  %v1316_v13 = vld [vmem:[%s1705_s4 + $0xb0] sm:$0xff]   ;;  %v1319_v16 = vld [vmem:[%s1705_s4 + $0xe8] sm:$0xff]   ;;  %v1322_v19 = vld [vmem:[%s1705_s4 + $0x20] sm:$0xff]  }
  0x13   :  { %v88_v53 = vpack.c.bf16 %v76_v49, %v76_v49  ;;  %v90_v54 = vpack.c.bf16 %v81_v50, %v81_v50  ;;  %v87_v55 = vpack.c.bf16 %v71_v51, %v71_v51  ;;  %v1320_v17 = vld [vmem:[%s1705_s4 + $0xa8] sm:$0xff]   ;;  %v1326_v23 = vld [vmem:[%s1705_s4 + $0x18] sm:$0xff]   ;;  %v1331_v28 = vld [vmem:[%s1705_s4 + $0xd0] sm:$0xff]  }
  0x14   :  { %1130 = vmatpush3.bf16.msra.mxu0 %v1287_v20  ;;  %v91_v5 = vpack.c.bf16 %v86_v3, %v86_v3  ;;  %v1323_v20 = vld [vmem:[%s1705_s4 + $0xe0] sm:$0xff]   ;;  %v1333_v30 = vld [vmem:[%s1705_s4 + $0x48] sm:$0xff]  }
  0x15   :  { %1152 = vmatpush3.bf16.msra.mxu1 %v1288_v21  ;;  %1131 = vmatprep.subr.bf16.mxu0 %v1289_v22  ;;  %v1324_v21 = vld [vmem:[%s1705_s4 + $0xa0] sm:$0xff]   ;;  %v1325_v22 = vld [vmem:[%s1705_s4 + $0x58] sm:$0xff]   ;;  %v1335_v32 = vld [vmem:[%s1705_s4 + $0xc8] sm:$0xff]  }
  0x16   :  { %1153 = vmatprep.subr.bf16.mxu1 %v1290_v24  ;;  %444 = vmatprep.mubr.bf16.mxu0 %v88_v53  ;;  %v1327_v24 = vld [vmem:[%s1705_s4 + $0xd8] sm:$0xff]  }
  0x17   :  { %484 = vmatprep.mubr.bf16.mxu1 %v90_v54  ;;  %v1077_v54 = vld [vmem:[%s1706_s2] ss:$0 sm:$0xff] }
  0x18   :  { %1132 = vmatpush3.bf16.msra.mxu0 %v1291_v25  ;;  %v1328_v25 = vld [vmem:[%s1705_s4 + $0x98] sm:$0xff]  }
  0x19   :  { %1154 = vmatpush3.bf16.msra.mxu1 %v1292_v26  ;;  %1133 = vmatprep.subr.bf16.mxu0 %v1293_v27  ;;  %v1329_v26 = vld [vmem:[%s1705_s4 + $0x50] sm:$0xff]  }
  0x1a   :  { %1155 = vmatprep.subr.bf16.mxu1 %v1294_v29  ;;  %v1330_v27 = vld [vmem:[%s1705_s4 + $0x10] sm:$0xff]  }
  0x1b   :  { %v1332_v29 = vld [vmem:[%s1705_s4 + $0x90] sm:$0xff]  }
  0x1c   :  { %1134 = vmatpush3.bf16.msra.mxu0 %v1295_v31  ;;  %v1334_v31 = vld [vmem:[%s1705_s4 + $0x8] sm:$0xff]  }
  0x1d   :  { %1156 = vmatpush3.bf16.msra.mxu1 %v1296_v33  ;;  %1135 = vmatprep.subr.bf16.mxu0 %v1297_v34  ;;  %v1336_v33 = vld [vmem:[%s1705_s4 + $0x88] sm:$0xff]   ;;  %v1337_v34 = vld [vmem:[%s1705_s4 + $0x40] sm:$0xff]  }
  0x1e   :  { %1157 = vmatprep.subr.bf16.mxu1 %v1298_v35  ;;  %v1338_v35 = vld [vmem:[%s1705_s4] sm:$0xff]  }
  0x20   :  { %1136 = vmatpush3.bf16.msra.mxu0 %v1299_v36  ;;  %v1339_v36 = vld [vmem:[%s1705_s4 + $0xc0] sm:$0xff]  }
  0x21   :  { %1158 = vmatpush3.bf16.msra.mxu1 %v1300_v37  ;;  %1227 = vmatprep.subr.bf16.mxu0 %v1349_v38  ;;  %v1340_v37 = vld [vmem:[%s1705_s4 + $0x80] sm:$0xff]  }
  0x22   :  { %1174 = vmatprep.subr.bf16.mxu1 %v1309_v6 }
  0x23   :  { %445 = vmatmul.mubr.bf16.vlgmr.msra.gmra.mxu0 %v87_v55 }
  0x24   :  { %485 = vmatmul.mubr.bf16.vlgmr.msra.gmra.mxu1 %v89_v52  ;;  %1228 = vmatpush3.bf16.msra.mxu0 %v1301_v56  ;;  %v1078_v56 = vld [vmem:[%s1707_s3] ss:$0 sm:$0xff] }
  0x25   :  { %1243 = vmatprep.mubr.msk.bf16.mxu0 %vm1350_vm6, %v1349_v38  ;;  %1229 = vmatprep.subr.bf16.mxu0 %v1349_v38 }
  0x26   :  { %1175 = vmatpush3.bf16.msra.mxu1 %v1310_v7 }
  0x27   :  { %1176 = vmatprep.subr.bf16.mxu1 %v1313_v10 }
  0x28   :  { %1230 = vmatpush3.bf16.msra.mxu0 %v1302_v57 }
  0x29   :  { %1231 = vmatprep.subr.bf16.mxu0 %v1349_v38 }
  0x2a   :  { %1177 = vmatpush3.bf16.msra.mxu1 %v1314_v11 }
  0x2b   :  { %1178 = vmatprep.subr.bf16.mxu1 %v1317_v14  ;;  %v1345_v14 = vld [vmem:[%s1705_s4 + $0x118] sm:$0xff]  }
  0x2c   :  { %1232 = vmatpush3.bf16.msra.mxu0 %v1303_v58 }
  0x2d   :  { %1233 = vmatprep.subr.bf16.mxu0 %v1349_v38 }
  0x2e   :  { %1179 = vmatpush3.bf16.msra.mxu1 %v1318_v15  ;;  %v1346_v15 = vld [vmem:[%s1705_s4 + $0x110] sm:$0xff]  }
  0x2f   :  { %1180 = vmatprep.subr.bf16.mxu1 %v1321_v18 }
  0x30   :  { %1234 = vmatpush3.bf16.msra.mxu0 %v1304_v59 }
  0x31   :  { %1235 = vmatprep.subr.bf16.mxu0 %v1349_v38 }
  0x32   :  { %1181 = vmatpush3.bf16.msra.mxu1 %v1322_v19  ;;  %v1348_v19 = vld [vmem:[%s1705_s4 + $0x100] sm:$0xff]  }
  0x33   :  { %1182 = vmatprep.subr.bf16.mxu1 %v1325_v22 }
  0x34   :  { %1236 = vmatpush3.bf16.msra.mxu0 %v1305_v60 }
  0x35   :  { %1237 = vmatprep.subr.bf16.mxu0 %v1349_v38 }
  0x36   :  { %1183 = vmatpush3.bf16.msra.mxu1 %v1326_v23 }
  0x37   :  { %1184 = vmatprep.subr.bf16.mxu1 %v1329_v26 }
  0x38   :  { %1238 = vmatpush3.bf16.msra.mxu0 %v1306_v62 }
  0x39   :  { %1239 = vmatprep.subr.bf16.mxu0 %v1349_v38 }
  0x3a   :  { %1185 = vmatpush3.bf16.msra.mxu1 %v1330_v27 }
  0x3b   :  { %1186 = vmatprep.subr.bf16.mxu1 %v1333_v30 }
  0x3c   :  { %1240 = vmatpush3.bf16.msra.mxu0 %v1307_v0 }
  0x3d   :  { %1241 = vmatprep.subr.bf16.mxu0 %v1349_v38 }
  0x3e   :  { %1187 = vmatpush3.bf16.msra.mxu1 %v1334_v31 }
  0x3f   :  { %1188 = vmatprep.subr.bf16.mxu1 %v1337_v34  ;;  %v1120_v34 = vld [vmem:[%s1709_s6] ss:$0 sm:$0xff] }
  0x40   :  { %1242 = vmatpush3.bf16.msra.mxu0 %v1308_v4 }
  0x41   :  { %1196 = vmatprep.subr.bf16.mxu0 %v1311_v8 }
  0x42   :  { %1189 = vmatpush3.bf16.msra.mxu1 %v1338_v35 }
  0x43   :  { %1244 = vmatmul.mubr.bf16.vlgmr.msra.gmra.mxu0 %v91_v5  ;;  %1247 = vmatprep.subr.bf16.mxu1 %v1349_v38 }
  0x44   :  { %1197 = vmatpush3.bf16.msra.mxu0 %v1312_v9 }
  0x45   :  { %1198 = vmatprep.subr.bf16.mxu0 %v1315_v12  ;;  %v1341_v12 = vld [vmem:[%s1705_s4 + $0x138] sm:$0xff]  }
  0x48   :  { %1199 = vmatpush3.bf16.msra.mxu0 %v1316_v13 }
  0x49   :  { %1200 = vmatprep.subr.bf16.mxu0 %v1319_v16 }
  0x4c   :  { %1201 = vmatpush3.bf16.msra.mxu0 %v1320_v17  ;;  %v1347_v17 = vld [vmem:[%s1705_s4 + $0x108] sm:$0xff]  }
  0x4d   :  { %1202 = vmatprep.subr.bf16.mxu0 %v1323_v20 }
  0x50   :  { %1203 = vmatpush3.bf16.msra.mxu0 %v1324_v21 }
  0x51   :  { %1204 = vmatprep.subr.bf16.mxu0 %v1327_v24 }
  0x54   :  { %1205 = vmatpush3.bf16.msra.mxu0 %v1328_v25 }
  0x55   :  { %1206 = vmatprep.subr.bf16.mxu0 %v1331_v28 }
  0x58   :  { %1207 = vmatpush3.bf16.msra.mxu0 %v1332_v29 }
  0x59   :  { %1208 = vmatprep.subr.bf16.mxu0 %v1335_v32 }
  0x5c   :  { %1209 = vmatpush3.bf16.msra.mxu0 %v1336_v33 }
  0x5d   :  { %1210 = vmatprep.subr.bf16.mxu0 %v1339_v36 }
  0x60   :  { %1211 = vmatpush3.bf16.msra.mxu0 %v1340_v37 }
  0xe3   :  { %v1137_v40 = vpop.f32.mrf.mxu0 }
  0xe4   :  { %v1159_v42 = vpop.f32.mrf.mxu1 }
  0xe5   :  { %v1138_v43 = vpop.f32.mrf.mxu0 }
  0xe6   :  { %v1160_v45 = vpop.f32.mrf.mxu1  ;;  %v1139_v50 = vadd.f32 %v1138_v43, %v1137_v40 }
  0xe7   :  { %v1140_v46 = vpop.f32.mrf.mxu0  ;;  %v1161_v51 = vadd.f32 %v1160_v45, %v1159_v42 }
  0xe8   :  { %v1162_v47 = vpop.f32.mrf.mxu1 }
  0xe9   :  { %v1141_v48 = vpop.f32.mrf.mxu0  ;;  %v487_v52 = vadd.f32 %v1161_v51, %v1139_v50 }
  0xea   :  { %v1163_v49 = vpop.f32.mrf.mxu1 }
 0x103   :  { %v526_v53 = vpop.f32.mrf.mxu0 }
 0x104   :  { %v527_v55 = vadd.f32 %v526_v53, %v487_v52 }
 0x105   :  { %v1245_v57 = vpop.f32.mrf.mxu0 }
 0x106   :  { %v539_v58 = vmul.f32 %v1077_v54, %v527_v55 }
 0x107   :  { %v529_v59 = vpop.f32.mrf.mxu0 }
 0x108   :  { %v547_v60 = vadd.f32 %v1078_v56, %v539_v58 }
 0x109   :  { %v1246_v61 = vpop.f32.mrf.mxu0 }
 0x10a   :  { %v548_v62 = vmax.f32 %v547_v60, 0.0 }
 0x10c   :  { %v554_v63 = vrot.slane %v548_v62, 7  ;;  %v558_v0 = vrot.slane %v548_v62, 1  ;;  %v550_v2 = vrot.slane %v548_v62, 6  ;;  %v568_v13 = vpack.c.bf16 %v548_v62, %v548_v62 }
 0x10d   :  { %v562_v16 = vrot.slane %v548_v62, 2 }
 0x10e   :  { %v556_v3 = vsel %vm74_vm0, 0.0, %v554_v63  ;;  %v560_v4 = vsel %vm79_vm1, %v558_v0, 0.0  ;;  %v552_v5 = vsel %vm69_vm2, 0.0, %v550_v2 }
 0x10f   :  { %v557_v6 = vmul.f32 %v1493_v39, %v556_v3  ;;  %v561_v7 = vmul.f32 %v1499_v41, %v560_v4  ;;  %v553_v8 = vmul.f32 %v1502_v44, %v552_v5  ;;  %v1342_v39 = vld [vmem:[%s1705_s4 + $0x130] sm:$0xff]   ;;  %v1343_v41 = vld [vmem:[%s1705_s4 + $0x128] sm:$0xff]   ;;  %v1344_v44 = vld [vmem:[%s1705_s4 + $0x120] sm:$0xff]   ;;  %v564_v18 = vsel %vm84_vm8, %v562_v16, 0.0 }
 0x110   :  { %v565_v20 = vmul.f32 %v1541_v1, %v564_v18 }
 0x111   :  { %v567_v9 = vpack.c.bf16 %v557_v6, %v557_v6  ;;  %v569_v10 = vpack.c.bf16 %v561_v7, %v561_v7  ;;  %v566_v11 = vpack.c.bf16 %v553_v8, %v553_v8 }
 0x112   :  { %v570_v21 = vpack.c.bf16 %v565_v20, %v565_v20 }
 0x113   :  { %923 = vmatprep.mubr.bf16.mxu1 %v567_v9  ;;  %963 = vmatprep.mubr.bf16.mxu0 %v569_v10 }
 0x114   :  { %924 = vmatmul.mubr.bf16.vlgmr.msra.gmra.mxu1 %v566_v11  ;;  %964 = vmatmul.mubr.bf16.vlgmr.msra.gmra.mxu0 %v568_v13 }
 0x115   :  { %1248 = vmatpush3.bf16.msra.mxu1 %v1341_v12  ;;  %1263 = vmatprep.mubr.msk.bf16.mxu1 %vm1350_vm6, %v1349_v38 }
 0x116   :  { %1249 = vmatprep.subr.bf16.mxu1 %v1349_v38 }
 0x119   :  { %1250 = vmatpush3.bf16.msra.mxu1 %v1342_v39 }
 0x11a   :  { %1251 = vmatprep.subr.bf16.mxu1 %v1349_v38 }
 0x11d   :  { %1252 = vmatpush3.bf16.msra.mxu1 %v1343_v41 }
 0x11e   :  { %1253 = vmatprep.subr.bf16.mxu1 %v1349_v38 }
 0x121   :  { %1254 = vmatpush3.bf16.msra.mxu1 %v1344_v44 }
 0x122   :  { %1255 = vmatprep.subr.bf16.mxu1 %v1349_v38 }
 0x125   :  { %1256 = vmatpush3.bf16.msra.mxu1 %v1345_v14 }
 0x126   :  { %1257 = vmatprep.subr.bf16.mxu1 %v1349_v38 }
 0x129   :  { %1258 = vmatpush3.bf16.msra.mxu1 %v1346_v15 }
 0x12a   :  { %1259 = vmatprep.subr.bf16.mxu1 %v1349_v38 }
 0x12d   :  { %1260 = vmatpush3.bf16.msra.mxu1 %v1347_v17 }
 0x12e   :  { %1261 = vmatprep.subr.bf16.mxu1 %v1349_v38  ;;  %v1119_v38 = vld [vmem:[%s1708_s5] ss:$0 sm:$0xff] }
 0x131   :  { %1262 = vmatpush3.bf16.msra.mxu1 %v1348_v19 }
 0x134   :  { %1264 = vmatmul.mubr.bf16.vlgmr.msra.gmra.mxu1 %v570_v21 }
 0x1d4   :  { %v1190_v22 = vpop.f32.mrf.mxu1  ;;  %v1212_v23 = vpop.f32.mrf.mxu0 }
 0x1d6   :  { %v1191_v24 = vpop.f32.mrf.mxu1  ;;  %v1213_v25 = vpop.f32.mrf.mxu0 }
 0x1d7   :  { %v1192_v30 = vadd.f32 %v1191_v24, %v1190_v22  ;;  %v1214_v31 = vadd.f32 %v1213_v25, %v1212_v23 }
 0x1d8   :  { %v1193_v26 = vpop.f32.mrf.mxu1  ;;  %v1215_v27 = vpop.f32.mrf.mxu0 }
 0x1d9   :  { %v966_v32 = vadd.f32 %v1214_v31, %v1192_v30 }
 0x1da   :  { %v1194_v28 = vpop.f32.mrf.mxu1  ;;  %v1216_v29 = vpop.f32.mrf.mxu0 }
 0x1f4   :  { %v1005_v33 = vpop.f32.mrf.mxu1 }
 0x1f5   :  { %v1006_v1 = vadd.f32 %v1005_v33, %v966_v32 }
 0x1f6   :  { %v1265_v35 = vpop.f32.mrf.mxu1 }
 0x1f7   :  { %v1018_v36 = vmul.f32 %v1119_v38, %v1006_v1 }
 0x1f8   :  { %v1008_v37 = vpop.f32.mrf.mxu1 }
 0x1f9   :  { %v1026_v40 = vadd.f32 %v1120_v34, %v1018_v36 }
 0x1fa   :  { %v1266_v42 = vpop.f32.mrf.mxu1 }
 0x1fb   :  { %v1027_v43 = vmax.f32 %v1026_v40, 0.0 }
 0x1fd   :  { %1028 = vst [vmem:[%s1710_s7] sm:$0xff] %v1027_v43 }

// kernel: intervals_model_forward.5
= control target key start
LH: loop header
LB: loop body
LE: loop exit
PB: predicated region body
PF: predicated region fallthrough
CT: control target
= control target key end

     0   :  { %12 = vsyncpa [#allocation3], 0  ;;  %s2094_s0 = inlined_call_operand.vmem [shape: f32[32,128], index: 0, kind: input, shape index: {}]   ;;  %s2095_s1 = inlined_call_operand.hbm [shape: bf16[640,128], index: 1, kind: input, shape index: {}]   ;;  %s2096_s2 = inlined_call_operand.vmem [shape: f32[1,128], index: 2, kind: input, shape index: {}]   ;;  %s2097_s3 = inlined_call_operand.vmem [shape: f32[1,128], index: 3, kind: input, shape index: {}]   ;;  %s2098_s4 = inlined_call_operand.hbm [shape: bf16[640,128], index: 4, kind: input, shape index: {}]   ;;  %s2099_s5 = inlined_call_operand.vmem [shape: f32[1,128], index: 5, kind: input, shape index: {}]   ;;  %s2100_s6 = inlined_call_operand.vmem [shape: f32[1,128], index: 6, kind: input, shape index: {}]   ;;  %s2101_s7 = inlined_call_operand.vmem [shape: f32[32,128], index: 7, kind: output, shape index: {}]  }
   0x1   :  { %13 = vsyncpa [#allocation5], 0  ;;  %s1954_s24 = smov 0  }
   0x2 LB: > { %s1478_s25 = sadd.s32 4294967295, %s1906_s24   ;;  %p1480_p0 = scmp.ge.s32.totalorder %s1906_s24, 1  ;;  %s1906_s24 = sphi %s1954_s24, %s19_s24  }
   0x3   : > { %p202_p1 = scmp.lt.s32.totalorder %s1906_s24, 3  ;;  %s1908_s26 = smov [#allocation2]  }
   0x4   : > { %s214_s27 = sshll.u32 %s1908_s26, 4  ;;  %p1968_p3 = scmp.eq.s32.totalorder %s1478_s25, 0  ;;  %s215_s27 = int_to_ptr.vmem [resolvable:$true] %s214_s27 }
   0x5   : > { %p1962_p2 = pnand %p1480_p0, %p202_p1  ;;  %s1909_s30 = smov [#allocation4]  }
   0x6   : > { %s233_s8 = sshll.u32 %s1909_s30, 4  ;;  %s1851_s10 = scalar_lea.vmem %s215_s27, 5120  ;;  %s234_s8 = int_to_ptr.vmem [resolvable:$true] %s233_s8 }
   0x7   : > { %p1735_p4 = pneg %p1962_p2  ;;  %p1852_p7 = scmp.ne.s32.totalorder %s215_s27, %s1851_s10 }
   0x8   : > { %p1859_p10 = scmp.lt.s32.totalorder %s215_s27, %s215_s27  ;;  %p1860_p11 = scmp.lt.s32.totalorder %s1851_s10, %s1851_s10 }
   0x9   : > { %p1976_p5 = pnand %p1968_p3, %p1735_p4 }
   0xa   : > { %p1861_p12 = por %p1860_p11, %p1859_p10 }
   0xb   : > { %p1842_p6 = pneg %p1976_p5 }
   0xd   : > { %p1854_p8 = pnand %p1852_p7, %p1842_p6 }
   0xf   : > { %p1855_p9 = pneg %p1854_p8 }
  0x11   : > { %p1862_p13 = pnand %p1861_p12, %p1855_p9 }
  0x13   : > { %1865 = shalt.err (!%p1862_p13)
}
  0x14   : > { %s1910_s11 = smov 64   ;;  %s1911_s12 = smov 4  }
  0x15   : > { %1738 = dma.hbm_to_vmem [thread:$0]  (!%p1976_p5), %s2095_s1, 5120, %s215_s27, [#allocation3], %s1910_s11, %s1910_s11, %s1911_s12  }
  0x16   : > { %s1877_s15 = scalar_lea.vmem %s234_s8, 5120  ;;  %p1885_p7 = scmp.lt.s32.totalorder %s234_s8, %s234_s8 }
  0x17   : > { %p1878_p0 = scmp.ne.s32.totalorder %s234_s8, %s1877_s15  ;;  %p1886_p8 = scmp.lt.s32.totalorder %s1877_s15, %s1877_s15 }
  0x19   : > { %p1880_p1 = pnand %p1878_p0, %p1842_p6  ;;  %p1887_p10 = por %p1886_p8, %p1885_p7 }
  0x1b   : > { %p1881_p4 = pneg %p1880_p1 }
  0x1d   : > { %p1888_p9 = pnand %p1887_p10, %p1881_p4 }
  0x1f   : > { %1891 = shalt.err (!%p1888_p9)
}
  0x20   : > { %1741 = dma.hbm_to_vmem [thread:$0]  (!%p1976_p5), %s2098_s4, 5120, %s234_s8, [#allocation5], %s1910_s11, %s1910_s11, %s1911_s12  }
  0x21   : > { %264 = sbr.rel (%p1962_p2) target bundleno = 556 (0x22c), region = 48 }
  0x26   : > { %1897 = dma.done.wait (%p1968_p3), [#allocation3], 5120  }
  0x27   : > { %1899 = vsyncadd (%p1968_p3), [#allocation3], 4294962176 }
  0x28   : > { %1901 = dma.done.wait (%p1968_p3), [#allocation5], 5120  }
  0x29   : > { %1903 = vsyncadd (%p1968_p3), [#allocation5], 4294962176  ;;  %v1760_v0 = vld [vmem:[#allocation2 + $0x78] sm:$0xff]   ;;  %v1764_v4 = vld [vmem:[#allocation2 + $0x70] sm:$0xff]   ;;  %v313_v10 = vlaneseq  ;;  %s1487_s18 = sshll.u32 %s1478_s25, 1  ;;  %vm401_vm0 = vcmask 1040384  }
  0x2a   : > { %v1761_v1 = vld [vmem:[#allocation2 + $0xf8] sm:$0xff]   ;;  %1581 = vmatprep.subr.bf16.mxu0 %v1760_v0  ;;  %v1765_v5 = vld [vmem:[#allocation2 + $0xf0] sm:$0xff]   ;;  %v1768_v8 = vld [vmem:[#allocation2 + $0x68] sm:$0xff]   ;;  %p301_p2 = scmp.lt.s32.totalorder %s1487_s18, 3  ;;  %vm410_vm1 = vcmask 1046528   ;;  %vm392_vm3 = vcmask 1041408  }
  0x2b   : > { %v1762_v2 = vld [vmem:[#allocation2 + $0x38] sm:$0xff]   ;;  %1603 = vmatprep.subr.bf16.mxu1 %v1761_v1  ;;  %v1766_v6 = vld [vmem:[#allocation2 + $0x30] sm:$0xff]   ;;  %v1769_v9 = vld [vmem:[#allocation2 + $0xe8] sm:$0xff]   ;;  %v314_v15 = vshrl.u32 %v313_v10, 7  ;;  %v1912_v39 = vmov 0.0   ;;  %vm419_vm7 = vcmask 1045504  }
  0x2c   : > { %v1763_v3 = vld [vmem:[#allocation2 + $0xb8] sm:$0xff]   ;;  %1582 = vmatpush3.bf16.msra.mxu0 %v1762_v2  ;;  %v1767_v7 = vld [vmem:[#allocation2 + $0xb0] sm:$0xff]   ;;  %v1770_v11 = vld [vmem:[#allocation2 + $0x28] sm:$0xff]   ;;  %s2106_s18 = smov (!%p301_p2, %s1487_s18), 3  ;;  %vm1913_vm8 = vmmov 0  }
  0x2d   : > { %1604 = vmatpush3.bf16.msra.mxu1 %v1763_v3  ;;  %1583 = vmatprep.subr.bf16.mxu0 %v1764_v4  ;;  %v1771_v12 = vld [vmem:[#allocation2 + $0xa8] sm:$0xff]   ;;  %v1772_v13 = vld [vmem:[#allocation2 + $0x60] sm:$0xff]   ;;  %v1776_v18 = vld [vmem:[#allocation2 + $0x58] sm:$0xff]   ;;  %v315_v20 = vadd.s32 8, %v314_v15  ;;  %v320_v23 = vand.u32 15, %v314_v15  ;;  %s1488_s19 = sshll.u32 %s2106_s18, 3 }
  0x2e   : > { %1605 = vmatprep.subr.bf16.mxu1 %v1765_v5  ;;  %v1773_v14 = vld [vmem:[#allocation2 + $0xe0] sm:$0xff]   ;;  %v1777_v19 = vld [vmem:[#allocation2 + $0xd8] sm:$0xff]   ;;  %v1780_v24 = vld [vmem:[#allocation2 + $0x50] sm:$0xff]   ;;  %s304_s22 = scalar_lea.vmem %s2094_s0, %s1488_s19  ;;  %s310_s11 = scalar_lea.vmem %s2101_s7, %s1488_s19 }
  0x2f   : > { %v1774_v16 = vld [vmem:[#allocation2 + $0x20] sm:$0xff]   ;;  %v1778_v21 = vld [vmem:[#allocation2 + $0x18] sm:$0xff]   ;;  %v1781_v25 = vld [vmem:[#allocation2 + $0xd0] sm:$0xff]   ;;  %v327_v26 = vand.u32 15, %v315_v20  ;;  %v352_v29 = vadd.s32 4294967295, %v320_v23  ;;  %v340_v34 = vadd.s32 4294967294, %v320_v23 }
  0x30   : > { %1584 = vmatpush3.bf16.msra.mxu0 %v1766_v6  ;;  %v1775_v17 = vld [vmem:[#allocation2 + $0xa0] sm:$0xff]   ;;  %v1779_v22 = vld [vmem:[#allocation2 + $0x98] sm:$0xff]   ;;  %v1782_v27 = vld [vmem:[#allocation2 + $0x10] sm:$0xff]  }
  0x31   : > { %1606 = vmatpush3.bf16.msra.mxu1 %v1767_v7  ;;  %1585 = vmatprep.subr.bf16.mxu0 %v1768_v8  ;;  %v1783_v28 = vld [vmem:[#allocation2 + $0x90] sm:$0xff]   ;;  %v1784_v30 = vld [vmem:[#allocation2 + $0x48] sm:$0xff]   ;;  %v365_v32 = vadd.s32 1, %v327_v26  ;;  %vm354_vm2 = vcmp.ge.s32.totalorder %v352_v29, 0  ;;  %v1788_v36 = vld [vmem:[#allocation2 + $0x40] sm:$0xff]   ;;  %vm342_vm5 = vcmp.ge.s32.totalorder %v340_v34, 0 }
  0x32   : > { %1607 = vmatprep.subr.bf16.mxu1 %v1769_v9  ;;  %v1785_v31 = vld [vmem:[#allocation2 + $0xc8] sm:$0xff]   ;;  %v1789_v37 = vld [vmem:[#allocation2 + $0xc0] sm:$0xff]   ;;  %v2019_v40 = vsel %vm354_vm2, 1.0, %v1912_v39  ;;  %v377_v45 = vadd.s32 2, %v327_v26  ;;  %v2026_v50 = vsel %vm342_vm5, 1.0, %v1912_v39  ;;  %v1792_v1 = vld [vmem:[#allocation2 + $0x138] sm:$0xff]  }
  0x33   : > { %v1786_v33 = vld [vmem:[#allocation2 + $0x8] sm:$0xff]   ;;  %vm369_vm4 = vcmp.lt.s32.totalorder %v365_v32, 16  ;;  %v1790_v38 = vld [vmem:[#allocation2] sm:$0xff]   ;;  %v1793_v5 = vld [vmem:[#allocation2 + $0x130] sm:$0xff]  }
  0x34   : > { %1586 = vmatpush3.bf16.msra.mxu0 %v1770_v11  ;;  %v1787_v35 = vld [vmem:[#allocation2 + $0x88] sm:$0xff]   ;;  %v1791_v41 = vld [vmem:[#allocation2 + $0x80] sm:$0xff]   ;;  %v2022_v44 = vsel %vm369_vm4, 1.0, %v1912_v39  ;;  %vm381_vm6 = vcmp.lt.s32.totalorder %v377_v45, 16  ;;  %v1796_v10 = vld [vmem:[#allocation2 + $0x118] sm:$0xff]  }
  0x35   : > { %1608 = vmatpush3.bf16.msra.mxu1 %v1771_v12  ;;  %1587 = vmatprep.subr.bf16.mxu0 %v1772_v13  ;;  %v388_v42 = vld [vmem:[%s304_s22] sm:$0xff]  ;;  %v389_v43 = vld [vmem:[%s304_s22 + $0x8] sm:$0xff]  ;;  %v2038_v4 = vsel %vm381_vm6, 1.0, %v1912_v39  ;;  %v1797_v11 = vld [vmem:[#allocation2 + $0x110] sm:$0xff]  }
  0x36   : > { %1609 = vmatprep.subr.bf16.mxu1 %v1773_v14  ;;  %v402_v46 = vrot.slane %v388_v42, 7  ;;  %v403_v47 = vrot.slane %v389_v43, 7  ;;  %v411_v48 = vrot.slane %v388_v42, 1  ;;  %v412_v49 = vrot.slane %v389_v43, 1  ;;  %v1794_v8 = vld [vmem:[#allocation2 + $0x128] sm:$0xff]   ;;  %v1795_v9 = vld [vmem:[#allocation2 + $0x120] sm:$0xff]  }
  0x37   : > { %v393_v51 = vrot.slane %v388_v42, 6  ;;  %v394_v52 = vrot.slane %v389_v43, 6  ;;  %v430_v62 = vpack.c.bf16 %v389_v43, %v388_v42  ;;  %v421_v2 = vrot.slane %v389_v43, 2  ;;  %v1798_v12 = vld [vmem:[#allocation2 + $0x108] sm:$0xff]   ;;  %v1799_v13 = vld [vmem:[#allocation2 + $0x100] sm:$0xff]   ;;  %v1803_v20 = vld [vmem:[#allocation4 + $0x70] sm:$0xff]  }
  0x38   : > { %1588 = vmatpush3.bf16.msra.mxu0 %v1774_v16  ;;  %v404_v53 = vsel %vm401_vm0, %v402_v46, %v403_v47  ;;  %v407_v54 = vsel %vm401_vm0, 0.0, %v402_v46  ;;  %v413_v55 = vsel %vm410_vm1, %v411_v48, %v412_v49  ;;  %v416_v56 = vsel %vm410_vm1, %v412_v49, 0.0  ;;  %v1805_v23 = vld [vmem:[#allocation4 + $0x30] sm:$0xff]   ;;  %v1810_v26 = vld [vmem:[#allocation4 + $0xe8] sm:$0xff]   ;;  %v1811_v29 = vld [vmem:[#allocation4 + $0x60] sm:$0xff]  }
  0x39   : > { %1610 = vmatpush3.bf16.msra.mxu1 %v1775_v17  ;;  %1589 = vmatprep.subr.bf16.mxu0 %v1776_v18  ;;  %v408_v57 = vmul.f32 %v2019_v40, %v407_v54  ;;  %v418_v58 = vmul.f32 %v2022_v44, %v416_v56  ;;  %v395_v59 = vsel %vm392_vm3, %v393_v51, %v394_v52  ;;  %v398_v60 = vsel %vm392_vm3, 0.0, %v393_v51  ;;  %v1800_v17 = vld [vmem:[#allocation4 + $0x78] sm:$0xff]   ;;  %v1824_v43 = vld [vmem:[#allocation4 + $0x90] sm:$0xff]   ;;  %v1825_v45 = vld [vmem:[#allocation4 + $0x8] sm:$0xff]  }
  0x3a   : > { %1611 = vmatprep.subr.bf16.mxu1 %v1777_v19  ;;  %v399_v61 = vmul.f32 %v2026_v50, %v398_v60  ;;  %v420_v6 = vrot.slane %v388_v42, 2  ;;  %v425_v7 = vsel %vm419_vm7, %v421_v2, 0.0  ;;  %v1801_v18 = vld [vmem:[#allocation4 + $0x38] sm:$0xff]   ;;  %v1823_v42 = vld [vmem:[#allocation4 + $0x48] sm:$0xff]   ;;  %v1827_v47 = vld [vmem:[#allocation4 + $0x40] sm:$0xff]  }
  0x3b   : > { %v429_v63 = vpack.c.bf16 %v404_v53, %v408_v57  ;;  %v431_v0 = vpack.c.bf16 %v418_v58, %v413_v55  ;;  %v427_v14 = vmul.f32 %v2038_v4, %v425_v7  ;;  %v1802_v19 = vld [vmem:[#allocation4 + $0xf8] sm:$0xff]   ;;  %v1826_v46 = vld [vmem:[#allocation4 + $0xc8] sm:$0xff]   ;;  %v1829_v49 = vld [vmem:[#allocation4] sm:$0xff]  }
  0x3c   : > { %1590 = vmatpush3.bf16.msra.mxu0 %v1778_v21  ;;  %v428_v3 = vpack.c.bf16 %v395_v59, %v399_v61  ;;  %v422_v15 = vsel %vm419_vm7, %v420_v6, %v421_v2  ;;  %v1804_v21 = vld [vmem:[#allocation4 + $0xb8] sm:$0xff]   ;;  %v1828_v48 = vld [vmem:[#allocation4 + $0x88] sm:$0xff]   ;;  %v1830_v51 = vld [vmem:[#allocation4 + $0xc0] sm:$0xff]  }
  0x3d   : > { %1612 = vmatpush3.bf16.msra.mxu1 %v1779_v22  ;;  %1591 = vmatprep.subr.bf16.mxu0 %v1780_v24  ;;  %v432_v16 = vpack.c.bf16 %v427_v14, %v422_v15  ;;  %v1806_v22 = vld [vmem:[#allocation4 + $0xf0] sm:$0xff]   ;;  %v1815_v32 = vld [vmem:[#allocation4 + $0x58] sm:$0xff]   ;;  %v1831_v52 = vld [vmem:[#allocation4 + $0x80] sm:$0xff]  }
  0x3e   : > { %1613 = vmatprep.subr.bf16.mxu1 %v1781_v25  ;;  %785 = vmatprep.mubr.bf16.mxu0 %v429_v63  ;;  %v1808_v24 = vld [vmem:[#allocation4 + $0xb0] sm:$0xff]   ;;  %v1807_v25 = vld [vmem:[#allocation4 + $0x68] sm:$0xff]   ;;  %v1817_v34 = vld [vmem:[#allocation4 + $0x18] sm:$0xff]  }
  0x3f   : > { %826 = vmatprep.mubr.bf16.mxu1 %v431_v0  ;;  %v1536_v6 = vld [vmem:[%s2097_s3] ss:$0 sm:$0xff] }
  0x40   : > { %1592 = vmatpush3.bf16.msra.mxu0 %v1782_v27  ;;  %v1809_v27 = vld [vmem:[#allocation4 + $0x28] sm:$0xff]  }
  0x41   : > { %1614 = vmatpush3.bf16.msra.mxu1 %v1783_v28  ;;  %1593 = vmatprep.subr.bf16.mxu0 %v1784_v30  ;;  %v1812_v28 = vld [vmem:[#allocation4 + $0xa8] sm:$0xff]   ;;  %v1813_v30 = vld [vmem:[#allocation4 + $0x20] sm:$0xff]  }
  0x42   : > { %1615 = vmatprep.subr.bf16.mxu1 %v1785_v31  ;;  %v1814_v31 = vld [vmem:[#allocation4 + $0xe0] sm:$0xff]  }
  0x44   : > { %1594 = vmatpush3.bf16.msra.mxu0 %v1786_v33  ;;  %v1816_v33 = vld [vmem:[#allocation4 + $0xa0] sm:$0xff]  }
  0x45   : > { %1616 = vmatpush3.bf16.msra.mxu1 %v1787_v35  ;;  %1595 = vmatprep.subr.bf16.mxu0 %v1788_v36  ;;  %v1818_v35 = vld [vmem:[#allocation4 + $0xd8] sm:$0xff]   ;;  %v1819_v36 = vld [vmem:[#allocation4 + $0x50] sm:$0xff]  }
  0x46   : > { %1617 = vmatprep.subr.bf16.mxu1 %v1789_v37  ;;  %v1820_v37 = vld [vmem:[#allocation4 + $0x98] sm:$0xff]  }
  0x48   : > { %1596 = vmatpush3.bf16.msra.mxu0 %v1790_v38  ;;  %v1821_v38 = vld [vmem:[#allocation4 + $0x10] sm:$0xff]  }
  0x49   : > { %1618 = vmatpush3.bf16.msra.mxu1 %v1791_v41  ;;  %1687 = vmatprep.subr.bf16.mxu0 %v1912_v39  ;;  %v1822_v41 = vld [vmem:[#allocation4 + $0xd0] sm:$0xff]  }
  0x4a   : > { %1634 = vmatprep.subr.bf16.mxu1 %v1800_v17 }
  0x4b   : > { %786 = vmatmul.mubr.bf16.vlgmr.msra.gmra.mxu0 %v428_v3  ;;  %v1535_v3 = vld [vmem:[%s2096_s2] ss:$0 sm:$0xff] }
  0x4c   : > { %827 = vmatmul.mubr.bf16.vlgmr.msra.gmra.mxu1 %v430_v62  ;;  %1688 = vmatpush3.bf16.msra.mxu0 %v1792_v1 }
  0x4d   : > { %1703 = vmatprep.mubr.msk.bf16.mxu0 %vm1913_vm8, %v1912_v39  ;;  %1689 = vmatprep.subr.bf16.mxu0 %v1912_v39 }
  0x4e   : > { %1635 = vmatpush3.bf16.msra.mxu1 %v1801_v18 }
  0x4f   : > { %1636 = vmatprep.subr.bf16.mxu1 %v1803_v20 }
  0x50   : > { %1690 = vmatpush3.bf16.msra.mxu0 %v1793_v5 }
  0x51   : > { %1691 = vmatprep.subr.bf16.mxu0 %v1912_v39 }
  0x52   : > { %1637 = vmatpush3.bf16.msra.mxu1 %v1805_v23 }
  0x53   : > { %1638 = vmatprep.subr.bf16.mxu1 %v1807_v25 }
  0x54   : > { %1692 = vmatpush3.bf16.msra.mxu0 %v1794_v8 }
  0x55   : > { %1693 = vmatprep.subr.bf16.mxu0 %v1912_v39 }
  0x56   : > { %1639 = vmatpush3.bf16.msra.mxu1 %v1809_v27 }
  0x57   : > { %1640 = vmatprep.subr.bf16.mxu1 %v1811_v29 }
  0x58   : > { %1694 = vmatpush3.bf16.msra.mxu0 %v1795_v9 }
  0x59   : > { %1695 = vmatprep.subr.bf16.mxu0 %v1912_v39 }
  0x5a   : > { %1641 = vmatpush3.bf16.msra.mxu1 %v1813_v30 }
  0x5b   : > { %1642 = vmatprep.subr.bf16.mxu1 %v1815_v32 }
  0x5c   : > { %1696 = vmatpush3.bf16.msra.mxu0 %v1796_v10 }
  0x5d   : > { %1697 = vmatprep.subr.bf16.mxu0 %v1912_v39 }
  0x5e   : > { %1643 = vmatpush3.bf16.msra.mxu1 %v1817_v34 }
  0x5f   : > { %1644 = vmatprep.subr.bf16.mxu1 %v1819_v36 }
  0x60   : > { %1698 = vmatpush3.bf16.msra.mxu0 %v1797_v11 }
  0x61   : > { %1699 = vmatprep.subr.bf16.mxu0 %v1912_v39 }
  0x62   : > { %1645 = vmatpush3.bf16.msra.mxu1 %v1821_v38  ;;  %v1836_v38 = vld [vmem:[#allocation4 + $0x118] sm:$0xff]  }
  0x63   : > { %1646 = vmatprep.subr.bf16.mxu1 %v1823_v42 }
  0x64   : > { %1700 = vmatpush3.bf16.msra.mxu0 %v1798_v12 }
  0x65   : > { %1701 = vmatprep.subr.bf16.mxu0 %v1912_v39 }
  0x66   : > { %1647 = vmatpush3.bf16.msra.mxu1 %v1825_v45 }
  0x67   : > { %1648 = vmatprep.subr.bf16.mxu1 %v1827_v47 }
  0x68   : > { %1702 = vmatpush3.bf16.msra.mxu0 %v1799_v13 }
  0x69   : > { %1656 = vmatprep.subr.bf16.mxu0 %v1802_v19 }
  0x6a   : > { %1649 = vmatpush3.bf16.msra.mxu1 %v1829_v49 }
  0x6b   : > { %1704 = vmatmul.mubr.bf16.vlgmr.msra.gmra.mxu0 %v432_v16  ;;  %1707 = vmatprep.subr.bf16.mxu1 %v1912_v39 }
  0x6c   : > { %1657 = vmatpush3.bf16.msra.mxu0 %v1804_v21 }
  0x6d   : > { %1658 = vmatprep.subr.bf16.mxu0 %v1806_v22 }
  0x70   : > { %1659 = vmatpush3.bf16.msra.mxu0 %v1808_v24 }
  0x71   : > { %1660 = vmatprep.subr.bf16.mxu0 %v1810_v26 }
  0x74   : > { %1661 = vmatpush3.bf16.msra.mxu0 %v1812_v28 }
  0x75   : > { %1662 = vmatprep.subr.bf16.mxu0 %v1814_v31 }
  0x78   : > { %1663 = vmatpush3.bf16.msra.mxu0 %v1816_v33  ;;  %v1832_v33 = vld [vmem:[#allocation4 + $0x138] sm:$0xff]  }
  0x79   : > { %1664 = vmatprep.subr.bf16.mxu0 %v1818_v35 }
  0x7c   : > { %1665 = vmatpush3.bf16.msra.mxu0 %v1820_v37  ;;  %v1834_v37 = vld [vmem:[#allocation4 + $0x128] sm:$0xff]  }
  0x7d   : > { %1666 = vmatprep.subr.bf16.mxu0 %v1822_v41  ;;  %v1837_v41 = vld [vmem:[#allocation4 + $0x110] sm:$0xff]  }
  0x80   : > { %1667 = vmatpush3.bf16.msra.mxu0 %v1824_v43  ;;  %v1838_v43 = vld [vmem:[#allocation4 + $0x108] sm:$0xff]  }
  0x81   : > { %1668 = vmatprep.subr.bf16.mxu0 %v1826_v46  ;;  %v1839_v46 = vld [vmem:[#allocation4 + $0x100] sm:$0xff]  }
  0x84   : > { %1669 = vmatpush3.bf16.msra.mxu0 %v1828_v48 }
  0x85   : > { %1670 = vmatprep.subr.bf16.mxu0 %v1830_v51 }
  0x88   : > { %1671 = vmatpush3.bf16.msra.mxu0 %v1831_v52 }
 0x10b   : > { %v1597_v53 = vpop.f32.mrf.mxu0 }
 0x10c   : > { %v1619_v54 = vpop.f32.mrf.mxu1 }
 0x10d   : > { %v1598_v55 = vpop.f32.mrf.mxu0 }
 0x10e   : > { %v1620_v56 = vpop.f32.mrf.mxu1  ;;  %v1599_v59 = vadd.f32 %v1598_v55, %v1597_v53 }
 0x10f   : > { %v1600_v57 = vpop.f32.mrf.mxu0  ;;  %v1621_v60 = vadd.f32 %v1620_v56, %v1619_v54 }
 0x110   : > { %v1622_v58 = vpop.f32.mrf.mxu1 }
 0x111   : > { %v1601_v61 = vpop.f32.mrf.mxu0  ;;  %v829_v1 = vadd.f32 %v1621_v60, %v1599_v59 }
 0x112   : > { %v1623_v62 = vpop.f32.mrf.mxu1  ;;  %v1602_v63 = vadd.f32 %v1601_v61, %v1600_v57 }
 0x113   : > { %v1624_v0 = vadd.f32 %v1623_v62, %v1622_v58 }
 0x115   : > { %v832_v9 = vadd.f32 %v1624_v0, %v1602_v63  ;;  %v1577_v63 = vld [vmem:[%s2099_s5] ss:$0 sm:$0xff] }
 0x12b   : > { %v869_v2 = vpop.f32.mrf.mxu0 }
 0x12c   : > { %v870_v5 = vadd.f32 %v869_v2, %v829_v1  ;;  %v1578_v2 = vld [vmem:[%s2100_s6] ss:$0 sm:$0xff] }
 0x12d   : > { %v1705_v7 = vpop.f32.mrf.mxu0 }
 0x12e   : > { %v883_v8 = vmul.f32 %v1535_v3, %v870_v5 }
 0x12f   : > { %v872_v10 = vpop.f32.mrf.mxu0 }
 0x130   : > { %v892_v11 = vadd.f32 %v1536_v6, %v883_v8  ;;  %v873_v12 = vadd.f32 %v872_v10, %v832_v9 }
 0x131   : > { %v1706_v13 = vpop.f32.mrf.mxu0 }
 0x132   : > { %v894_v14 = vmax.f32 %v892_v11, 0.0  ;;  %v884_v15 = vmul.f32 %v1535_v3, %v873_v12 }
 0x134   : > { %v893_v16 = vadd.f32 %v1536_v6, %v884_v15  ;;  %v906_v17 = vrot.slane %v894_v14, 7  ;;  %v898_v18 = vrot.slane %v894_v14, 6  ;;  %v914_v29 = vrot.slane %v894_v14, 1 }
 0x135   : > { %v922_v48 = vrot.slane %v894_v14, 2 }
 0x136   : > { %v895_v19 = vmax.f32 %v893_v16, 0.0  ;;  %v911_v20 = vsel %vm401_vm0, 0.0, %v906_v17  ;;  %v903_v21 = vsel %vm392_vm3, 0.0, %v898_v18 }
 0x137   : > { %v912_v25 = vmul.f32 %v2019_v40, %v911_v20  ;;  %v904_v26 = vmul.f32 %v2026_v50, %v903_v21  ;;  %v1833_v50 = vld [vmem:[#allocation4 + $0x130] sm:$0xff]  }
 0x138   : > { %v907_v22 = vrot.slane %v895_v19, 7  ;;  %v899_v23 = vrot.slane %v895_v19, 6  ;;  %v915_v24 = vrot.slane %v895_v19, 1  ;;  %v932_v40 = vpack.c.bf16 %v895_v19, %v894_v14 }
 0x139   : > { %v923_v42 = vrot.slane %v895_v19, 2 }
 0x13a   : > { %v908_v27 = vsel %vm401_vm0, %v906_v17, %v907_v22  ;;  %v900_v28 = vsel %vm392_vm3, %v898_v18, %v899_v23  ;;  %v919_v30 = vsel %vm410_vm1, %v915_v24, 0.0  ;;  %v916_v35 = vsel %vm410_vm1, %v914_v29, %v915_v24 }
 0x13b   : > { %v931_v31 = vpack.c.bf16 %v908_v27, %v912_v25  ;;  %v930_v32 = vpack.c.bf16 %v900_v28, %v904_v26  ;;  %v921_v34 = vmul.f32 %v2022_v44, %v919_v30  ;;  %v1835_v44 = vld [vmem:[#allocation4 + $0x120] sm:$0xff]   ;;  %v927_v45 = vsel %vm419_vm7, %v923_v42, 0.0 }
 0x13c   : > { %v929_v47 = vmul.f32 %v2038_v4, %v927_v45  ;;  %v924_v49 = vsel %vm419_vm7, %v922_v48, %v923_v42 }
 0x13d   : > { %1287 = vmatprep.mubr.bf16.mxu1 %v931_v31  ;;  %v933_v36 = vpack.c.bf16 %v921_v34, %v916_v35 }
 0x13e   : > { %1288 = vmatmul.mubr.bf16.vlgmr.msra.gmra.mxu1 %v930_v32  ;;  %v934_v51 = vpack.c.bf16 %v929_v47, %v924_v49 }
 0x13f   : > { %1708 = vmatpush3.bf16.msra.mxu1 %v1832_v33  ;;  %1328 = vmatprep.mubr.bf16.mxu0 %v933_v36 }
 0x140   : > { %1329 = vmatmul.mubr.bf16.vlgmr.msra.gmra.mxu0 %v932_v40  ;;  %1709 = vmatprep.subr.bf16.mxu1 %v1912_v39 }
 0x141   : > { %1723 = vmatprep.mubr.msk.bf16.mxu1 %vm1913_vm8, %v1912_v39 }
 0x143   : > { %1710 = vmatpush3.bf16.msra.mxu1 %v1833_v50 }
 0x144   : > { %1711 = vmatprep.subr.bf16.mxu1 %v1912_v39 }
 0x147   : > { %1712 = vmatpush3.bf16.msra.mxu1 %v1834_v37 }
 0x148   : > { %1713 = vmatprep.subr.bf16.mxu1 %v1912_v39 }
 0x14b   : > { %1714 = vmatpush3.bf16.msra.mxu1 %v1835_v44 }
 0x14c   : > { %1715 = vmatprep.subr.bf16.mxu1 %v1912_v39 }
 0x14f   : > { %1716 = vmatpush3.bf16.msra.mxu1 %v1836_v38 }
 0x150   : > { %1717 = vmatprep.subr.bf16.mxu1 %v1912_v39 }
 0x153   : > { %1718 = vmatpush3.bf16.msra.mxu1 %v1837_v41 }
 0x154   : > { %1719 = vmatprep.subr.bf16.mxu1 %v1912_v39 }
 0x157   : > { %1720 = vmatpush3.bf16.msra.mxu1 %v1838_v43 }
 0x158   : > { %1721 = vmatprep.subr.bf16.mxu1 %v1912_v39 }
 0x15b   : > { %1722 = vmatpush3.bf16.msra.mxu1 %v1839_v46 }
 0x15e   : > { %1724 = vmatmul.mubr.bf16.vlgmr.msra.gmra.mxu1 %v934_v51 }
 0x1fe   : > { %v1650_v53 = vpop.f32.mrf.mxu1 }
 0x200   : > { %v1672_v52 = vpop.f32.mrf.mxu0  ;;  %v1651_v55 = vpop.f32.mrf.mxu1 }
 0x201   : > { %v1652_v60 = vadd.f32 %v1651_v55, %v1650_v53 }
 0x202   : > { %v1673_v54 = vpop.f32.mrf.mxu0  ;;  %v1653_v57 = vpop.f32.mrf.mxu1 }
 0x203   : > { %v1674_v58 = vadd.f32 %v1673_v54, %v1672_v52 }
 0x204   : > { %v1675_v56 = vpop.f32.mrf.mxu0  ;;  %v1654_v61 = vpop.f32.mrf.mxu1 }
 0x205   : > { %v1331_v62 = vadd.f32 %v1674_v58, %v1652_v60  ;;  %v1655_v0 = vadd.f32 %v1654_v61, %v1653_v57 }
 0x206   : > { %v1676_v59 = vpop.f32.mrf.mxu0 }
 0x207   : > { %v1677_v39 = vadd.f32 %v1676_v59, %v1675_v56 }
 0x209   : > { %v1334_v6 = vadd.f32 %v1677_v39, %v1655_v0 }
 0x21e   : > { %v1371_v4 = vpop.f32.mrf.mxu1 }
 0x21f   : > { %v1372_v1 = vadd.f32 %v1371_v4, %v1331_v62 }
 0x220   : > { %v1725_v3 = vpop.f32.mrf.mxu1 }
 0x221   : > { %v1385_v5 = vmul.f32 %v1577_v63, %v1372_v1 }
 0x222   : > { %v1374_v7 = vpop.f32.mrf.mxu1 }
 0x223   : > { %v1394_v8 = vadd.f32 %v1578_v2, %v1385_v5  ;;  %v1375_v9 = vadd.f32 %v1374_v7, %v1334_v6 }
 0x224   : > { %v1726_v10 = vpop.f32.mrf.mxu1 }
 0x225   : > { %v1396_v11 = vmax.f32 %v1394_v8, 0.0  ;;  %v1386_v12 = vmul.f32 %v1577_v63, %v1375_v9 }
 0x227   : > { %1398 = vst [vmem:[%s310_s11] sm:$0xff] %v1396_v11  ;;  %v1395_v13 = vadd.f32 %v1578_v2, %v1386_v12 }
 0x229   : > { %v1397_v14 = vmax.f32 %v1395_v13, 0.0 }
 0x22b   : > { %1399 = vst [vmem:[%s310_s11 + $0x8] sm:$0xff] %v1397_v14 }
 0x22c PF: > { %s19_s24 = sadd.s32 1, %s1906_s24  }
 0x22d   : > { %p16_p3 = scmp.ge.s32.totalorder %s19_s24, 4  }
 0x22f   :  { %18 = sbr.rel (!%p16_p3) target bundleno = 2 (0x2), region = 87 }
 0x234   :  { %1422 = vsyncpa [#allocation3], 1 }
 0x235   :  { %1424 = vsyncpa [#allocation3 + $0x1], 1 }
 0x236   :  { %1425 = vsyncpa [#allocation5], 1 }

// kernel: intervals_model_forward.6
= control target key start
LH: loop header
LB: loop body
LE: loop exit
PB: predicated region body
PF: predicated region fallthrough
CT: control target
= control target key end

     0   :  { %s1713_s24 = smov 0   ;;  %s2041_s0 = inlined_call_operand.vmem [shape: f32[16,128], index: 0, kind: input, shape index: {}]   ;;  %s2042_s1 = inlined_call_operand.vmem [shape: bf16[640,128], index: 1, kind: input, shape index: {}]   ;;  %s2043_s2 = inlined_call_operand.vmem [shape: f32[1,128], index: 2, kind: input, shape index: {}]   ;;  %s2044_s3 = inlined_call_operand.vmem [shape: f32[1,128], index: 3, kind: input, shape index: {}]   ;;  %s2045_s4 = inlined_call_operand.vmem [shape: bf16[640,128], index: 4, kind: input, shape index: {}]   ;;  %s2046_s5 = inlined_call_operand.vmem [shape: f32[1,128], index: 5, kind: input, shape index: {}]   ;;  %s2047_s6 = inlined_call_operand.vmem [shape: f32[1,128], index: 6, kind: input, shape index: {}]   ;;  %s2048_s7 = inlined_call_operand.vmem [shape: f32[16,128], index: 7, kind: output, shape index: {}]  }
   0x1 LB: > { %s1330_s25 = sadd.s32 4294967295, %s1669_s24   ;;  %p1334_p0 = scmp.ge.s32.totalorder %s1669_s24, 1  ;;  %s1669_s24 = sphi %s1713_s24, %s17_s24  }
   0x2   : > { %p236_p1 = scmp.lt.s32.totalorder %s1669_s24, 3 }
   0x4   : > { %p237_p2 = pnand %p1334_p0, %p236_p1 }
   0x5   : > { %p266_p3 = scmp.lt.s32.totalorder (!%p237_p2), %s1330_s25, 1 }
   0x6   : > { %240 = sbr.rel (%p237_p2) target bundleno = 520 (0x208), region = 48 }
   0xb   : > { %v1583_v0 = vld [vmem:[%s2042_s1 + $0x78] sm:$0xff]   ;;  %v1587_v4 = vld [vmem:[%s2042_s1 + $0x70] sm:$0xff]   ;;  %v1591_v8 = vld [vmem:[%s2042_s1 + $0x68] sm:$0xff]   ;;  %v275_v9 = vlaneseq  ;;  %s2050_s25 = smov (!%p266_p3, %s1330_s25), 1  ;;  %vm322_vm1 = vcmask 1040384   ;;  %v1671_v34 = vmov 0.0  }
   0xc   : > { %v1584_v1 = vld [vmem:[%s2042_s1 + $0xf8] sm:$0xff]   ;;  %1427 = vmatprep.subr.bf16.mxu0 %v1583_v0  ;;  %v1588_v5 = vld [vmem:[%s2042_s1 + $0xf0] sm:$0xff]   ;;  %v1592_v10 = vld [vmem:[%s2042_s1 + $0xe8] sm:$0xff]   ;;  %s1335_s9 = sshll.u32 %s2050_s25, 3  ;;  %vm327_vm3 = vcmask 1046528   ;;  %vm317_vm5 = vcmask 1041408  }
   0xd   : > { %v1585_v2 = vld [vmem:[%s2042_s1 + $0x38] sm:$0xff]   ;;  %1449 = vmatprep.subr.bf16.mxu1 %v1584_v1  ;;  %v1589_v6 = vld [vmem:[%s2042_s1 + $0x30] sm:$0xff]   ;;  %v1593_v11 = vld [vmem:[%s2042_s1 + $0x28] sm:$0xff]   ;;  %v276_v14 = vshrl.u32 %v275_v9, 7  ;;  %s269_s26 = scalar_lea.vmem %s2041_s0, %s1335_s9  ;;  %vm332_vm7 = vcmask 1045504   ;;  %vm1672_vm8 = vmmov 0   ;;  %s273_s15 = scalar_lea.vmem %s2048_s7, %s1335_s9 }
   0xe   : > { %v1586_v3 = vld [vmem:[%s2042_s1 + $0xb8] sm:$0xff]   ;;  %1428 = vmatpush3.bf16.msra.mxu0 %v1585_v2  ;;  %v1590_v7 = vld [vmem:[%s2042_s1 + $0xb0] sm:$0xff]   ;;  %v1594_v12 = vld [vmem:[%s2042_s1 + $0xa8] sm:$0xff]  }
   0xf   : > { %1450 = vmatpush3.bf16.msra.mxu1 %v1586_v3  ;;  %1429 = vmatprep.subr.bf16.mxu0 %v1587_v4  ;;  %v1595_v13 = vld [vmem:[%s2042_s1 + $0x60] sm:$0xff]   ;;  %v1599_v18 = vld [vmem:[%s2042_s1 + $0x58] sm:$0xff]   ;;  %v281_v19 = vand.u32 7, %v276_v14  ;;  %v1603_v23 = vld [vmem:[%s2042_s1 + $0x50] sm:$0xff]  }
  0x10   : > { %1451 = vmatprep.subr.bf16.mxu1 %v1588_v5  ;;  %v1596_v15 = vld [vmem:[%s2042_s1 + $0xe0] sm:$0xff]   ;;  %v1600_v20 = vld [vmem:[%s2042_s1 + $0xd8] sm:$0xff]   ;;  %v1604_v25 = vld [vmem:[%s2042_s1 + $0xd0] sm:$0xff]  }
  0x11   : > { %v1597_v16 = vld [vmem:[%s2042_s1 + $0x20] sm:$0xff]   ;;  %v1601_v21 = vld [vmem:[%s2042_s1 + $0x18] sm:$0xff]   ;;  %v295_v24 = vadd.s32 4294967295, %v281_v19  ;;  %v301_v26 = vadd.s32 1, %v281_v19  ;;  %v1605_v27 = vld [vmem:[%s2042_s1 + $0x10] sm:$0xff]   ;;  %v289_v32 = vadd.s32 4294967294, %v281_v19 }
  0x12   : > { %1430 = vmatpush3.bf16.msra.mxu0 %v1589_v6  ;;  %v1598_v17 = vld [vmem:[%s2042_s1 + $0xa0] sm:$0xff]   ;;  %v1602_v22 = vld [vmem:[%s2042_s1 + $0x98] sm:$0xff]   ;;  %v1606_v28 = vld [vmem:[%s2042_s1 + $0x90] sm:$0xff]   ;;  %v307_v41 = vadd.s32 2, %v281_v19 }
  0x13   : > { %1452 = vmatpush3.bf16.msra.mxu1 %v1590_v7  ;;  %1431 = vmatprep.subr.bf16.mxu0 %v1591_v8  ;;  %v1607_v29 = vld [vmem:[%s2042_s1 + $0x48] sm:$0xff]   ;;  %vm296_vm0 = vcmp.ge.s32.totalorder %v295_v24, 0  ;;  %vm303_vm2 = vcmp.lt.s32.totalorder %v301_v26, 8  ;;  %v1611_v36 = vld [vmem:[%s2042_s1 + $0x40] sm:$0xff]   ;;  %vm290_vm4 = vcmp.ge.s32.totalorder %v289_v32, 0  ;;  %v1615_v58 = vld [vmem:[%s2042_s1 + $0x138] sm:$0xff]  }
  0x14   : > { %1453 = vmatprep.subr.bf16.mxu1 %v1592_v10  ;;  %v1608_v30 = vld [vmem:[%s2042_s1 + $0xc8] sm:$0xff]   ;;  %v1813_v35 = vsel %vm296_vm0, 1.0, %v1671_v34  ;;  %v1819_v37 = vsel %vm303_vm2, 1.0, %v1671_v34  ;;  %v1612_v38 = vld [vmem:[%s2042_s1 + $0xc0] sm:$0xff]   ;;  %v1836_v45 = vsel %vm290_vm4, 1.0, %v1671_v34  ;;  %vm309_vm6 = vcmp.lt.s32.totalorder %v307_v41, 8 }
  0x15   : > { %v1609_v31 = vld [vmem:[%s2042_s1 + $0x8] sm:$0xff]   ;;  %v1613_v39 = vld [vmem:[%s2042_s1] sm:$0xff]   ;;  %v1849_v59 = vsel %vm309_vm6, 1.0, %v1671_v34  ;;  %v1616_v60 = vld [vmem:[%s2042_s1 + $0x130] sm:$0xff]  }
  0x16   : > { %1432 = vmatpush3.bf16.msra.mxu0 %v1593_v11  ;;  %v1610_v33 = vld [vmem:[%s2042_s1 + $0x88] sm:$0xff]   ;;  %v1614_v40 = vld [vmem:[%s2042_s1 + $0x80] sm:$0xff]   ;;  %v1619_v0 = vld [vmem:[%s2042_s1 + $0x118] sm:$0xff]  }
  0x17   : > { %1454 = vmatpush3.bf16.msra.mxu1 %v1594_v12  ;;  %1433 = vmatprep.subr.bf16.mxu0 %v1595_v13  ;;  %v313_v42 = vld [vmem:[%s269_s26] sm:$0xff]  ;;  %v1617_v62 = vld [vmem:[%s2042_s1 + $0x128] sm:$0xff]   ;;  %v1620_v1 = vld [vmem:[%s2042_s1 + $0x110] sm:$0xff]  }
  0x18   : > { %1455 = vmatprep.subr.bf16.mxu1 %v1596_v15  ;;  %v320_v43 = vrot.slane %v313_v42, 7  ;;  %v325_v44 = vrot.slane %v313_v42, 1  ;;  %v315_v46 = vrot.slane %v313_v42, 6  ;;  %v330_v53 = vrot.slane %v313_v42, 2  ;;  %v1618_v63 = vld [vmem:[%s2042_s1 + $0x120] sm:$0xff]   ;;  %v1621_v2 = vld [vmem:[%s2042_s1 + $0x108] sm:$0xff]  }
  0x19   : > { %v337_v54 = vpack.c.bf16 %v313_v42, %v313_v42  ;;  %v1622_v3 = vld [vmem:[%s2042_s1 + $0x100] sm:$0xff]   ;;  %v1623_v6 = vld [vmem:[%s2045_s4 + $0x78] sm:$0xff]   ;;  %v1627_v10 = vld [vmem:[%s2045_s4 + $0x70] sm:$0xff]  }
  0x1a   : > { %1434 = vmatpush3.bf16.msra.mxu0 %v1597_v16  ;;  %v323_v47 = vsel %vm322_vm1, 0.0, %v320_v43  ;;  %v328_v48 = vsel %vm327_vm3, %v325_v44, 0.0  ;;  %v318_v49 = vsel %vm317_vm5, 0.0, %v315_v46  ;;  %v333_v61 = vsel %vm332_vm7, %v330_v53, 0.0  ;;  %v1624_v7 = vld [vmem:[%s2045_s4 + $0x38] sm:$0xff]   ;;  %v1629_v11 = vld [vmem:[%s2045_s4 + $0xf0] sm:$0xff]  }
  0x1b   : > { %1456 = vmatpush3.bf16.msra.mxu1 %v1598_v17  ;;  %1435 = vmatprep.subr.bf16.mxu0 %v1599_v18  ;;  %v324_v50 = vmul.f32 %v1813_v35, %v323_v47  ;;  %v329_v51 = vmul.f32 %v1819_v37, %v328_v48  ;;  %v319_v52 = vmul.f32 %v1836_v45, %v318_v49  ;;  %v1625_v8 = vld [vmem:[%s2045_s4 + $0xf8] sm:$0xff]   ;;  %v1628_v12 = vld [vmem:[%s2045_s4 + $0x30] sm:$0xff]   ;;  %v1631_v14 = vld [vmem:[%s2045_s4 + $0x68] sm:$0xff]  }
  0x1c   : > { %1457 = vmatprep.subr.bf16.mxu1 %v1600_v20  ;;  %v334_v4 = vmul.f32 %v1849_v59, %v333_v61  ;;  %v1626_v9 = vld [vmem:[%s2045_s4 + $0xb8] sm:$0xff]   ;;  %v1630_v13 = vld [vmem:[%s2045_s4 + $0xb0] sm:$0xff]   ;;  %v1633_v15 = vld [vmem:[%s2045_s4 + $0xe8] sm:$0xff]  }
  0x1d   : > { %v336_v55 = vpack.c.bf16 %v324_v50, %v324_v50  ;;  %v338_v56 = vpack.c.bf16 %v329_v51, %v329_v51  ;;  %v335_v57 = vpack.c.bf16 %v319_v52, %v319_v52  ;;  %v1632_v16 = vld [vmem:[%s2045_s4 + $0x28] sm:$0xff]   ;;  %v1635_v18 = vld [vmem:[%s2045_s4 + $0x60] sm:$0xff]   ;;  %v1641_v24 = vld [vmem:[%s2045_s4 + $0xd8] sm:$0xff]  }
  0x1e   : > { %1436 = vmatpush3.bf16.msra.mxu0 %v1601_v21  ;;  %v339_v5 = vpack.c.bf16 %v334_v4, %v334_v4  ;;  %v1634_v17 = vld [vmem:[%s2045_s4 + $0xa8] sm:$0xff]   ;;  %v1637_v19 = vld [vmem:[%s2045_s4 + $0xe0] sm:$0xff]   ;;  %v1643_v26 = vld [vmem:[%s2045_s4 + $0x50] sm:$0xff]  }
  0x1f   : > { %1458 = vmatpush3.bf16.msra.mxu1 %v1602_v22  ;;  %1437 = vmatprep.subr.bf16.mxu0 %v1603_v23  ;;  %v1636_v20 = vld [vmem:[%s2045_s4 + $0x20] sm:$0xff]   ;;  %v1639_v22 = vld [vmem:[%s2045_s4 + $0x58] sm:$0xff]   ;;  %v1649_v32 = vld [vmem:[%s2045_s4 + $0xc8] sm:$0xff]  }
  0x20   : > { %1459 = vmatprep.subr.bf16.mxu1 %v1604_v25  ;;  %692 = vmatprep.mubr.bf16.mxu0 %v336_v55  ;;  %v1638_v21 = vld [vmem:[%s2045_s4 + $0xa0] sm:$0xff]   ;;  %v1640_v23 = vld [vmem:[%s2045_s4 + $0x18] sm:$0xff]  }
  0x21   : > { %732 = vmatprep.mubr.bf16.mxu1 %v338_v56  ;;  %v1642_v25 = vld [vmem:[%s2045_s4 + $0x98] sm:$0xff]   ;;  %v1382_v56 = vld [vmem:[%s2044_s3] ss:$0 sm:$0xff] }
  0x22   : > { %1438 = vmatpush3.bf16.msra.mxu0 %v1605_v27  ;;  %v1644_v27 = vld [vmem:[%s2045_s4 + $0x10] sm:$0xff]  }
  0x23   : > { %1460 = vmatpush3.bf16.msra.mxu1 %v1606_v28  ;;  %1439 = vmatprep.subr.bf16.mxu0 %v1607_v29  ;;  %v1645_v28 = vld [vmem:[%s2045_s4 + $0xd0] sm:$0xff]  }
  0x24   : > { %1461 = vmatprep.subr.bf16.mxu1 %v1608_v30  ;;  %v1646_v29 = vld [vmem:[%s2045_s4 + $0x90] sm:$0xff]   ;;  %v1647_v30 = vld [vmem:[%s2045_s4 + $0x48] sm:$0xff]  }
  0x26   : > { %1440 = vmatpush3.bf16.msra.mxu0 %v1609_v31  ;;  %v1648_v31 = vld [vmem:[%s2045_s4 + $0x8] sm:$0xff]  }
  0x27   : > { %1462 = vmatpush3.bf16.msra.mxu1 %v1610_v33  ;;  %1441 = vmatprep.subr.bf16.mxu0 %v1611_v36  ;;  %v1650_v33 = vld [vmem:[%s2045_s4 + $0x88] sm:$0xff]   ;;  %v1651_v36 = vld [vmem:[%s2045_s4 + $0x40] sm:$0xff]  }
  0x28   : > { %1463 = vmatprep.subr.bf16.mxu1 %v1612_v38  ;;  %v1653_v38 = vld [vmem:[%s2045_s4 + $0xc0] sm:$0xff]  }
  0x2a   : > { %1442 = vmatpush3.bf16.msra.mxu0 %v1613_v39  ;;  %v1652_v39 = vld [vmem:[%s2045_s4] sm:$0xff]  }
  0x2b   : > { %1464 = vmatpush3.bf16.msra.mxu1 %v1614_v40  ;;  %1533 = vmatprep.subr.bf16.mxu0 %v1671_v34  ;;  %v1654_v40 = vld [vmem:[%s2045_s4 + $0x80] sm:$0xff]  }
  0x2c   : > { %1480 = vmatprep.subr.bf16.mxu1 %v1623_v6 }
  0x2d   : > { %693 = vmatmul.mubr.bf16.vlgmr.msra.gmra.mxu0 %v335_v57 }
  0x2e   : > { %733 = vmatmul.mubr.bf16.vlgmr.msra.gmra.mxu1 %v337_v54  ;;  %1534 = vmatpush3.bf16.msra.mxu0 %v1615_v58  ;;  %v1381_v54 = vld [vmem:[%s2043_s2] ss:$0 sm:$0xff] }
  0x2f   : > { %1549 = vmatprep.mubr.msk.bf16.mxu0 %vm1672_vm8, %v1671_v34  ;;  %1535 = vmatprep.subr.bf16.mxu0 %v1671_v34 }
  0x30   : > { %1481 = vmatpush3.bf16.msra.mxu1 %v1624_v7 }
  0x31   : > { %1482 = vmatprep.subr.bf16.mxu1 %v1627_v10 }
  0x32   : > { %1536 = vmatpush3.bf16.msra.mxu0 %v1616_v60 }
  0x33   : > { %1537 = vmatprep.subr.bf16.mxu0 %v1671_v34 }
  0x34   : > { %1483 = vmatpush3.bf16.msra.mxu1 %v1628_v12  ;;  %v1655_v12 = vld [vmem:[%s2045_s4 + $0x138] sm:$0xff]  }
  0x35   : > { %1484 = vmatprep.subr.bf16.mxu1 %v1631_v14  ;;  %v1659_v14 = vld [vmem:[%s2045_s4 + $0x118] sm:$0xff]  }
  0x36   : > { %1538 = vmatpush3.bf16.msra.mxu0 %v1617_v62 }
  0x37   : > { %1539 = vmatprep.subr.bf16.mxu0 %v1671_v34 }
  0x38   : > { %1485 = vmatpush3.bf16.msra.mxu1 %v1632_v16 }
  0x39   : > { %1486 = vmatprep.subr.bf16.mxu1 %v1635_v18 }
  0x3a   : > { %1540 = vmatpush3.bf16.msra.mxu0 %v1618_v63 }
  0x3b   : > { %1541 = vmatprep.subr.bf16.mxu0 %v1671_v34 }
  0x3c   : > { %1487 = vmatpush3.bf16.msra.mxu1 %v1636_v20 }
  0x3d   : > { %1488 = vmatprep.subr.bf16.mxu1 %v1639_v22 }
  0x3e   : > { %1542 = vmatpush3.bf16.msra.mxu0 %v1619_v0 }
  0x3f   : > { %1543 = vmatprep.subr.bf16.mxu0 %v1671_v34 }
  0x40   : > { %1489 = vmatpush3.bf16.msra.mxu1 %v1640_v23 }
  0x41   : > { %1490 = vmatprep.subr.bf16.mxu1 %v1643_v26 }
  0x42   : > { %1544 = vmatpush3.bf16.msra.mxu0 %v1620_v1 }
  0x43   : > { %1545 = vmatprep.subr.bf16.mxu0 %v1671_v34 }
  0x44   : > { %1491 = vmatpush3.bf16.msra.mxu1 %v1644_v27 }
  0x45   : > { %1492 = vmatprep.subr.bf16.mxu1 %v1647_v30 }
  0x46   : > { %1546 = vmatpush3.bf16.msra.mxu0 %v1621_v2 }
  0x47   : > { %1547 = vmatprep.subr.bf16.mxu0 %v1671_v34 }
  0x48   : > { %1493 = vmatpush3.bf16.msra.mxu1 %v1648_v31 }
  0x49   : > { %1494 = vmatprep.subr.bf16.mxu1 %v1651_v36  ;;  %v1424_v36 = vld [vmem:[%s2047_s6] ss:$0 sm:$0xff] }
  0x4a   : > { %1548 = vmatpush3.bf16.msra.mxu0 %v1622_v3 }
  0x4b   : > { %1502 = vmatprep.subr.bf16.mxu0 %v1625_v8 }
  0x4c   : > { %1495 = vmatpush3.bf16.msra.mxu1 %v1652_v39 }
  0x4d   : > { %1550 = vmatmul.mubr.bf16.vlgmr.msra.gmra.mxu0 %v339_v5  ;;  %1553 = vmatprep.subr.bf16.mxu1 %v1671_v34 }
  0x4e   : > { %1503 = vmatpush3.bf16.msra.mxu0 %v1626_v9 }
  0x4f   : > { %1504 = vmatprep.subr.bf16.mxu0 %v1629_v11 }
  0x52   : > { %1505 = vmatpush3.bf16.msra.mxu0 %v1630_v13 }
  0x53   : > { %1506 = vmatprep.subr.bf16.mxu0 %v1633_v15  ;;  %v1660_v15 = vld [vmem:[%s2045_s4 + $0x110] sm:$0xff]  }
  0x56   : > { %1507 = vmatpush3.bf16.msra.mxu0 %v1634_v17  ;;  %v1661_v17 = vld [vmem:[%s2045_s4 + $0x108] sm:$0xff]  }
  0x57   : > { %1508 = vmatprep.subr.bf16.mxu0 %v1637_v19  ;;  %v1662_v19 = vld [vmem:[%s2045_s4 + $0x100] sm:$0xff]  }
  0x5a   : > { %1509 = vmatpush3.bf16.msra.mxu0 %v1638_v21 }
  0x5b   : > { %1510 = vmatprep.subr.bf16.mxu0 %v1641_v24 }
  0x5e   : > { %1511 = vmatpush3.bf16.msra.mxu0 %v1642_v25 }
  0x5f   : > { %1512 = vmatprep.subr.bf16.mxu0 %v1645_v28 }
  0x62   : > { %1513 = vmatpush3.bf16.msra.mxu0 %v1646_v29 }
  0x63   : > { %1514 = vmatprep.subr.bf16.mxu0 %v1649_v32 }
  0x66   : > { %1515 = vmatpush3.bf16.msra.mxu0 %v1650_v33 }
  0x67   : > { %1516 = vmatprep.subr.bf16.mxu0 %v1653_v38 }
  0x6a   : > { %1517 = vmatpush3.bf16.msra.mxu0 %v1654_v40 }
  0xed   : > { %v1443_v41 = vpop.f32.mrf.mxu0 }
  0xee   : > { %v1465_v42 = vpop.f32.mrf.mxu1 }
  0xef   : > { %v1444_v43 = vpop.f32.mrf.mxu0 }
  0xf0   : > { %v1466_v44 = vpop.f32.mrf.mxu1  ;;  %v1445_v50 = vadd.f32 %v1444_v43, %v1443_v41 }
  0xf1   : > { %v1446_v46 = vpop.f32.mrf.mxu0  ;;  %v1467_v51 = vadd.f32 %v1466_v44, %v1465_v42 }
  0xf2   : > { %v1468_v47 = vpop.f32.mrf.mxu1 }
  0xf3   : > { %v1447_v48 = vpop.f32.mrf.mxu0  ;;  %v735_v52 = vadd.f32 %v1467_v51, %v1445_v50 }
  0xf4   : > { %v1469_v49 = vpop.f32.mrf.mxu1 }
 0x10d   : > { %v774_v53 = vpop.f32.mrf.mxu0 }
 0x10e   : > { %v775_v55 = vadd.f32 %v774_v53, %v735_v52 }
 0x10f   : > { %v1551_v57 = vpop.f32.mrf.mxu0 }
 0x110   : > { %v787_v58 = vmul.f32 %v1381_v54, %v775_v55 }
 0x111   : > { %v777_v60 = vpop.f32.mrf.mxu0 }
 0x112   : > { %v795_v61 = vadd.f32 %v1382_v56, %v787_v58 }
 0x113   : > { %v1552_v62 = vpop.f32.mrf.mxu0 }
 0x114   : > { %v796_v63 = vmax.f32 %v795_v61, 0.0 }
 0x116   : > { %v802_v0 = vrot.slane %v796_v63, 7  ;;  %v806_v1 = vrot.slane %v796_v63, 1  ;;  %v798_v2 = vrot.slane %v796_v63, 6  ;;  %v816_v13 = vpack.c.bf16 %v796_v63, %v796_v63 }
 0x117   : > { %v810_v16 = vrot.slane %v796_v63, 2 }
 0x118   : > { %v804_v3 = vsel %vm322_vm1, 0.0, %v802_v0  ;;  %v808_v4 = vsel %vm327_vm3, %v806_v1, 0.0  ;;  %v800_v5 = vsel %vm317_vm5, 0.0, %v798_v2 }
 0x119   : > { %v805_v6 = vmul.f32 %v1813_v35, %v804_v3  ;;  %v809_v7 = vmul.f32 %v1819_v37, %v808_v4  ;;  %v801_v8 = vmul.f32 %v1836_v45, %v800_v5  ;;  %v1656_v35 = vld [vmem:[%s2045_s4 + $0x130] sm:$0xff]   ;;  %v1657_v37 = vld [vmem:[%s2045_s4 + $0x128] sm:$0xff]   ;;  %v1658_v45 = vld [vmem:[%s2045_s4 + $0x120] sm:$0xff]   ;;  %v812_v18 = vsel %vm332_vm7, %v810_v16, 0.0 }
 0x11a   : > { %v813_v20 = vmul.f32 %v1849_v59, %v812_v18 }
 0x11b   : > { %v815_v9 = vpack.c.bf16 %v805_v6, %v805_v6  ;;  %v817_v10 = vpack.c.bf16 %v809_v7, %v809_v7  ;;  %v814_v11 = vpack.c.bf16 %v801_v8, %v801_v8 }
 0x11c   : > { %v818_v21 = vpack.c.bf16 %v813_v20, %v813_v20 }
 0x11d   : > { %1171 = vmatprep.mubr.bf16.mxu1 %v815_v9  ;;  %1211 = vmatprep.mubr.bf16.mxu0 %v817_v10 }
 0x11e   : > { %1172 = vmatmul.mubr.bf16.vlgmr.msra.gmra.mxu1 %v814_v11  ;;  %1212 = vmatmul.mubr.bf16.vlgmr.msra.gmra.mxu0 %v816_v13 }
 0x11f   : > { %1554 = vmatpush3.bf16.msra.mxu1 %v1655_v12  ;;  %1569 = vmatprep.mubr.msk.bf16.mxu1 %vm1672_vm8, %v1671_v34 }
 0x120   : > { %1555 = vmatprep.subr.bf16.mxu1 %v1671_v34 }
 0x123   : > { %1556 = vmatpush3.bf16.msra.mxu1 %v1656_v35 }
 0x124   : > { %1557 = vmatprep.subr.bf16.mxu1 %v1671_v34 }
 0x127   : > { %1558 = vmatpush3.bf16.msra.mxu1 %v1657_v37 }
 0x128   : > { %1559 = vmatprep.subr.bf16.mxu1 %v1671_v34 }
 0x12b   : > { %1560 = vmatpush3.bf16.msra.mxu1 %v1658_v45 }
 0x12c   : > { %1561 = vmatprep.subr.bf16.mxu1 %v1671_v34 }
 0x12f   : > { %1562 = vmatpush3.bf16.msra.mxu1 %v1659_v14 }
 0x130   : > { %1563 = vmatprep.subr.bf16.mxu1 %v1671_v34 }
 0x133   : > { %1564 = vmatpush3.bf16.msra.mxu1 %v1660_v15 }
 0x134   : > { %1565 = vmatprep.subr.bf16.mxu1 %v1671_v34 }
 0x137   : > { %1566 = vmatpush3.bf16.msra.mxu1 %v1661_v17 }
 0x138   : > { %1567 = vmatprep.subr.bf16.mxu1 %v1671_v34  ;;  %v1423_v34 = vld [vmem:[%s2046_s5] ss:$0 sm:$0xff] }
 0x13b   : > { %1568 = vmatpush3.bf16.msra.mxu1 %v1662_v19 }
 0x13e   : > { %1570 = vmatmul.mubr.bf16.vlgmr.msra.gmra.mxu1 %v818_v21 }
 0x1de   : > { %v1496_v22 = vpop.f32.mrf.mxu1  ;;  %v1518_v23 = vpop.f32.mrf.mxu0 }
 0x1e0   : > { %v1497_v24 = vpop.f32.mrf.mxu1  ;;  %v1519_v25 = vpop.f32.mrf.mxu0 }
 0x1e1   : > { %v1498_v30 = vadd.f32 %v1497_v24, %v1496_v22  ;;  %v1520_v31 = vadd.f32 %v1519_v25, %v1518_v23 }
 0x1e2   : > { %v1499_v26 = vpop.f32.mrf.mxu1  ;;  %v1521_v27 = vpop.f32.mrf.mxu0 }
 0x1e3   : > { %v1214_v32 = vadd.f32 %v1520_v31, %v1498_v30 }
 0x1e4   : > { %v1500_v28 = vpop.f32.mrf.mxu1  ;;  %v1522_v29 = vpop.f32.mrf.mxu0 }
 0x1fe   : > { %v1253_v33 = vpop.f32.mrf.mxu1 }
 0x1ff   : > { %v1254_v59 = vadd.f32 %v1253_v33, %v1214_v32 }
 0x200   : > { %v1571_v38 = vpop.f32.mrf.mxu1 }
 0x201   : > { %v1266_v39 = vmul.f32 %v1423_v34, %v1254_v59 }
 0x202   : > { %v1256_v40 = vpop.f32.mrf.mxu1 }
 0x203   : > { %v1274_v41 = vadd.f32 %v1424_v36, %v1266_v39 }
 0x204   : > { %v1572_v42 = vpop.f32.mrf.mxu1 }
 0x205   : > { %v1275_v43 = vmax.f32 %v1274_v41, 0.0 }
 0x207   : > { %1276 = vst [vmem:[%s273_s15] sm:$0xff] %v1275_v43 }
 0x208 PF: > { %s17_s24 = sadd.s32 1, %s1669_s24  }
 0x209   : > { %p14_p4 = scmp.ge.s32.totalorder %s17_s24, 4  }
 0x20b   :  { %16 = sbr.rel (!%p14_p4) target bundleno = 1 (0x1), region = 78 }

// kernel: intervals_model_forward.9
= control target key start
LH: loop header
LB: loop body
LE: loop exit
PB: predicated region body
PF: predicated region fallthrough
CT: control target
= control target key end

     0   :  { %s1811_s24 = smov 0   ;;  %s2143_s0 = inlined_call_operand.vmem [shape: f32[32,128], index: 0, kind: input, shape index: {}]   ;;  %s2144_s1 = inlined_call_operand.vmem [shape: bf16[640,128], index: 1, kind: input, shape index: {}]   ;;  %s2145_s2 = inlined_call_operand.vmem [shape: f32[1,128], index: 2, kind: input, shape index: {}]   ;;  %s2146_s3 = inlined_call_operand.vmem [shape: f32[1,128], index: 3, kind: input, shape index: {}]   ;;  %s2147_s4 = inlined_call_operand.vmem [shape: bf16[640,128], index: 4, kind: input, shape index: {}]   ;;  %s2148_s5 = inlined_call_operand.vmem [shape: f32[1,128], index: 5, kind: input, shape index: {}]   ;;  %s2149_s6 = inlined_call_operand.vmem [shape: f32[1,128], index: 6, kind: input, shape index: {}]   ;;  %s2150_s7 = inlined_call_operand.vmem [shape: f32[32,128], index: 7, kind: output, shape index: {}]  }
   0x1 LB: > { %s1426_s25 = sadd.s32 4294967295, %s1767_s24   ;;  %p1430_p0 = scmp.ge.s32.totalorder %s1767_s24, 1  ;;  %s1767_s24 = sphi %s1811_s24, %s17_s24  }
   0x2   : > { %p238_p1 = scmp.lt.s32.totalorder %s1767_s24, 3 }
   0x4   : > { %p239_p2 = pnand %p1430_p0, %p238_p1 }
   0x5   : > { %s1431_s23 = sshll.u32 (!%p239_p2), %s1426_s25, 1 }
   0x6   : > { %242 = sbr.rel (%p239_p2) target bundleno = 526 (0x20e), region = 48  ;;  %p271_p3 = scmp.lt.s32.totalorder (!%p239_p2), %s1431_s23, 3 }
   0xb   : > { %v1681_v0 = vld [vmem:[%s2144_s1 + $0x78] sm:$0xff]   ;;  %v1685_v4 = vld [vmem:[%s2144_s1 + $0x70] sm:$0xff]   ;;  %v1689_v8 = vld [vmem:[%s2144_s1 + $0x68] sm:$0xff]   ;;  %v283_v10 = vlaneseq  ;;  %s2152_s23 = smov (!%p271_p3, %s1431_s23), 3  ;;  %vm371_vm1 = vcmask 1040384   ;;  %v1769_v34 = vmov 0.0  }
   0xc   : > { %v1682_v1 = vld [vmem:[%s2144_s1 + $0xf8] sm:$0xff]   ;;  %1525 = vmatprep.subr.bf16.mxu0 %v1681_v0  ;;  %v1686_v5 = vld [vmem:[%s2144_s1 + $0xf0] sm:$0xff]   ;;  %v1690_v9 = vld [vmem:[%s2144_s1 + $0xe8] sm:$0xff]   ;;  %s1432_s27 = sshll.u32 %s2152_s23, 3  ;;  %vm380_vm2 = vcmask 1046528   ;;  %vm362_vm5 = vcmask 1041408  }
   0xd   : > { %v1683_v2 = vld [vmem:[%s2144_s1 + $0x38] sm:$0xff]   ;;  %1547 = vmatprep.subr.bf16.mxu1 %v1682_v1  ;;  %v1687_v6 = vld [vmem:[%s2144_s1 + $0x30] sm:$0xff]   ;;  %v1691_v11 = vld [vmem:[%s2144_s1 + $0x28] sm:$0xff]   ;;  %v284_v15 = vshrl.u32 %v283_v10, 7  ;;  %s274_s28 = scalar_lea.vmem %s2143_s0, %s1432_s27  ;;  %vm389_vm7 = vcmask 1045504   ;;  %vm1770_vm8 = vmmov 0   ;;  %s280_s15 = scalar_lea.vmem %s2150_s7, %s1432_s27 }
   0xe   : > { %v1684_v3 = vld [vmem:[%s2144_s1 + $0xb8] sm:$0xff]   ;;  %1526 = vmatpush3.bf16.msra.mxu0 %v1683_v2  ;;  %v1688_v7 = vld [vmem:[%s2144_s1 + $0xb0] sm:$0xff]   ;;  %v1692_v12 = vld [vmem:[%s2144_s1 + $0xa8] sm:$0xff]  }
   0xf   : > { %1548 = vmatpush3.bf16.msra.mxu1 %v1684_v3  ;;  %1527 = vmatprep.subr.bf16.mxu0 %v1685_v4  ;;  %v1693_v13 = vld [vmem:[%s2144_s1 + $0x60] sm:$0xff]   ;;  %v290_v18 = vand.u32 15, %v284_v15  ;;  %v1697_v19 = vld [vmem:[%s2144_s1 + $0x58] sm:$0xff]   ;;  %v285_v21 = vadd.s32 8, %v284_v15  ;;  %v1701_v25 = vld [vmem:[%s2144_s1 + $0x50] sm:$0xff]  }
  0x10   : > { %1549 = vmatprep.subr.bf16.mxu1 %v1686_v5  ;;  %v1694_v14 = vld [vmem:[%s2144_s1 + $0xe0] sm:$0xff]   ;;  %v1698_v20 = vld [vmem:[%s2144_s1 + $0xd8] sm:$0xff]   ;;  %v1702_v26 = vld [vmem:[%s2144_s1 + $0xd0] sm:$0xff]  }
  0x11   : > { %v1695_v16 = vld [vmem:[%s2144_s1 + $0x20] sm:$0xff]   ;;  %v1699_v22 = vld [vmem:[%s2144_s1 + $0x18] sm:$0xff]   ;;  %v322_v24 = vadd.s32 4294967295, %v290_v18  ;;  %v297_v27 = vand.u32 15, %v285_v21  ;;  %v1703_v28 = vld [vmem:[%s2144_s1 + $0x10] sm:$0xff]   ;;  %v310_v37 = vadd.s32 4294967294, %v290_v18 }
  0x12   : > { %1528 = vmatpush3.bf16.msra.mxu0 %v1687_v6  ;;  %v1696_v17 = vld [vmem:[%s2144_s1 + $0xa0] sm:$0xff]   ;;  %v1700_v23 = vld [vmem:[%s2144_s1 + $0x98] sm:$0xff]   ;;  %v1704_v29 = vld [vmem:[%s2144_s1 + $0x90] sm:$0xff]  }
  0x13   : > { %1550 = vmatpush3.bf16.msra.mxu1 %v1688_v7  ;;  %1529 = vmatprep.subr.bf16.mxu0 %v1689_v8  ;;  %vm324_vm0 = vcmp.ge.s32.totalorder %v322_v24, 0  ;;  %v1705_v30 = vld [vmem:[%s2144_s1 + $0x48] sm:$0xff]   ;;  %v335_v32 = vadd.s32 1, %v297_v27  ;;  %v1709_v38 = vld [vmem:[%s2144_s1 + $0x40] sm:$0xff]   ;;  %v347_v41 = vadd.s32 2, %v297_v27  ;;  %vm312_vm4 = vcmp.ge.s32.totalorder %v310_v37, 0 }
  0x14   : > { %1551 = vmatprep.subr.bf16.mxu1 %v1690_v9  ;;  %v1706_v31 = vld [vmem:[%s2144_s1 + $0xc8] sm:$0xff]   ;;  %v1904_v35 = vsel %vm324_vm0, 1.0, %v1769_v34  ;;  %v1710_v39 = vld [vmem:[%s2144_s1 + $0xc0] sm:$0xff]   ;;  %v1931_v50 = vsel %vm312_vm4, 1.0, %v1769_v34  ;;  %v1713_v1 = vld [vmem:[%s2144_s1 + $0x138] sm:$0xff]  }
  0x15   : > { %v1707_v33 = vld [vmem:[%s2144_s1 + $0x8] sm:$0xff]   ;;  %vm339_vm3 = vcmp.lt.s32.totalorder %v335_v32, 16  ;;  %v1711_v40 = vld [vmem:[%s2144_s1] sm:$0xff]   ;;  %vm351_vm6 = vcmp.lt.s32.totalorder %v347_v41, 16  ;;  %v1714_v5 = vld [vmem:[%s2144_s1 + $0x130] sm:$0xff]  }
  0x16   : > { %1530 = vmatpush3.bf16.msra.mxu0 %v1691_v11  ;;  %v1708_v36 = vld [vmem:[%s2144_s1 + $0x88] sm:$0xff]   ;;  %v1712_v42 = vld [vmem:[%s2144_s1 + $0x80] sm:$0xff]   ;;  %v1927_v45 = vsel %vm339_vm3, 1.0, %v1769_v34  ;;  %v1946_v4 = vsel %vm351_vm6, 1.0, %v1769_v34  ;;  %v1717_v10 = vld [vmem:[%s2144_s1 + $0x118] sm:$0xff]  }
  0x17   : > { %1552 = vmatpush3.bf16.msra.mxu1 %v1692_v12  ;;  %1531 = vmatprep.subr.bf16.mxu0 %v1693_v13  ;;  %v358_v43 = vld [vmem:[%s274_s28] sm:$0xff]  ;;  %v359_v44 = vld [vmem:[%s274_s28 + $0x8] sm:$0xff]  ;;  %v1718_v11 = vld [vmem:[%s2144_s1 + $0x110] sm:$0xff]  }
  0x18   : > { %1553 = vmatprep.subr.bf16.mxu1 %v1694_v14  ;;  %v372_v46 = vrot.slane %v358_v43, 7  ;;  %v373_v47 = vrot.slane %v359_v44, 7  ;;  %v381_v48 = vrot.slane %v358_v43, 1  ;;  %v382_v49 = vrot.slane %v359_v44, 1  ;;  %v1715_v8 = vld [vmem:[%s2144_s1 + $0x128] sm:$0xff]   ;;  %v1716_v9 = vld [vmem:[%s2144_s1 + $0x120] sm:$0xff]  }
  0x19   : > { %v363_v51 = vrot.slane %v358_v43, 6  ;;  %v364_v52 = vrot.slane %v359_v44, 6  ;;  %v400_v62 = vpack.c.bf16 %v359_v44, %v358_v43  ;;  %v391_v2 = vrot.slane %v359_v44, 2  ;;  %v1719_v12 = vld [vmem:[%s2144_s1 + $0x108] sm:$0xff]   ;;  %v1720_v13 = vld [vmem:[%s2144_s1 + $0x100] sm:$0xff]   ;;  %v1722_v18 = vld [vmem:[%s2147_s4 + $0x38] sm:$0xff]  }
  0x1a   : > { %1532 = vmatpush3.bf16.msra.mxu0 %v1695_v16  ;;  %v374_v53 = vsel %vm371_vm1, %v372_v46, %v373_v47  ;;  %v377_v54 = vsel %vm371_vm1, 0.0, %v372_v46  ;;  %v383_v55 = vsel %vm380_vm2, %v381_v48, %v382_v49  ;;  %v386_v56 = vsel %vm380_vm2, %v382_v49, 0.0  ;;  %v1725_v21 = vld [vmem:[%s2147_s4 + $0xb8] sm:$0xff]   ;;  %v1729_v24 = vld [vmem:[%s2147_s4 + $0xb0] sm:$0xff]   ;;  %v1730_v27 = vld [vmem:[%s2147_s4 + $0x28] sm:$0xff]  }
  0x1b   : > { %1554 = vmatpush3.bf16.msra.mxu1 %v1696_v17  ;;  %1533 = vmatprep.subr.bf16.mxu0 %v1697_v19  ;;  %v378_v57 = vmul.f32 %v1904_v35, %v377_v54  ;;  %v388_v58 = vmul.f32 %v1927_v45, %v386_v56  ;;  %v365_v59 = vsel %vm362_vm5, %v363_v51, %v364_v52  ;;  %v368_v60 = vsel %vm362_vm5, 0.0, %v363_v51  ;;  %v1721_v17 = vld [vmem:[%s2147_s4 + $0x78] sm:$0xff]   ;;  %v1743_v41 = vld [vmem:[%s2147_s4 + $0xd0] sm:$0xff]   ;;  %v1746_v44 = vld [vmem:[%s2147_s4 + $0x8] sm:$0xff]  }
  0x1c   : > { %1555 = vmatprep.subr.bf16.mxu1 %v1698_v20  ;;  %v369_v61 = vmul.f32 %v1931_v50, %v368_v60  ;;  %v390_v6 = vrot.slane %v358_v43, 2  ;;  %v395_v7 = vsel %vm389_vm7, %v391_v2, 0.0  ;;  %v1723_v19 = vld [vmem:[%s2147_s4 + $0xf8] sm:$0xff]   ;;  %v1724_v20 = vld [vmem:[%s2147_s4 + $0x70] sm:$0xff]   ;;  %v1747_v46 = vld [vmem:[%s2147_s4 + $0xc8] sm:$0xff]  }
  0x1d   : > { %v399_v63 = vpack.c.bf16 %v374_v53, %v378_v57  ;;  %v401_v0 = vpack.c.bf16 %v388_v58, %v383_v55  ;;  %v397_v14 = vmul.f32 %v1946_v4, %v395_v7  ;;  %v1736_v32 = vld [vmem:[%s2147_s4 + $0x58] sm:$0xff]   ;;  %v1745_v43 = vld [vmem:[%s2147_s4 + $0x90] sm:$0xff]   ;;  %v1748_v47 = vld [vmem:[%s2147_s4 + $0x40] sm:$0xff]  }
  0x1e   : > { %1534 = vmatpush3.bf16.msra.mxu0 %v1699_v22  ;;  %v398_v3 = vpack.c.bf16 %v365_v59, %v369_v61  ;;  %v392_v15 = vsel %vm389_vm7, %v390_v6, %v391_v2  ;;  %v1727_v22 = vld [vmem:[%s2147_s4 + $0xf0] sm:$0xff]   ;;  %v1739_v37 = vld [vmem:[%s2147_s4 + $0xd8] sm:$0xff]   ;;  %v1749_v48 = vld [vmem:[%s2147_s4 + $0x88] sm:$0xff]  }
  0x1f   : > { %1556 = vmatpush3.bf16.msra.mxu1 %v1700_v23  ;;  %1535 = vmatprep.subr.bf16.mxu0 %v1701_v25  ;;  %v402_v16 = vpack.c.bf16 %v397_v14, %v392_v15  ;;  %v1726_v23 = vld [vmem:[%s2147_s4 + $0x30] sm:$0xff]   ;;  %v1728_v25 = vld [vmem:[%s2147_s4 + $0x68] sm:$0xff]   ;;  %v1750_v49 = vld [vmem:[%s2147_s4] sm:$0xff]  }
  0x20   : > { %1557 = vmatprep.subr.bf16.mxu1 %v1702_v26  ;;  %755 = vmatprep.mubr.bf16.mxu0 %v399_v63  ;;  %v1731_v26 = vld [vmem:[%s2147_s4 + $0xe8] sm:$0xff]   ;;  %v1751_v51 = vld [vmem:[%s2147_s4 + $0xc0] sm:$0xff]  }
  0x21   : > { %796 = vmatprep.mubr.bf16.mxu1 %v401_v0  ;;  %v1752_v52 = vld [vmem:[%s2147_s4 + $0x80] sm:$0xff]  }
  0x22   : > { %1536 = vmatpush3.bf16.msra.mxu0 %v1703_v28  ;;  %v1733_v28 = vld [vmem:[%s2147_s4 + $0xa8] sm:$0xff]   ;;  %v1480_v6 = vld [vmem:[%s2146_s3] ss:$0 sm:$0xff] }
  0x23   : > { %1558 = vmatpush3.bf16.msra.mxu1 %v1704_v29  ;;  %1537 = vmatprep.subr.bf16.mxu0 %v1705_v30  ;;  %v1732_v29 = vld [vmem:[%s2147_s4 + $0x60] sm:$0xff]  }
  0x24   : > { %1559 = vmatprep.subr.bf16.mxu1 %v1706_v31  ;;  %v1734_v30 = vld [vmem:[%s2147_s4 + $0x20] sm:$0xff]  }
  0x25   : > { %v1735_v31 = vld [vmem:[%s2147_s4 + $0xe0] sm:$0xff]  }
  0x26   : > { %1538 = vmatpush3.bf16.msra.mxu0 %v1707_v33  ;;  %v1737_v33 = vld [vmem:[%s2147_s4 + $0xa0] sm:$0xff]  }
  0x27   : > { %1560 = vmatpush3.bf16.msra.mxu1 %v1708_v36  ;;  %1539 = vmatprep.subr.bf16.mxu0 %v1709_v38  ;;  %v1738_v36 = vld [vmem:[%s2147_s4 + $0x18] sm:$0xff]   ;;  %v1740_v38 = vld [vmem:[%s2147_s4 + $0x50] sm:$0xff]  }
  0x28   : > { %1561 = vmatprep.subr.bf16.mxu1 %v1710_v39  ;;  %v1741_v39 = vld [vmem:[%s2147_s4 + $0x98] sm:$0xff]  }
  0x2a   : > { %1540 = vmatpush3.bf16.msra.mxu0 %v1711_v40  ;;  %v1742_v40 = vld [vmem:[%s2147_s4 + $0x10] sm:$0xff]  }
  0x2b   : > { %1562 = vmatpush3.bf16.msra.mxu1 %v1712_v42  ;;  %1631 = vmatprep.subr.bf16.mxu0 %v1769_v34  ;;  %v1744_v42 = vld [vmem:[%s2147_s4 + $0x48] sm:$0xff]  }
  0x2c   : > { %1578 = vmatprep.subr.bf16.mxu1 %v1721_v17 }
  0x2d   : > { %756 = vmatmul.mubr.bf16.vlgmr.msra.gmra.mxu0 %v398_v3  ;;  %v1479_v3 = vld [vmem:[%s2145_s2] ss:$0 sm:$0xff] }
  0x2e   : > { %797 = vmatmul.mubr.bf16.vlgmr.msra.gmra.mxu1 %v400_v62  ;;  %1632 = vmatpush3.bf16.msra.mxu0 %v1713_v1 }
  0x2f   : > { %1647 = vmatprep.mubr.msk.bf16.mxu0 %vm1770_vm8, %v1769_v34  ;;  %1633 = vmatprep.subr.bf16.mxu0 %v1769_v34 }
  0x30   : > { %1579 = vmatpush3.bf16.msra.mxu1 %v1722_v18 }
  0x31   : > { %1580 = vmatprep.subr.bf16.mxu1 %v1724_v20 }
  0x32   : > { %1634 = vmatpush3.bf16.msra.mxu0 %v1714_v5 }
  0x33   : > { %1635 = vmatprep.subr.bf16.mxu0 %v1769_v34 }
  0x34   : > { %1581 = vmatpush3.bf16.msra.mxu1 %v1726_v23 }
  0x35   : > { %1582 = vmatprep.subr.bf16.mxu1 %v1728_v25 }
  0x36   : > { %1636 = vmatpush3.bf16.msra.mxu0 %v1715_v8 }
  0x37   : > { %1637 = vmatprep.subr.bf16.mxu0 %v1769_v34 }
  0x38   : > { %1583 = vmatpush3.bf16.msra.mxu1 %v1730_v27 }
  0x39   : > { %1584 = vmatprep.subr.bf16.mxu1 %v1732_v29 }
  0x3a   : > { %1638 = vmatpush3.bf16.msra.mxu0 %v1716_v9 }
  0x3b   : > { %1639 = vmatprep.subr.bf16.mxu0 %v1769_v34 }
  0x3c   : > { %1585 = vmatpush3.bf16.msra.mxu1 %v1734_v30 }
  0x3d   : > { %1586 = vmatprep.subr.bf16.mxu1 %v1736_v32 }
  0x3e   : > { %1640 = vmatpush3.bf16.msra.mxu0 %v1717_v10 }
  0x3f   : > { %1641 = vmatprep.subr.bf16.mxu0 %v1769_v34 }
  0x40   : > { %1587 = vmatpush3.bf16.msra.mxu1 %v1738_v36 }
  0x41   : > { %1588 = vmatprep.subr.bf16.mxu1 %v1740_v38  ;;  %v1754_v38 = vld [vmem:[%s2147_s4 + $0x130] sm:$0xff]  }
  0x42   : > { %1642 = vmatpush3.bf16.msra.mxu0 %v1718_v11 }
  0x43   : > { %1643 = vmatprep.subr.bf16.mxu0 %v1769_v34 }
  0x44   : > { %1589 = vmatpush3.bf16.msra.mxu1 %v1742_v40  ;;  %v1757_v40 = vld [vmem:[%s2147_s4 + $0x118] sm:$0xff]  }
  0x45   : > { %1590 = vmatprep.subr.bf16.mxu1 %v1744_v42 }
  0x46   : > { %1644 = vmatpush3.bf16.msra.mxu0 %v1719_v12 }
  0x47   : > { %1645 = vmatprep.subr.bf16.mxu0 %v1769_v34 }
  0x48   : > { %1591 = vmatpush3.bf16.msra.mxu1 %v1746_v44 }
  0x49   : > { %1592 = vmatprep.subr.bf16.mxu1 %v1748_v47 }
  0x4a   : > { %1646 = vmatpush3.bf16.msra.mxu0 %v1720_v13 }
  0x4b   : > { %1600 = vmatprep.subr.bf16.mxu0 %v1723_v19 }
  0x4c   : > { %1593 = vmatpush3.bf16.msra.mxu1 %v1750_v49 }
  0x4d   : > { %1648 = vmatmul.mubr.bf16.vlgmr.msra.gmra.mxu0 %v402_v16  ;;  %1651 = vmatprep.subr.bf16.mxu1 %v1769_v34 }
  0x4e   : > { %1601 = vmatpush3.bf16.msra.mxu0 %v1725_v21 }
  0x4f   : > { %1602 = vmatprep.subr.bf16.mxu0 %v1727_v22 }
  0x52   : > { %1603 = vmatpush3.bf16.msra.mxu0 %v1729_v24 }
  0x53   : > { %1604 = vmatprep.subr.bf16.mxu0 %v1731_v26 }
  0x56   : > { %1605 = vmatpush3.bf16.msra.mxu0 %v1733_v28 }
  0x57   : > { %1606 = vmatprep.subr.bf16.mxu0 %v1735_v31 }
  0x5a   : > { %1607 = vmatpush3.bf16.msra.mxu0 %v1737_v33  ;;  %v1753_v33 = vld [vmem:[%s2147_s4 + $0x138] sm:$0xff]  }
  0x5b   : > { %1608 = vmatprep.subr.bf16.mxu0 %v1739_v37 }
  0x5e   : > { %1609 = vmatpush3.bf16.msra.mxu0 %v1741_v39  ;;  %v1756_v39 = vld [vmem:[%s2147_s4 + $0x120] sm:$0xff]  }
  0x5f   : > { %1610 = vmatprep.subr.bf16.mxu0 %v1743_v41  ;;  %v1758_v41 = vld [vmem:[%s2147_s4 + $0x110] sm:$0xff]  }
  0x62   : > { %1611 = vmatpush3.bf16.msra.mxu0 %v1745_v43  ;;  %v1759_v43 = vld [vmem:[%s2147_s4 + $0x108] sm:$0xff]  }
  0x63   : > { %1612 = vmatprep.subr.bf16.mxu0 %v1747_v46  ;;  %v1760_v46 = vld [vmem:[%s2147_s4 + $0x100] sm:$0xff]  }
  0x66   : > { %1613 = vmatpush3.bf16.msra.mxu0 %v1749_v48 }
  0x67   : > { %1614 = vmatprep.subr.bf16.mxu0 %v1751_v51 }
  0x6a   : > { %1615 = vmatpush3.bf16.msra.mxu0 %v1752_v52 }
  0xed   : > { %v1541_v53 = vpop.f32.mrf.mxu0 }
  0xee   : > { %v1563_v54 = vpop.f32.mrf.mxu1 }
  0xef   : > { %v1542_v55 = vpop.f32.mrf.mxu0 }
  0xf0   : > { %v1564_v56 = vpop.f32.mrf.mxu1  ;;  %v1543_v59 = vadd.f32 %v1542_v55, %v1541_v53 }
  0xf1   : > { %v1544_v57 = vpop.f32.mrf.mxu0  ;;  %v1565_v60 = vadd.f32 %v1564_v56, %v1563_v54 }
  0xf2   : > { %v1566_v58 = vpop.f32.mrf.mxu1 }
  0xf3   : > { %v1545_v61 = vpop.f32.mrf.mxu0  ;;  %v799_v1 = vadd.f32 %v1565_v60, %v1543_v59 }
  0xf4   : > { %v1567_v62 = vpop.f32.mrf.mxu1  ;;  %v1546_v63 = vadd.f32 %v1545_v61, %v1544_v57 }
  0xf5   : > { %v1568_v0 = vadd.f32 %v1567_v62, %v1566_v58 }
  0xf7   : > { %v802_v9 = vadd.f32 %v1568_v0, %v1546_v63  ;;  %v1521_v63 = vld [vmem:[%s2148_s5] ss:$0 sm:$0xff] }
 0x10d   : > { %v839_v2 = vpop.f32.mrf.mxu0 }
 0x10e   : > { %v840_v5 = vadd.f32 %v839_v2, %v799_v1  ;;  %v1522_v2 = vld [vmem:[%s2149_s6] ss:$0 sm:$0xff] }
 0x10f   : > { %v1649_v7 = vpop.f32.mrf.mxu0 }
 0x110   : > { %v853_v8 = vmul.f32 %v1479_v3, %v840_v5 }
 0x111   : > { %v842_v10 = vpop.f32.mrf.mxu0 }
 0x112   : > { %v862_v11 = vadd.f32 %v1480_v6, %v853_v8  ;;  %v843_v12 = vadd.f32 %v842_v10, %v802_v9 }
 0x113   : > { %v1650_v13 = vpop.f32.mrf.mxu0 }
 0x114   : > { %v864_v14 = vmax.f32 %v862_v11, 0.0  ;;  %v854_v15 = vmul.f32 %v1479_v3, %v843_v12 }
 0x116   : > { %v863_v16 = vadd.f32 %v1480_v6, %v854_v15  ;;  %v876_v17 = vrot.slane %v864_v14, 7  ;;  %v868_v18 = vrot.slane %v864_v14, 6  ;;  %v884_v29 = vrot.slane %v864_v14, 1 }
 0x117   : > { %v892_v48 = vrot.slane %v864_v14, 2 }
 0x118   : > { %v865_v19 = vmax.f32 %v863_v16, 0.0  ;;  %v881_v20 = vsel %vm371_vm1, 0.0, %v876_v17  ;;  %v873_v21 = vsel %vm362_vm5, 0.0, %v868_v18 }
 0x119   : > { %v882_v25 = vmul.f32 %v1904_v35, %v881_v20  ;;  %v874_v26 = vmul.f32 %v1931_v50, %v873_v21 }
 0x11a   : > { %v877_v22 = vrot.slane %v865_v19, 7  ;;  %v869_v23 = vrot.slane %v865_v19, 6  ;;  %v885_v24 = vrot.slane %v865_v19, 1  ;;  %v902_v50 = vpack.c.bf16 %v865_v19, %v864_v14 }
 0x11b   : > { %v893_v42 = vrot.slane %v865_v19, 2 }
 0x11c   : > { %v878_v27 = vsel %vm371_vm1, %v876_v17, %v877_v22  ;;  %v870_v28 = vsel %vm362_vm5, %v868_v18, %v869_v23  ;;  %v889_v30 = vsel %vm380_vm2, %v885_v24, 0.0  ;;  %v886_v37 = vsel %vm380_vm2, %v884_v29, %v885_v24 }
 0x11d   : > { %v901_v31 = vpack.c.bf16 %v878_v27, %v882_v25  ;;  %v900_v32 = vpack.c.bf16 %v870_v28, %v874_v26  ;;  %v891_v36 = vmul.f32 %v1927_v45, %v889_v30  ;;  %v1755_v45 = vld [vmem:[%s2147_s4 + $0x128] sm:$0xff]   ;;  %v897_v44 = vsel %vm389_vm7, %v893_v42, 0.0 }
 0x11e   : > { %v899_v47 = vmul.f32 %v1946_v4, %v897_v44  ;;  %v894_v49 = vsel %vm389_vm7, %v892_v48, %v893_v42 }
 0x11f   : > { %1257 = vmatprep.mubr.bf16.mxu1 %v901_v31  ;;  %v903_v35 = vpack.c.bf16 %v891_v36, %v886_v37 }
 0x120   : > { %1258 = vmatmul.mubr.bf16.vlgmr.msra.gmra.mxu1 %v900_v32  ;;  %v904_v51 = vpack.c.bf16 %v899_v47, %v894_v49 }
 0x121   : > { %1652 = vmatpush3.bf16.msra.mxu1 %v1753_v33  ;;  %1298 = vmatprep.mubr.bf16.mxu0 %v903_v35 }
 0x122   : > { %1299 = vmatmul.mubr.bf16.vlgmr.msra.gmra.mxu0 %v902_v50  ;;  %1653 = vmatprep.subr.bf16.mxu1 %v1769_v34 }
 0x123   : > { %1667 = vmatprep.mubr.msk.bf16.mxu1 %vm1770_vm8, %v1769_v34 }
 0x125   : > { %1654 = vmatpush3.bf16.msra.mxu1 %v1754_v38 }
 0x126   : > { %1655 = vmatprep.subr.bf16.mxu1 %v1769_v34 }
 0x129   : > { %1656 = vmatpush3.bf16.msra.mxu1 %v1755_v45 }
 0x12a   : > { %1657 = vmatprep.subr.bf16.mxu1 %v1769_v34 }
 0x12d   : > { %1658 = vmatpush3.bf16.msra.mxu1 %v1756_v39 }
 0x12e   : > { %1659 = vmatprep.subr.bf16.mxu1 %v1769_v34 }
 0x131   : > { %1660 = vmatpush3.bf16.msra.mxu1 %v1757_v40 }
 0x132   : > { %1661 = vmatprep.subr.bf16.mxu1 %v1769_v34 }
 0x135   : > { %1662 = vmatpush3.bf16.msra.mxu1 %v1758_v41 }
 0x136   : > { %1663 = vmatprep.subr.bf16.mxu1 %v1769_v34 }
 0x139   : > { %1664 = vmatpush3.bf16.msra.mxu1 %v1759_v43 }
 0x13a   : > { %1665 = vmatprep.subr.bf16.mxu1 %v1769_v34 }
 0x13d   : > { %1666 = vmatpush3.bf16.msra.mxu1 %v1760_v46 }
 0x140   : > { %1668 = vmatmul.mubr.bf16.vlgmr.msra.gmra.mxu1 %v904_v51 }
 0x1e0   : > { %v1594_v53 = vpop.f32.mrf.mxu1 }
 0x1e2   : > { %v1616_v52 = vpop.f32.mrf.mxu0  ;;  %v1595_v55 = vpop.f32.mrf.mxu1 }
 0x1e3   : > { %v1596_v60 = vadd.f32 %v1595_v55, %v1594_v53 }
 0x1e4   : > { %v1617_v54 = vpop.f32.mrf.mxu0  ;;  %v1597_v57 = vpop.f32.mrf.mxu1 }
 0x1e5   : > { %v1618_v58 = vadd.f32 %v1617_v54, %v1616_v52 }
 0x1e6   : > { %v1619_v56 = vpop.f32.mrf.mxu0  ;;  %v1598_v61 = vpop.f32.mrf.mxu1 }
 0x1e7   : > { %v1301_v62 = vadd.f32 %v1618_v58, %v1596_v60  ;;  %v1599_v0 = vadd.f32 %v1598_v61, %v1597_v57 }
 0x1e8   : > { %v1620_v59 = vpop.f32.mrf.mxu0 }
 0x1e9   : > { %v1621_v34 = vadd.f32 %v1620_v59, %v1619_v56 }
 0x1eb   : > { %v1304_v6 = vadd.f32 %v1621_v34, %v1599_v0 }
 0x200   : > { %v1341_v4 = vpop.f32.mrf.mxu1 }
 0x201   : > { %v1342_v1 = vadd.f32 %v1341_v4, %v1301_v62 }
 0x202   : > { %v1669_v3 = vpop.f32.mrf.mxu1 }
 0x203   : > { %v1355_v5 = vmul.f32 %v1521_v63, %v1342_v1 }
 0x204   : > { %v1344_v7 = vpop.f32.mrf.mxu1 }
 0x205   : > { %v1364_v8 = vadd.f32 %v1522_v2, %v1355_v5  ;;  %v1345_v9 = vadd.f32 %v1344_v7, %v1304_v6 }
 0x206   : > { %v1670_v10 = vpop.f32.mrf.mxu1 }
 0x207   : > { %v1366_v11 = vmax.f32 %v1364_v8, 0.0  ;;  %v1356_v12 = vmul.f32 %v1521_v63, %v1345_v9 }
 0x209   : > { %1368 = vst [vmem:[%s280_s15] sm:$0xff] %v1366_v11  ;;  %v1365_v13 = vadd.f32 %v1522_v2, %v1356_v12 }
 0x20b   : > { %v1367_v14 = vmax.f32 %v1365_v13, 0.0 }
 0x20d   : > { %1369 = vst [vmem:[%s280_s15 + $0x8] sm:$0xff] %v1367_v14 }
 0x20e PF: > { %s17_s24 = sadd.s32 1, %s1767_s24  }
 0x20f   : > { %p14_p4 = scmp.ge.s32.totalorder %s17_s24, 4  }
 0x211   :  { %16 = sbr.rel (!%p14_p4) target bundleno = 1 (0x1), region = 78 }

</bundles_post_ra>
